<compile_context>
chip_gen: v7x
topology: tpu7x:2x2x1
jax: 0.10.0
libtpu: 0.0.40
codegen_flags: <defaults>
</compile_context>

<pallas_src>
import functools
import math

import jax
import jax.numpy as jnp
from jax import lax
from jax.experimental import pallas as pl
from jax.experimental.pallas import tpu as pltpu

LN_EPS = 1e-5          # nn.LayerNorm default
BF16 = jnp.bfloat16
F32 = jnp.float32


def _layer_norm(x, gamma, beta):
    x = x.astype(F32)
    mu = jnp.mean(x, axis=-1, keepdims=True)
    xc = x - mu
    var = jnp.mean(xc * xc, axis=-1, keepdims=True)
    return xc * lax.rsqrt(var + LN_EPS) * gamma + beta


def _gelu(x):
    # TODO(synk): PyTorch F.gelu defaults to the exact erf form; the tanh
    # approximation (used in kernel and reference) differs by < ~1e-3.
    c = math.sqrt(2.0 / math.pi)
    return 0.5 * x * (1.0 + jnp.tanh(c * (x + 0.044715 * x * x * x)))


# -----------------------------------------------------------------------------
# One-time parameter preparation (review item: no per-call weight casts,
# fold 1/sqrt(head_dim) into the Q projection).
# -----------------------------------------------------------------------------
def prepare_params(params, num_heads):
    E = params["token_embed"].shape[1]
    head_dim = E // num_heads
    scale = 1.0 / math.sqrt(head_dim)
    prepped = {
        "token_embed": params["token_embed"],
        "pos_embed": params["pos_embed"],
        "lnf_g": params["lnf_g"], "lnf_b": params["lnf_b"],
        "w_h1": params["w_h1"], "b_h1": params["b_h1"],
        "w_h2": params["w_h2"], "b_h2": params["b_h2"],
        "layers": [],
    }
    for lp in params["layers"]:
        Fh = lp["w_ff1"].shape[1]
        w_qkv = lp["w_qkv"].at[:, :E].multiply(scale)     # fold 1/sqrt(D) into Q
        b_qkv = lp["b_qkv"].at[:E].multiply(scale)
        prepped["layers"].append({
            "ln1_g": lp["ln1_g"].reshape(1, E),
            "ln1_b": lp["ln1_b"].reshape(1, E),
            "w_qkv": w_qkv.astype(BF16),
            "b_qkv": b_qkv.reshape(1, 3 * E),
            "w_out": lp["w_out"].astype(BF16),
            "b_out": lp["b_out"].reshape(1, E),
            "ln2_g": lp["ln2_g"].reshape(1, E),
            "ln2_b": lp["ln2_b"].reshape(1, E),
            "w_ff1": lp["w_ff1"].astype(BF16),
            "b_ff1": lp["b_ff1"].reshape(1, Fh),
            "w_ff2": lp["w_ff2"].astype(BF16),
            "b_ff2": lp["b_ff2"].reshape(1, E),
        })
    return prepped


# -----------------------------------------------------------------------------
# Kernel 1: embedding gather.  Token table stays in HBM; rows are DMA-gathered
# into a VMEM scratch (ids are scalar-prefetched to SMEM).
# -----------------------------------------------------------------------------
def _embed_kernel(ids_ref, tok_hbm, pos_ref, o_ref, gath, sem, *, seq_len):
    b = pl.program_id(0)
    copies = []
    # TODO(synk): for large T switch to pl.loop with a bounded in-flight window.
    for t in range(seq_len):                       # static unroll, small T
        tok_id = ids_ref[b, t]                     # scalar SMEM read
        cp = pltpu.make_async_copy(tok_hbm.at[pl.ds(tok_id, 1), :],
                                   gath.at[pl.ds(t, 1), :],
                                   sem.at[t])
        cp.start()
        copies.append(cp)
    for cp in copies:
        cp.wait()
    o_ref[...] = (gath[...] + pos_ref[...]).astype(o_ref.dtype)


def embed(input_ids, token_table, pos_table):
    B, T = input_ids.shape
    V, E = token_table.shape
    return pl.pallas_call(
        functools.partial(_embed_kernel, seq_len=T),
        out_shape=jax.ShapeDtypeStruct((B, T, E), token_table.dtype),
        grid_spec=pltpu.PrefetchScalarGridSpec(
            num_scalar_prefetch=1,                             # ids -> SMEM
            grid=(B,),
            in_specs=[
                pl.BlockSpec(memory_space=pl.ANY),             # token table in HBM
                pl.BlockSpec((T, E), lambda b, ids: (0, 0)),   # positions 0..T-1
            ],
            out_specs=pl.BlockSpec((pl.Squeezed(), T, E), lambda b, ids: (b, 0, 0)),
            scratch_shapes=[
                pltpu.VMEM((T, E), token_table.dtype),         # gathered rows
                pltpu.SemaphoreType.DMA((T,)),
            ]),
        compiler_params=pltpu.CompilerParams(
            dimension_semantics=("parallel",),
            vmem_limit_bytes=64 * 1024 * 1024),
    )(input_ids.astype(jnp.int32), token_table, pos_table)


# -----------------------------------------------------------------------------
# Kernel 2: fused transformer layer
#   x = x + MHSA(LN1(x));  x = x + FF(LN2(x))          (eval dropout == identity)
# grid = (batch, query-tile).  LN1(x)/K/V computed once per batch row (q == 0)
# into VMEM scratch and re-used by every query tile.
# -----------------------------------------------------------------------------
def _layer_kernel(x_ref, g1_ref, b1_ref, wqkv_ref, bqkv_ref, wout_ref, bout_ref,
                  g2_ref, b2_ref, w1_ref, bf1_ref, w2_ref, bf2_ref, o_ref,
                  h1_sc, k_sc, v_sc, merged_sc, *, num_heads, head_dim, q_tile):
    E = num_heads * head_dim
    qi = pl.program_id(1)
    row0 = pl.multiple_of(qi * q_tile, q_tile)

    # ---- once per batch row: full-sequence LN1, K, V -> VMEM scratch --------
    @pl.when(qi == 0)
    def _():
        h1 = _layer_norm(x_ref[...], g1_ref[...], b1_ref[...]).astype(BF16)
        h1_sc[...] = h1
        k_sc[...] = (jnp.dot(h1, wqkv_ref[:, E:2 * E], preferred_element_type=F32)
                     + bqkv_ref[:, E:2 * E]).astype(BF16)
        v_sc[...] = (jnp.dot(h1, wqkv_ref[:, 2 * E:3 * E], preferred_element_type=F32)
                     + bqkv_ref[:, 2 * E:3 * E]).astype(BF16)

    # ---- attention for this query tile --------------------------------------
    x_q = x_ref[pl.ds(row0, q_tile), :].astype(F32)              # residual input
    h_q = h1_sc[pl.ds(row0, q_tile), :]                          # already normalized (bf16)
    # 1/sqrt(head_dim) is pre-folded into the Q columns of W_qkv / b_qkv.
    q = (jnp.dot(h_q, wqkv_ref[:, 0:E], preferred_element_type=F32)
         + bqkv_ref[:, 0:E]).astype(BF16)                        # (Tq, E)

    # Per-head attention with static lane slices (no head transposes, no concat);
    # only one (Tq, T) score block is live at a time.
    # TODO(synk): add a KV grid axis + online-softmax (flash tiling) for long T.
    for h in range(num_heads):
        sl = slice(h * head_dim, (h + 1) * head_dim)
        s = lax.dot_general(q[:, sl], k_sc[:, sl], (((1,), (1,)), ((), ())),
                            preferred_element_type=F32)          # (Tq, T)
        m = jnp.max(s, axis=-1, keepdims=True)                   # f32 softmax stats
        p = jnp.exp(s - m)
        denom = jnp.sum(p, axis=-1, keepdims=True)
        attn = (p * pl.reciprocal(denom, approx=True)).astype(BF16)
        merged_sc[:, sl] = jnp.dot(attn, v_sc[:, sl],
                                   preferred_element_type=F32).astype(BF16)

    attn_out = jnp.dot(merged_sc[...], wout_ref[...],
                       preferred_element_type=F32) + bout_ref[...]
    x_mid = x_q + attn_out                                       # residual 1 (f32)

    # ---- feed-forward on the same tile (fused; second residual) -------------
    h2 = _layer_norm(x_mid, g2_ref[...], b2_ref[...]).astype(BF16)
    a = jnp.dot(h2, w1_ref[...], preferred_element_type=F32) + bf1_ref[...]
    y = jnp.dot(_gelu(a).astype(BF16), w2_ref[...],
                preferred_element_type=F32) + bf2_ref[...]
    o_ref[...] = (x_mid + y).astype(o_ref.dtype)


def transformer_layer(x, lp, *, num_heads, q_tile):
    B, T, E = x.shape
    assert E % num_heads == 0 and T % q_tile == 0
    head_dim = E // num_heads
    nq = T // q_tile
    Fh = lp["w_ff1"].shape[1]
    kernel = functools.partial(_layer_kernel, num_heads=num_heads,
                               head_dim=head_dim, q_tile=q_tile)

    # Constant-index (fetched-once) operand spec.
    # TODO(synk): on v7x (64 MiB VMEM) add pipeline_mode=pl.Buffered(1) here (or
    # DMA weights to scratch once) to drop the second pipeline buffer.
    def cspec(shape):
        return pl.BlockSpec(shape, lambda b, q, _n=len(shape): (0,) * _n)

    return pl.pallas_call(
        kernel,
        out_shape=jax.ShapeDtypeStruct((B, T, E), x.dtype),
        grid_spec=pltpu.PrefetchScalarGridSpec(
            num_scalar_prefetch=0,
            grid=(B, nq),
            in_specs=[
                pl.BlockSpec((pl.Squeezed(), T, E), lambda b, q: (b, 0, 0)),  # x (full seq)
                cspec((1, E)), cspec((1, E)),                                 # ln1 gamma/beta
                cspec((E, 3 * E)), cspec((1, 3 * E)),                         # W_qkv / b_qkv
                cspec((E, E)), cspec((1, E)),                                 # W_out / b_out
                cspec((1, E)), cspec((1, E)),                                 # ln2 gamma/beta
                cspec((E, Fh)), cspec((1, Fh)),                               # W_ff1 / b_ff1
                cspec((Fh, E)), cspec((1, E)),                                # W_ff2 / b_ff2
            ],
            out_specs=pl.BlockSpec((pl.Squeezed(), q_tile, E), lambda b, q: (b, q, 0)),
            scratch_shapes=[
                pltpu.VMEM((T, E), BF16),        # LN1(x)  (full sequence)
                pltpu.VMEM((T, E), BF16),        # K
                pltpu.VMEM((T, E), BF16),        # V
                pltpu.VMEM((q_tile, E), BF16),   # merged head outputs
            ]),
        compiler_params=pltpu.CompilerParams(
            # batch axis parallel (feeds both v7x TensorCores); q axis must be
            # the inner sequential axis so the K/V scratch cache is valid.
            dimension_semantics=("parallel", "arbitrary"),
            vmem_limit_bytes=64 * 1024 * 1024),
    )(x, lp["ln1_g"], lp["ln1_b"], lp["w_qkv"], lp["b_qkv"],
      lp["w_out"], lp["b_out"], lp["ln2_g"], lp["ln2_b"],
      lp["w_ff1"], lp["b_ff1"], lp["w_ff2"], lp["b_ff2"])


# -----------------------------------------------------------------------------
# Classifier head: final LayerNorm -> mean over T -> Linear -> GELU -> Linear(2).
# Per perf review this stays in plain XLA (B rows, 64-lane intermediate, 2-lane
# output gain nothing from a dedicated grid=(1,) pallas_call).
# -----------------------------------------------------------------------------
def classifier_head(x, lnf_g, lnf_b, w1, b1, w2, b2):
    h = _layer_norm(x, lnf_g, lnf_b)
    pooled = jnp.mean(h, axis=1)
    a = jnp.dot(pooled, w1) + b1
    return jnp.dot(_gelu(a), w2) + b2


# -----------------------------------------------------------------------------
# Full Decoder forward (attention_mask = None path).
# -----------------------------------------------------------------------------
def decoder_forward(prepped, input_ids, *, num_heads, q_tile):
    x = embed(input_ids, prepped["token_embed"], prepped["pos_embed"])
    for lp in prepped["layers"]:
        # TODO(synk): stack layer weights into (L, ...) arrays and loop layers
        # via a leading grid axis to remove the remaining per-layer dispatch.
        x = transformer_layer(x, lp, num_heads=num_heads, q_tile=q_tile)
    return classifier_head(x, prepped["lnf_g"], prepped["lnf_b"],
                           prepped["w_h1"], prepped["b_h1"],
                           prepped["w_h2"], prepped["b_h2"])


# -----------------------------------------------------------------------------
# Plain-JAX reference (same bf16-matmul / f32-accumulation numerics, original
# unfolded parameters).
# -----------------------------------------------------------------------------
def _mm(a, b):
    return jnp.dot(a.astype(BF16), b.astype(BF16), preferred_element_type=F32)


def reference_decoder(params, input_ids, num_heads):
    B, T = input_ids.shape
    x = params["token_embed"][input_ids] + params["pos_embed"][None, :T, :]
    E = x.shape[-1]
    D = E // num_heads
    for lp in params["layers"]:
        h = _layer_norm(x, lp["ln1_g"], lp["ln1_b"])
        q = _mm(h, lp["w_qkv"][:, 0:E]) + lp["b_qkv"][0:E]
        k = _mm(h, lp["w_qkv"][:, E:2 * E]) + lp["b_qkv"][E:2 * E]
        v = _mm(h, lp["w_qkv"][:, 2 * E:]) + lp["b_qkv"][2 * E:]
        q = q * (1.0 / math.sqrt(D))
        q = q.reshape(B, T, num_heads, D).transpose(0, 2, 1, 3)
        k = k.reshape(B, T, num_heads, D).transpose(0, 2, 1, 3)
        v = v.reshape(B, T, num_heads, D).transpose(0, 2, 1, 3)
        s = jnp.einsum("bhtd,bhsd->bhts", q.astype(BF16), k.astype(BF16),
                       preferred_element_type=F32)
        attn = jax.nn.softmax(s, axis=-1)
        o = jnp.einsum("bhts,bhsd->bhtd", attn.astype(BF16), v.astype(BF16),
                       preferred_element_type=F32)
        o = o.transpose(0, 2, 1, 3).reshape(B, T, E)
        x = x + _mm(o, lp["w_out"]) + lp["b_out"]
        h = _layer_norm(x, lp["ln2_g"], lp["ln2_b"])
        a = _mm(h, lp["w_ff1"]) + lp["b_ff1"]
        x = x + _mm(_gelu(a), lp["w_ff2"]) + lp["b_ff2"]
    return classifier_head(x, params["lnf_g"], params["lnf_b"],
                           params["w_h1"], params["b_h1"],
                           params["w_h2"], params["b_h2"])


def init_params(key, vocab, max_len, embed_dim, ff_hidden, n_layers):
    ks = iter(jax.random.split(key, 8 + 12 * n_layers))

    def rnd(shape, scale=0.05):
        return scale * jax.random.normal(next(ks), shape, dtype=F32)

    params = {
        "token_embed": rnd((vocab, embed_dim), 0.1),
        "pos_embed": rnd((max_len, embed_dim), 0.1),
        "layers": [],
        "lnf_g": 1.0 + rnd((embed_dim,)),
        "lnf_b": rnd((embed_dim,)),
        "w_h1": rnd((embed_dim, embed_dim // 2)),
        "b_h1": rnd((embed_dim // 2,)),
        "w_h2": rnd((embed_dim // 2, 2)),
        "b_h2": rnd((2,)),
    }
    for _ in range(n_layers):
        params["layers"].append({
            "ln1_g": 1.0 + rnd((embed_dim,)),
            "ln1_b": rnd((embed_dim,)),
            "w_qkv": rnd((embed_dim, 3 * embed_dim)),
            "b_qkv": rnd((3 * embed_dim,)),
            "w_out": rnd((embed_dim, embed_dim)),
            "b_out": rnd((embed_dim,)),
            "ln2_g": 1.0 + rnd((embed_dim,)),
            "ln2_b": rnd((embed_dim,)),
            "w_ff1": rnd((embed_dim, ff_hidden)),
            "b_ff1": rnd((ff_hidden,)),
            "w_ff2": rnd((ff_hidden, embed_dim)),
            "b_ff2": rnd((embed_dim,)),
        })
    return params


if __name__ == "__main__":
    VOCAB, MAX_LEN = 128, 16
    BATCH, SEQ = 2, 8
    EMBED, HEADS, LAYERS, FF_HIDDEN = 128, 4, 2, 256   # E=128 keeps stores lane-dense

    root = jax.random.PRNGKey(0)
    k_params, k_ids = jax.random.split(root)
    params = init_params(k_params, VOCAB, MAX_LEN, EMBED, FF_HIDDEN, LAYERS)
    input_ids = jax.random.randint(k_ids, (BATCH, SEQ), 0, VOCAB, dtype=jnp.int32)

    # One-time bf16 cast + scale folding (no per-call converts under jit).
    prepped = prepare_params(params, HEADS)

    # q_tile: full SEQ here; 128 on v5e, 256 on v6e/v7x at production sizes.
    q_tile = min(SEQ, 128)

    fwd = jax.jit(functools.partial(decoder_forward, num_heads=HEADS, q_tile=q_tile))
    logits = jax.block_until_ready(fwd(prepped, input_ids))

    ref = reference_decoder(params, input_ids, HEADS)
    assert logits.shape == (BATCH, 2)
    assert bool(jnp.all(jnp.isfinite(logits)))
    # bf16 matmuls + approx softmax reciprocal + folded scaling -> loose tolerance.
    assert jnp.allclose(logits, ref, atol=5e-2, rtol=5e-2)

    print("KERNEL_OK")
</pallas_src>

<mosaic_0001>
module attributes {stable_mosaic.version = 11 : i64} {
  func.func @_layer_kernel(%arg0: i32, %arg1: i32, %arg2: memref<1x8x128xf32, #tpu.memory_space<vmem>>, %arg3: memref<1x128xf32, #tpu.memory_space<vmem>>, %arg4: memref<1x128xf32, #tpu.memory_space<vmem>>, %arg5: memref<128x384xbf16, #tpu.memory_space<vmem>>, %arg6: memref<1x384xf32, #tpu.memory_space<vmem>>, %arg7: memref<128x128xbf16, #tpu.memory_space<vmem>>, %arg8: memref<1x128xf32, #tpu.memory_space<vmem>>, %arg9: memref<1x128xf32, #tpu.memory_space<vmem>>, %arg10: memref<1x128xf32, #tpu.memory_space<vmem>>, %arg11: memref<128x256xbf16, #tpu.memory_space<vmem>>, %arg12: memref<1x256xf32, #tpu.memory_space<vmem>>, %arg13: memref<256x128xbf16, #tpu.memory_space<vmem>>, %arg14: memref<1x128xf32, #tpu.memory_space<vmem>>, %arg15: memref<1x8x128xf32, #tpu.memory_space<vmem>>, %arg16: memref<8x128xbf16, #tpu.memory_space<vmem>>, %arg17: memref<8x128xbf16, #tpu.memory_space<vmem>>, %arg18: memref<8x128xbf16, #tpu.memory_space<vmem>>, %arg19: memref<8x128xbf16, #tpu.memory_space<vmem>>) attributes {dimension_semantics = [#tpu.dimension_semantics<parallel>, #tpu.dimension_semantics<arbitrary>], iteration_bounds = array<i64: 2, 1>, scalar_prefetch = 0 : i64, scratch_operands = 4 : i64, tpu.core_type = #tpu.core_type<tc>, window_params = [{transform_indices = @transform_0, window_bounds = array<i64: 1, 8, 128>}, {pipeline_mode = #tpu.pipeline_mode<synchronous>, transform_indices = @transform_1, window_bounds = array<i64: 1, 128>}, {pipeline_mode = #tpu.pipeline_mode<synchronous>, transform_indices = @transform_2, window_bounds = array<i64: 1, 128>}, {pipeline_mode = #tpu.pipeline_mode<synchronous>, transform_indices = @transform_3, window_bounds = array<i64: 128, 384>}, {pipeline_mode = #tpu.pipeline_mode<synchronous>, transform_indices = @transform_4, window_bounds = array<i64: 1, 384>}, {pipeline_mode = #tpu.pipeline_mode<synchronous>, transform_indices = @transform_5, window_bounds = array<i64: 128, 128>}, {pipeline_mode = #tpu.pipeline_mode<synchronous>, transform_indices = @transform_6, window_bounds = array<i64: 1, 128>}, {pipeline_mode = #tpu.pipeline_mode<synchronous>, transform_indices = @transform_7, window_bounds = array<i64: 1, 128>}, {pipeline_mode = #tpu.pipeline_mode<synchronous>, transform_indices = @transform_8, window_bounds = array<i64: 1, 128>}, {pipeline_mode = #tpu.pipeline_mode<synchronous>, transform_indices = @transform_9, window_bounds = array<i64: 128, 256>}, {pipeline_mode = #tpu.pipeline_mode<synchronous>, transform_indices = @transform_10, window_bounds = array<i64: 1, 256>}, {pipeline_mode = #tpu.pipeline_mode<synchronous>, transform_indices = @transform_11, window_bounds = array<i64: 256, 128>}, {pipeline_mode = #tpu.pipeline_mode<synchronous>, transform_indices = @transform_12, window_bounds = array<i64: 1, 128>}, {transform_indices = @transform_13, window_bounds = array<i64: 1, 8, 128>}]} {
    %c8_i32 = arith.constant 8 : i32
    %0 = arith.muli %arg1, %c8_i32 : i32
    %1 = tpu.assume_multiple %0, 8 : i32
    %c0_i32 = arith.constant 0 : i32
    %2 = arith.cmpi eq, %arg1, %c0_i32 : i32
    %3 = arith.extui %2 : i1 to i32
    %c0_i32_0 = arith.constant 0 : i32
    %4 = arith.cmpi ne, %3, %c0_i32_0 : i32
    scf.if %4 {
      %c0_77 = arith.constant 0 : index
      %c0_78 = arith.constant 0 : index
      %c0_79 = arith.constant 0 : index
      %146 = vector.load %arg2[%c0_77, %c0_78, %c0_79] : memref<1x8x128xf32, #tpu.memory_space<vmem>>, vector<1x8x128xf32>
      %147 = vector.shape_cast %146 : vector<1x8x128xf32> to vector<8x128xf32>
      %c0_80 = arith.constant 0 : index
      %c0_81 = arith.constant 0 : index
      %148 = vector.load %arg3[%c0_80, %c0_81] : memref<1x128xf32, #tpu.memory_space<vmem>>, vector<1x128xf32>
      %c0_82 = arith.constant 0 : index
      %c0_83 = arith.constant 0 : index
      %149 = vector.load %arg4[%c0_82, %c0_83] : memref<1x128xf32, #tpu.memory_space<vmem>>, vector<1x128xf32>
      %cst_84 = arith.constant dense<0.000000e+00> : vector<8xf32>
      %150 = vector.multi_reduction <add>, %147, %cst_84 [1] : vector<8x128xf32> to vector<8xf32>
      %151 = vector.shape_cast %150 : vector<8xf32> to vector<8x1xf32>
      %cst_85 = arith.constant 1.280000e+02 : f32
      %152 = vector.broadcast %cst_85 : f32 to vector<8x1xf32>
      %153 = arith.divf %151, %152 : vector<8x1xf32>
      %154 = vector.broadcast %153 : vector<8x1xf32> to vector<8x128xf32>
      %155 = arith.subf %147, %154 : vector<8x128xf32>
      %156 = arith.mulf %155, %155 : vector<8x128xf32>
      %cst_86 = arith.constant dense<0.000000e+00> : vector<8xf32>
      %157 = vector.multi_reduction <add>, %156, %cst_86 [1] : vector<8x128xf32> to vector<8xf32>
      %158 = vector.shape_cast %157 : vector<8xf32> to vector<8x1xf32>
      %cst_87 = arith.constant 1.280000e+02 : f32
      %159 = vector.broadcast %cst_87 : f32 to vector<8x1xf32>
      %160 = arith.divf %158, %159 : vector<8x1xf32>
      %cst_88 = arith.constant 9.99999974E-6 : f32
      %161 = vector.broadcast %cst_88 : f32 to vector<8x1xf32>
      %162 = arith.addf %160, %161 : vector<8x1xf32>
      %163 = math.rsqrt %162 : vector<8x1xf32>
      %164 = vector.broadcast %163 : vector<8x1xf32> to vector<8x128xf32>
      %165 = arith.mulf %155, %164 : vector<8x128xf32>
      %166 = vector.broadcast %148 : vector<1x128xf32> to vector<8x128xf32>
      %167 = arith.mulf %165, %166 : vector<8x128xf32>
      %168 = vector.broadcast %149 : vector<1x128xf32> to vector<8x128xf32>
      %169 = arith.addf %167, %168 : vector<8x128xf32>
      %170 = arith.truncf %169 : vector<8x128xf32> to vector<8x128xbf16>
      %c0_89 = arith.constant 0 : index
      %c0_90 = arith.constant 0 : index
      %171 = vector.load %arg16[%c0_89, %c0_90] : memref<8x128xbf16, #tpu.memory_space<vmem>>, vector<8x128xbf16>
      tpu.vector_store %arg16[%c0_89, %c0_90], %170 {strides = array<i32>} : memref<8x128xbf16, #tpu.memory_space<vmem>>, vector<8x128xbf16>,
      %c0_91 = arith.constant 0 : index
      %c128 = arith.constant 128 : index
      %172 = vector.load %arg5[%c0_91, %c128] : memref<128x384xbf16, #tpu.memory_space<vmem>>, vector<128x128xbf16>
      %cst_92 = arith.constant dense<0.000000e+00> : vector<8x128xf32>
      %173 = tpu.matmul %170, %172, %cst_92 {dimension_numbers = #tpu.dot_dimension_numbers<[1], [0], [0], [1], [0, 0, 1, 1], [], []>} : vector<8x128xbf16>, vector<128x128xbf16>, vector<8x128xf32> -> vector<8x128xf32>
      %c0_93 = arith.constant 0 : index
      %c128_94 = arith.constant 128 : index
      %174 = vector.load %arg6[%c0_93, %c128_94] : memref<1x384xf32, #tpu.memory_space<vmem>>, vector<1x128xf32>
      %175 = vector.broadcast %174 : vector<1x128xf32> to vector<8x128xf32>
      %176 = arith.addf %173, %175 : vector<8x128xf32>
      %177 = arith.truncf %176 : vector<8x128xf32> to vector<8x128xbf16>
      %c0_95 = arith.constant 0 : index
      %c0_96 = arith.constant 0 : index
      %178 = vector.load %arg17[%c0_95, %c0_96] : memref<8x128xbf16, #tpu.memory_space<vmem>>, vector<8x128xbf16>
      tpu.vector_store %arg17[%c0_95, %c0_96], %177 {strides = array<i32>} : memref<8x128xbf16, #tpu.memory_space<vmem>>, vector<8x128xbf16>,
      %c0_97 = arith.constant 0 : index
      %c256 = arith.constant 256 : index
      %179 = vector.load %arg5[%c0_97, %c256] : memref<128x384xbf16, #tpu.memory_space<vmem>>, vector<128x128xbf16>
      %cst_98 = arith.constant dense<0.000000e+00> : vector<8x128xf32>
      %180 = tpu.matmul %170, %179, %cst_98 {dimension_numbers = #tpu.dot_dimension_numbers<[1], [0], [0], [1], [0, 0, 1, 1], [], []>} : vector<8x128xbf16>, vector<128x128xbf16>, vector<8x128xf32> -> vector<8x128xf32>
      %c0_99 = arith.constant 0 : index
      %c256_100 = arith.constant 256 : index
      %181 = vector.load %arg6[%c0_99, %c256_100] : memref<1x384xf32, #tpu.memory_space<vmem>>, vector<1x128xf32>
      %182 = vector.broadcast %181 : vector<1x128xf32> to vector<8x128xf32>
      %183 = arith.addf %180, %182 : vector<8x128xf32>
      %184 = arith.truncf %183 : vector<8x128xf32> to vector<8x128xbf16>
      %c0_101 = arith.constant 0 : index
      %c0_102 = arith.constant 0 : index
      %185 = vector.load %arg18[%c0_101, %c0_102] : memref<8x128xbf16, #tpu.memory_space<vmem>>, vector<8x128xbf16>
      tpu.vector_store %arg18[%c0_101, %c0_102], %184 {strides = array<i32>} : memref<8x128xbf16, #tpu.memory_space<vmem>>, vector<8x128xbf16>,
    } else {
    }
    %c0 = arith.constant 0 : index
    %5 = arith.index_cast %1 : i32 to index
    %c0_1 = arith.constant 0 : index
    %6 = vector.load %arg2[%c0, %5, %c0_1] : memref<1x8x128xf32, #tpu.memory_space<vmem>>, vector<1x8x128xf32>
    %7 = vector.shape_cast %6 : vector<1x8x128xf32> to vector<8x128xf32>
    %8 = arith.index_cast %1 : i32 to index
    %c0_2 = arith.constant 0 : index
    %9 = vector.load %arg16[%8, %c0_2] : memref<8x128xbf16, #tpu.memory_space<vmem>>, vector<8x128xbf16>
    %c0_3 = arith.constant 0 : index
    %c0_4 = arith.constant 0 : index
    %10 = vector.load %arg5[%c0_3, %c0_4] : memref<128x384xbf16, #tpu.memory_space<vmem>>, vector<128x128xbf16>
    %cst = arith.constant dense<0.000000e+00> : vector<8x128xf32>
    %11 = tpu.matmul %9, %10, %cst {dimension_numbers = #tpu.dot_dimension_numbers<[1], [0], [0], [1], [0, 0, 1, 1], [], []>} : vector<8x128xbf16>, vector<128x128xbf16>, vector<8x128xf32> -> vector<8x128xf32>
    %c0_5 = arith.constant 0 : index
    %c0_6 = arith.constant 0 : index
    %12 = vector.load %arg6[%c0_5, %c0_6] : memref<1x384xf32, #tpu.memory_space<vmem>>, vector<1x128xf32>
    %13 = vector.broadcast %12 : vector<1x128xf32> to vector<8x128xf32>
    %14 = arith.addf %11, %13 : vector<8x128xf32>
    %15 = arith.truncf %14 : vector<8x128xf32> to vector<8x128xbf16>
    %16 = vector.extract_strided_slice %15 {offsets = [0, 0], sizes = [8, 32], strides = [1, 1]} : vector<8x128xbf16> to vector<8x32xbf16>
    %c0_7 = arith.constant 0 : index
    %c0_8 = arith.constant 0 : index
    %17 = vector.load %arg17[%c0_7, %c0_8] : memref<8x128xbf16, #tpu.memory_space<vmem>>, vector<8x32xbf16>
    %cst_9 = arith.constant dense<0.000000e+00> : vector<8x8xf32>
    %18 = tpu.matmul %16, %17, %cst_9 {dimension_numbers = #tpu.dot_dimension_numbers<[1], [1], [0], [0], [0, 0, 1, 0], [], []>} : vector<8x32xbf16>, vector<8x32xbf16>, vector<8x8xf32> -> vector<8x8xf32>
    %cst_10 = arith.constant dense<0xFF800000> : vector<8xf32>
    %19 = vector.multi_reduction <maximumf>, %18, %cst_10 [1] : vector<8x8xf32> to vector<8xf32>
    %20 = vector.shape_cast %19 : vector<8xf32> to vector<8x1xf32>
    %21 = vector.broadcast %20 : vector<8x1xf32> to vector<8x8xf32>
    %22 = arith.subf %18, %21 : vector<8x8xf32>
    %23 = math.exp %22 : vector<8x8xf32>
    %cst_11 = arith.constant dense<0.000000e+00> : vector<8xf32>
    %24 = vector.multi_reduction <add>, %23, %cst_11 [1] : vector<8x8xf32> to vector<8xf32>
    %25 = vector.shape_cast %24 : vector<8xf32> to vector<8x1xf32>
    %26 = tpu.reciprocal %25 {approx = true} : vector<8x1xf32> -> vector<8x1xf32>
    %27 = vector.broadcast %26 : vector<8x1xf32> to vector<8x8xf32>
    %28 = arith.mulf %23, %27 : vector<8x8xf32>
    %29 = arith.truncf %28 : vector<8x8xf32> to vector<8x8xbf16>
    %c0_12 = arith.constant 0 : index
    %c0_13 = arith.constant 0 : index
    %30 = vector.load %arg18[%c0_12, %c0_13] : memref<8x128xbf16, #tpu.memory_space<vmem>>, vector<8x32xbf16>
    %cst_14 = arith.constant dense<0.000000e+00> : vector<8x32xf32>
    %31 = tpu.matmul %29, %30, %cst_14 {dimension_numbers = #tpu.dot_dimension_numbers<[1], [0], [0], [1], [0, 0, 1, 1], [], []>} : vector<8x8xbf16>, vector<8x32xbf16>, vector<8x32xf32> -> vector<8x32xf32>
    %32 = arith.truncf %31 : vector<8x32xf32> to vector<8x32xbf16>
    %c0_15 = arith.constant 0 : index
    %c0_16 = arith.constant 0 : index
    %33 = vector.load %arg19[%c0_15, %c0_16] : memref<8x128xbf16, #tpu.memory_space<vmem>>, vector<8x32xbf16>
    tpu.vector_store %arg19[%c0_15, %c0_16], %32 {strides = array<i32>} : memref<8x128xbf16, #tpu.memory_space<vmem>>, vector<8x32xbf16>,
    %34 = vector.extract_strided_slice %15 {offsets = [0, 32], sizes = [8, 32], strides = [1, 1]} : vector<8x128xbf16> to vector<8x32xbf16>
    %c0_17 = arith.constant 0 : index
    %c32 = arith.constant 32 : index
    %35 = vector.load %arg17[%c0_17, %c32] : memref<8x128xbf16, #tpu.memory_space<vmem>>, vector<8x32xbf16>
    %cst_18 = arith.constant dense<0.000000e+00> : vector<8x8xf32>
    %36 = tpu.matmul %34, %35, %cst_18 {dimension_numbers = #tpu.dot_dimension_numbers<[1], [1], [0], [0], [0, 0, 1, 0], [], []>} : vector<8x32xbf16>, vector<8x32xbf16>, vector<8x8xf32> -> vector<8x8xf32>
    %cst_19 = arith.constant dense<0xFF800000> : vector<8xf32>
    %37 = vector.multi_reduction <maximumf>, %36, %cst_19 [1] : vector<8x8xf32> to vector<8xf32>
    %38 = vector.shape_cast %37 : vector<8xf32> to vector<8x1xf32>
    %39 = vector.broadcast %38 : vector<8x1xf32> to vector<8x8xf32>
    %40 = arith.subf %36, %39 : vector<8x8xf32>
    %41 = math.exp %40 : vector<8x8xf32>
    %cst_20 = arith.constant dense<0.000000e+00> : vector<8xf32>
    %42 = vector.multi_reduction <add>, %41, %cst_20 [1] : vector<8x8xf32> to vector<8xf32>
    %43 = vector.shape_cast %42 : vector<8xf32> to vector<8x1xf32>
    %44 = tpu.reciprocal %43 {approx = true} : vector<8x1xf32> -> vector<8x1xf32>
    %45 = vector.broadcast %44 : vector<8x1xf32> to vector<8x8xf32>
    %46 = arith.mulf %41, %45 : vector<8x8xf32>
    %47 = arith.truncf %46 : vector<8x8xf32> to vector<8x8xbf16>
    %c0_21 = arith.constant 0 : index
    %c32_22 = arith.constant 32 : index
    %48 = vector.load %arg18[%c0_21, %c32_22] : memref<8x128xbf16, #tpu.memory_space<vmem>>, vector<8x32xbf16>
    %cst_23 = arith.constant dense<0.000000e+00> : vector<8x32xf32>
    %49 = tpu.matmul %47, %48, %cst_23 {dimension_numbers = #tpu.dot_dimension_numbers<[1], [0], [0], [1], [0, 0, 1, 1], [], []>} : vector<8x8xbf16>, vector<8x32xbf16>, vector<8x32xf32> -> vector<8x32xf32>
    %50 = arith.truncf %49 : vector<8x32xf32> to vector<8x32xbf16>
    %c0_24 = arith.constant 0 : index
    %c32_25 = arith.constant 32 : index
    %51 = vector.load %arg19[%c0_24, %c32_25] : memref<8x128xbf16, #tpu.memory_space<vmem>>, vector<8x32xbf16>
    tpu.vector_store %arg19[%c0_24, %c32_25], %50 {strides = array<i32>} : memref<8x128xbf16, #tpu.memory_space<vmem>>, vector<8x32xbf16>,
    %52 = vector.extract_strided_slice %15 {offsets = [0, 64], sizes = [8, 32], strides = [1, 1]} : vector<8x128xbf16> to vector<8x32xbf16>
    %c0_26 = arith.constant 0 : index
    %c64 = arith.constant 64 : index
    %53 = vector.load %arg17[%c0_26, %c64] : memref<8x128xbf16, #tpu.memory_space<vmem>>, vector<8x32xbf16>
    %cst_27 = arith.constant dense<0.000000e+00> : vector<8x8xf32>
    %54 = tpu.matmul %52, %53, %cst_27 {dimension_numbers = #tpu.dot_dimension_numbers<[1], [1], [0], [0], [0, 0, 1, 0], [], []>} : vector<8x32xbf16>, vector<8x32xbf16>, vector<8x8xf32> -> vector<8x8xf32>
    %cst_28 = arith.constant dense<0xFF800000> : vector<8xf32>
    %55 = vector.multi_reduction <maximumf>, %54, %cst_28 [1] : vector<8x8xf32> to vector<8xf32>
    %56 = vector.shape_cast %55 : vector<8xf32> to vector<8x1xf32>
    %57 = vector.broadcast %56 : vector<8x1xf32> to vector<8x8xf32>
    %58 = arith.subf %54, %57 : vector<8x8xf32>
    %59 = math.exp %58 : vector<8x8xf32>
    %cst_29 = arith.constant dense<0.000000e+00> : vector<8xf32>
    %60 = vector.multi_reduction <add>, %59, %cst_29 [1] : vector<8x8xf32> to vector<8xf32>
    %61 = vector.shape_cast %60 : vector<8xf32> to vector<8x1xf32>
    %62 = tpu.reciprocal %61 {approx = true} : vector<8x1xf32> -> vector<8x1xf32>
    %63 = vector.broadcast %62 : vector<8x1xf32> to vector<8x8xf32>
    %64 = arith.mulf %59, %63 : vector<8x8xf32>
    %65 = arith.truncf %64 : vector<8x8xf32> to vector<8x8xbf16>
    %c0_30 = arith.constant 0 : index
    %c64_31 = arith.constant 64 : index
    %66 = vector.load %arg18[%c0_30, %c64_31] : memref<8x128xbf16, #tpu.memory_space<vmem>>, vector<8x32xbf16>
    %cst_32 = arith.constant dense<0.000000e+00> : vector<8x32xf32>
    %67 = tpu.matmul %65, %66, %cst_32 {dimension_numbers = #tpu.dot_dimension_numbers<[1], [0], [0], [1], [0, 0, 1, 1], [], []>} : vector<8x8xbf16>, vector<8x32xbf16>, vector<8x32xf32> -> vector<8x32xf32>
    %68 = arith.truncf %67 : vector<8x32xf32> to vector<8x32xbf16>
    %c0_33 = arith.constant 0 : index
    %c64_34 = arith.constant 64 : index
    %69 = vector.load %arg19[%c0_33, %c64_34] : memref<8x128xbf16, #tpu.memory_space<vmem>>, vector<8x32xbf16>
    tpu.vector_store %arg19[%c0_33, %c64_34], %68 {strides = array<i32>} : memref<8x128xbf16, #tpu.memory_space<vmem>>, vector<8x32xbf16>,
    %70 = vector.extract_strided_slice %15 {offsets = [0, 96], sizes = [8, 32], strides = [1, 1]} : vector<8x128xbf16> to vector<8x32xbf16>
    %c0_35 = arith.constant 0 : index
    %c96 = arith.constant 96 : index
    %71 = vector.load %arg17[%c0_35, %c96] : memref<8x128xbf16, #tpu.memory_space<vmem>>, vector<8x32xbf16>
    %cst_36 = arith.constant dense<0.000000e+00> : vector<8x8xf32>
    %72 = tpu.matmul %70, %71, %cst_36 {dimension_numbers = #tpu.dot_dimension_numbers<[1], [1], [0], [0], [0, 0, 1, 0], [], []>} : vector<8x32xbf16>, vector<8x32xbf16>, vector<8x8xf32> -> vector<8x8xf32>
    %cst_37 = arith.constant dense<0xFF800000> : vector<8xf32>
    %73 = vector.multi_reduction <maximumf>, %72, %cst_37 [1] : vector<8x8xf32> to vector<8xf32>
    %74 = vector.shape_cast %73 : vector<8xf32> to vector<8x1xf32>
    %75 = vector.broadcast %74 : vector<8x1xf32> to vector<8x8xf32>
    %76 = arith.subf %72, %75 : vector<8x8xf32>
    %77 = math.exp %76 : vector<8x8xf32>
    %cst_38 = arith.constant dense<0.000000e+00> : vector<8xf32>
    %78 = vector.multi_reduction <add>, %77, %cst_38 [1] : vector<8x8xf32> to vector<8xf32>
    %79 = vector.shape_cast %78 : vector<8xf32> to vector<8x1xf32>
    %80 = tpu.reciprocal %79 {approx = true} : vector<8x1xf32> -> vector<8x1xf32>
    %81 = vector.broadcast %80 : vector<8x1xf32> to vector<8x8xf32>
    %82 = arith.mulf %77, %81 : vector<8x8xf32>
    %83 = arith.truncf %82 : vector<8x8xf32> to vector<8x8xbf16>
    %c0_39 = arith.constant 0 : index
    %c96_40 = arith.constant 96 : index
    %84 = vector.load %arg18[%c0_39, %c96_40] : memref<8x128xbf16, #tpu.memory_space<vmem>>, vector<8x32xbf16>
    %cst_41 = arith.constant dense<0.000000e+00> : vector<8x32xf32>
    %85 = tpu.matmul %83, %84, %cst_41 {dimension_numbers = #tpu.dot_dimension_numbers<[1], [0], [0], [1], [0, 0, 1, 1], [], []>} : vector<8x8xbf16>, vector<8x32xbf16>, vector<8x32xf32> -> vector<8x32xf32>
    %86 = arith.truncf %85 : vector<8x32xf32> to vector<8x32xbf16>
    %c0_42 = arith.constant 0 : index
    %c96_43 = arith.constant 96 : index
    %87 = vector.load %arg19[%c0_42, %c96_43] : memref<8x128xbf16, #tpu.memory_space<vmem>>, vector<8x32xbf16>
    tpu.vector_store %arg19[%c0_42, %c96_43], %86 {strides = array<i32>} : memref<8x128xbf16, #tpu.memory_space<vmem>>, vector<8x32xbf16>,
    %c0_44 = arith.constant 0 : index
    %c0_45 = arith.constant 0 : index
    %88 = vector.load %arg19[%c0_44, %c0_45] : memref<8x128xbf16, #tpu.memory_space<vmem>>, vector<8x128xbf16>
    %c0_46 = arith.constant 0 : index
    %c0_47 = arith.constant 0 : index
    %89 = vector.load %arg7[%c0_46, %c0_47] : memref<128x128xbf16, #tpu.memory_space<vmem>>, vector<128x128xbf16>
    %cst_48 = arith.constant dense<0.000000e+00> : vector<8x128xf32>
    %90 = tpu.matmul %88, %89, %cst_48 {dimension_numbers = #tpu.dot_dimension_numbers<[1], [0], [0], [1], [0, 0, 1, 1], [], []>} : vector<8x128xbf16>, vector<128x128xbf16>, vector<8x128xf32> -> vector<8x128xf32>
    %c0_49 = arith.constant 0 : index
    %c0_50 = arith.constant 0 : index
    %91 = vector.load %arg8[%c0_49, %c0_50] : memref<1x128xf32, #tpu.memory_space<vmem>>, vector<1x128xf32>
    %92 = vector.broadcast %91 : vector<1x128xf32> to vector<8x128xf32>
    %93 = arith.addf %90, %92 : vector<8x128xf32>
    %94 = arith.addf %7, %93 : vector<8x128xf32>
    %c0_51 = arith.constant 0 : index
    %c0_52 = arith.constant 0 : index
    %95 = vector.load %arg9[%c0_51, %c0_52] : memref<1x128xf32, #tpu.memory_space<vmem>>, vector<1x128xf32>
    %c0_53 = arith.constant 0 : index
    %c0_54 = arith.constant 0 : index
    %96 = vector.load %arg10[%c0_53, %c0_54] : memref<1x128xf32, #tpu.memory_space<vmem>>, vector<1x128xf32>
    %cst_55 = arith.constant dense<0.000000e+00> : vector<8xf32>
    %97 = vector.multi_reduction <add>, %94, %cst_55 [1] : vector<8x128xf32> to vector<8xf32>
    %98 = vector.shape_cast %97 : vector<8xf32> to vector<8x1xf32>
    %cst_56 = arith.constant 1.280000e+02 : f32
    %99 = vector.broadcast %cst_56 : f32 to vector<8x1xf32>
    %100 = arith.divf %98, %99 : vector<8x1xf32>
    %101 = vector.broadcast %100 : vector<8x1xf32> to vector<8x128xf32>
    %102 = arith.subf %94, %101 : vector<8x128xf32>
    %103 = arith.mulf %102, %102 : vector<8x128xf32>
    %cst_57 = arith.constant dense<0.000000e+00> : vector<8xf32>
    %104 = vector.multi_reduction <add>, %103, %cst_57 [1] : vector<8x128xf32> to vector<8xf32>
    %105 = vector.shape_cast %104 : vector<8xf32> to vector<8x1xf32>
    %cst_58 = arith.constant 1.280000e+02 : f32
    %106 = vector.broadcast %cst_58 : f32 to vector<8x1xf32>
    %107 = arith.divf %105, %106 : vector<8x1xf32>
    %cst_59 = arith.constant 9.99999974E-6 : f32
    %108 = vector.broadcast %cst_59 : f32 to vector<8x1xf32>
    %109 = arith.addf %107, %108 : vector<8x1xf32>
    %110 = math.rsqrt %109 : vector<8x1xf32>
    %111 = vector.broadcast %110 : vector<8x1xf32> to vector<8x128xf32>
    %112 = arith.mulf %102, %111 : vector<8x128xf32>
    %113 = vector.broadcast %95 : vector<1x128xf32> to vector<8x128xf32>
    %114 = arith.mulf %112, %113 : vector<8x128xf32>
    %115 = vector.broadcast %96 : vector<1x128xf32> to vector<8x128xf32>
    %116 = arith.addf %114, %115 : vector<8x128xf32>
    %117 = arith.truncf %116 : vector<8x128xf32> to vector<8x128xbf16>
    %c0_60 = arith.constant 0 : index
    %c0_61 = arith.constant 0 : index
    %118 = vector.load %arg11[%c0_60, %c0_61] : memref<128x256xbf16, #tpu.memory_space<vmem>>, vector<128x256xbf16>
    %cst_62 = arith.constant dense<0.000000e+00> : vector<8x256xf32>
    %119 = tpu.matmul %117, %118, %cst_62 {dimension_numbers = #tpu.dot_dimension_numbers<[1], [0], [0], [1], [0, 0, 1, 1], [], []>} : vector<8x128xbf16>, vector<128x256xbf16>, vector<8x256xf32> -> vector<8x256xf32>
    %c0_63 = arith.constant 0 : index
    %c0_64 = arith.constant 0 : index
    %120 = vector.load %arg12[%c0_63, %c0_64] : memref<1x256xf32, #tpu.memory_space<vmem>>, vector<1x256xf32>
    %121 = vector.broadcast %120 : vector<1x256xf32> to vector<8x256xf32>
    %122 = arith.addf %119, %121 : vector<8x256xf32>
    %cst_65 = arith.constant 5.000000e-01 : f32
    %123 = vector.broadcast %cst_65 : f32 to vector<8x256xf32>
    %124 = arith.mulf %123, %122 : vector<8x256xf32>
    %cst_66 = arith.constant 4.471500e-02 : f32
    %125 = vector.broadcast %cst_66 : f32 to vector<8x256xf32>
    %126 = arith.mulf %125, %122 : vector<8x256xf32>
    %127 = arith.mulf %126, %122 : vector<8x256xf32>
    %128 = arith.mulf %127, %122 : vector<8x256xf32>
    %129 = arith.addf %122, %128 : vector<8x256xf32>
    %cst_67 = arith.constant 0.797884583 : f32
    %130 = vector.broadcast %cst_67 : f32 to vector<8x256xf32>
    %131 = arith.mulf %130, %129 : vector<8x256xf32>
    %132 = math.tanh %131 : vector<8x256xf32>
    %cst_68 = arith.constant 1.000000e+00 : f32
    %133 = vector.broadcast %cst_68 : f32 to vector<8x256xf32>
    %134 = arith.addf %133, %132 : vector<8x256xf32>
    %135 = arith.mulf %124, %134 : vector<8x256xf32>
    %136 = arith.truncf %135 : vector<8x256xf32> to vector<8x256xbf16>
    %c0_69 = arith.constant 0 : index
    %c0_70 = arith.constant 0 : index
    %137 = vector.load %arg13[%c0_69, %c0_70] : memref<256x128xbf16, #tpu.memory_space<vmem>>, vector<256x128xbf16>
    %cst_71 = arith.constant dense<0.000000e+00> : vector<8x128xf32>
    %138 = tpu.matmul %136, %137, %cst_71 {dimension_numbers = #tpu.dot_dimension_numbers<[1], [0], [0], [1], [0, 0, 1, 1], [], []>} : vector<8x256xbf16>, vector<256x128xbf16>, vector<8x128xf32> -> vector<8x128xf32>
    %c0_72 = arith.constant 0 : index
    %c0_73 = arith.constant 0 : index
    %139 = vector.load %arg14[%c0_72, %c0_73] : memref<1x128xf32, #tpu.memory_space<vmem>>, vector<1x128xf32>
    %140 = vector.broadcast %139 : vector<1x128xf32> to vector<8x128xf32>
    %141 = arith.addf %138, %140 : vector<8x128xf32>
    %142 = arith.addf %94, %141 : vector<8x128xf32>
    %c0_74 = arith.constant 0 : index
    %c0_75 = arith.constant 0 : index
    %c0_76 = arith.constant 0 : index
    %143 = vector.load %arg15[%c0_74, %c0_75, %c0_76] : memref<1x8x128xf32, #tpu.memory_space<vmem>>, vector<1x8x128xf32>
    %144 = vector.shape_cast %143 : vector<1x8x128xf32> to vector<8x128xf32>
    %145 = vector.shape_cast %142 : vector<8x128xf32> to vector<1x8x128xf32>
    tpu.vector_store %arg15[%c0_74, %c0_75, %c0_76], %145 {strides = array<i32>} : memref<1x8x128xf32, #tpu.memory_space<vmem>>, vector<1x8x128xf32>,
    return
  }
  func.func @transform_0(%arg0: i32, %arg1: i32) -> (i32, i32, i32) {
    %c0_i32 = arith.constant 0 : i32
    %c0_i32_0 = arith.constant 0 : i32
    %c0_i32_1 = arith.constant 0 : i32
    return %arg0, %c0_i32, %c0_i32_0 : i32, i32, i32
  }
  func.func @transform_1(%arg0: i32, %arg1: i32) -> (i32, i32) {
    %c0_i32 = arith.constant 0 : i32
    %c0_i32_0 = arith.constant 0 : i32
    %c0_i32_1 = arith.constant 0 : i32
    return %c0_i32, %c0_i32_0 : i32, i32
  }
  func.func @transform_2(%arg0: i32, %arg1: i32) -> (i32, i32) {
    %c0_i32 = arith.constant 0 : i32
    %c0_i32_0 = arith.constant 0 : i32
    %c0_i32_1 = arith.constant 0 : i32
    return %c0_i32, %c0_i32_0 : i32, i32
  }
  func.func @transform_3(%arg0: i32, %arg1: i32) -> (i32, i32) {
    %c0_i32 = arith.constant 0 : i32
    %c0_i32_0 = arith.constant 0 : i32
    %c0_i32_1 = arith.constant 0 : i32
    return %c0_i32, %c0_i32_0 : i32, i32
  }
  func.func @transform_4(%arg0: i32, %arg1: i32) -> (i32, i32) {
    %c0_i32 = arith.constant 0 : i32
    %c0_i32_0 = arith.constant 0 : i32
    %c0_i32_1 = arith.constant 0 : i32
    return %c0_i32, %c0_i32_0 : i32, i32
  }
  func.func @transform_5(%arg0: i32, %arg1: i32) -> (i32, i32) {
    %c0_i32 = arith.constant 0 : i32
    %c0_i32_0 = arith.constant 0 : i32
    %c0_i32_1 = arith.constant 0 : i32
    return %c0_i32, %c0_i32_0 : i32, i32
  }
  func.func @transform_6(%arg0: i32, %arg1: i32) -> (i32, i32) {
    %c0_i32 = arith.constant 0 : i32
    %c0_i32_0 = arith.constant 0 : i32
    %c0_i32_1 = arith.constant 0 : i32
    return %c0_i32, %c0_i32_0 : i32, i32
  }
  func.func @transform_7(%arg0: i32, %arg1: i32) -> (i32, i32) {
    %c0_i32 = arith.constant 0 : i32
    %c0_i32_0 = arith.constant 0 : i32
    %c0_i32_1 = arith.constant 0 : i32
    return %c0_i32, %c0_i32_0 : i32, i32
  }
  func.func @transform_8(%arg0: i32, %arg1: i32) -> (i32, i32) {
    %c0_i32 = arith.constant 0 : i32
    %c0_i32_0 = arith.constant 0 : i32
    %c0_i32_1 = arith.constant 0 : i32
    return %c0_i32, %c0_i32_0 : i32, i32
  }
  func.func @transform_9(%arg0: i32, %arg1: i32) -> (i32, i32) {
    %c0_i32 = arith.constant 0 : i32
    %c0_i32_0 = arith.constant 0 : i32
    %c0_i32_1 = arith.constant 0 : i32
    return %c0_i32, %c0_i32_0 : i32, i32
  }
  func.func @transform_10(%arg0: i32, %arg1: i32) -> (i32, i32) {
    %c0_i32 = arith.constant 0 : i32
    %c0_i32_0 = arith.constant 0 : i32
    %c0_i32_1 = arith.constant 0 : i32
    return %c0_i32, %c0_i32_0 : i32, i32
  }
  func.func @transform_11(%arg0: i32, %arg1: i32) -> (i32, i32) {
    %c0_i32 = arith.constant 0 : i32
    %c0_i32_0 = arith.constant 0 : i32
    %c0_i32_1 = arith.constant 0 : i32
    return %c0_i32, %c0_i32_0 : i32, i32
  }
  func.func @transform_12(%arg0: i32, %arg1: i32) -> (i32, i32) {
    %c0_i32 = arith.constant 0 : i32
    %c0_i32_0 = arith.constant 0 : i32
    %c0_i32_1 = arith.constant 0 : i32
    return %c0_i32, %c0_i32_0 : i32, i32
  }
  func.func @transform_13(%arg0: i32, %arg1: i32) -> (i32, i32, i32) {
    %c0_i32 = arith.constant 0 : i32
    %c0_i32_0 = arith.constant 0 : i32
    return %arg0, %arg1, %c0_i32 : i32, i32, i32
  }
}

module attributes {stable_mosaic.version = 11 : i64} {
  func.func @_embed_kernel(%arg0: i32, %arg1: memref<2x8xi32, #tpu.memory_space<smem>>, %arg2: memref<128x128xf32, #tpu.memory_space<any>>, %arg3: memref<8x128xf32, #tpu.memory_space<vmem>>, %arg4: memref<1x8x128xf32, #tpu.memory_space<vmem>>, %arg5: memref<8x128xf32, #tpu.memory_space<vmem>>, %arg6: memref<8x!tpu.dma_semaphore, #tpu.memory_space<semaphore_mem>>) attributes {dimension_semantics = [#tpu.dimension_semantics<parallel>], iteration_bounds = array<i64: 2>, scalar_prefetch = 1 : i64, scratch_operands = 2 : i64, tpu.core_type = #tpu.core_type<tc>, window_params = [{}, {transform_indices = @transform_1, window_bounds = array<i64: 8, 128>}, {transform_indices = @transform_2, window_bounds = array<i64: 1, 8, 128>}]} {
    %0 = arith.index_cast %arg0 : i32 to index
    %c0 = arith.constant 0 : index
    %1 = memref.load %arg1[%0, %c0] : memref<2x8xi32, #tpu.memory_space<smem>>
    %c0_i32 = arith.constant 0 : i32
    %c0_i32_0 = arith.constant 0 : i32
    %2 = tpu.memref_slice %arg2[%1, %c0_i32_0] : memref<128x128xf32, #tpu.memory_space<any>> -> memref<1x128xf32, #tpu.memory_space<any>>
    %c0_i32_1 = arith.constant 0 : i32
    %c0_i32_2 = arith.constant 0 : i32
    %3 = tpu.memref_slice %arg5[%c0_i32_1, %c0_i32_2] : memref<8x128xf32, #tpu.memory_space<vmem>> -> memref<1x128xf32, #tpu.memory_space<vmem>>
    %4 = tpu.memref_slice %arg6[%c0_i32] : memref<8x!tpu.dma_semaphore, #tpu.memory_space<semaphore_mem>> -> memref<1x!tpu.dma_semaphore, #tpu.memory_space<semaphore_mem>>
    %5 = tpu.memref_squeeze %4 : memref<1x!tpu.dma_semaphore, #tpu.memory_space<semaphore_mem>> -> memref<!tpu.dma_semaphore, #tpu.memory_space<semaphore_mem>>
    tpu.enqueue_dma source(%2 : memref<1x128xf32, #tpu.memory_space<any>>) target(%3 : memref<1x128xf32, #tpu.memory_space<vmem>>) target_semaphore(%5 : memref<!tpu.dma_semaphore, #tpu.memory_space<semaphore_mem>>)
    %6 = arith.index_cast %arg0 : i32 to index
    %c1 = arith.constant 1 : index
    %7 = memref.load %arg1[%6, %c1] : memref<2x8xi32, #tpu.memory_space<smem>>
    %c1_i32 = arith.constant 1 : i32
    %c0_i32_3 = arith.constant 0 : i32
    %8 = tpu.memref_slice %arg2[%7, %c0_i32_3] : memref<128x128xf32, #tpu.memory_space<any>> -> memref<1x128xf32, #tpu.memory_space<any>>
    %c1_i32_4 = arith.constant 1 : i32
    %c0_i32_5 = arith.constant 0 : i32
    %9 = tpu.memref_slice %arg5[%c1_i32_4, %c0_i32_5] : memref<8x128xf32, #tpu.memory_space<vmem>> -> memref<1x128xf32, #tpu.memory_space<vmem>>
    %10 = tpu.memref_slice %arg6[%c1_i32] : memref<8x!tpu.dma_semaphore, #tpu.memory_space<semaphore_mem>> -> memref<1x!tpu.dma_semaphore, #tpu.memory_space<semaphore_mem>>
    %11 = tpu.memref_squeeze %10 : memref<1x!tpu.dma_semaphore, #tpu.memory_space<semaphore_mem>> -> memref<!tpu.dma_semaphore, #tpu.memory_space<semaphore_mem>>
    tpu.enqueue_dma source(%8 : memref<1x128xf32, #tpu.memory_space<any>>) target(%9 : memref<1x128xf32, #tpu.memory_space<vmem>>) target_semaphore(%11 : memref<!tpu.dma_semaphore, #tpu.memory_space<semaphore_mem>>)
    %12 = arith.index_cast %arg0 : i32 to index
    %c2 = arith.constant 2 : index
    %13 = memref.load %arg1[%12, %c2] : memref<2x8xi32, #tpu.memory_space<smem>>
    %c2_i32 = arith.constant 2 : i32
    %c0_i32_6 = arith.constant 0 : i32
    %14 = tpu.memref_slice %arg2[%13, %c0_i32_6] : memref<128x128xf32, #tpu.memory_space<any>> -> memref<1x128xf32, #tpu.memory_space<any>>
    %c2_i32_7 = arith.constant 2 : i32
    %c0_i32_8 = arith.constant 0 : i32
    %15 = tpu.memref_slice %arg5[%c2_i32_7, %c0_i32_8] : memref<8x128xf32, #tpu.memory_space<vmem>> -> memref<1x128xf32, #tpu.memory_space<vmem>>
    %16 = tpu.memref_slice %arg6[%c2_i32] : memref<8x!tpu.dma_semaphore, #tpu.memory_space<semaphore_mem>> -> memref<1x!tpu.dma_semaphore, #tpu.memory_space<semaphore_mem>>
    %17 = tpu.memref_squeeze %16 : memref<1x!tpu.dma_semaphore, #tpu.memory_space<semaphore_mem>> -> memref<!tpu.dma_semaphore, #tpu.memory_space<semaphore_mem>>
    tpu.enqueue_dma source(%14 : memref<1x128xf32, #tpu.memory_space<any>>) target(%15 : memref<1x128xf32, #tpu.memory_space<vmem>>) target_semaphore(%17 : memref<!tpu.dma_semaphore, #tpu.memory_space<semaphore_mem>>)
    %18 = arith.index_cast %arg0 : i32 to index
    %c3 = arith.constant 3 : index
    %19 = memref.load %arg1[%18, %c3] : memref<2x8xi32, #tpu.memory_space<smem>>
    %c3_i32 = arith.constant 3 : i32
    %c0_i32_9 = arith.constant 0 : i32
    %20 = tpu.memref_slice %arg2[%19, %c0_i32_9] : memref<128x128xf32, #tpu.memory_space<any>> -> memref<1x128xf32, #tpu.memory_space<any>>
    %c3_i32_10 = arith.constant 3 : i32
    %c0_i32_11 = arith.constant 0 : i32
    %21 = tpu.memref_slice %arg5[%c3_i32_10, %c0_i32_11] : memref<8x128xf32, #tpu.memory_space<vmem>> -> memref<1x128xf32, #tpu.memory_space<vmem>>
    %22 = tpu.memref_slice %arg6[%c3_i32] : memref<8x!tpu.dma_semaphore, #tpu.memory_space<semaphore_mem>> -> memref<1x!tpu.dma_semaphore, #tpu.memory_space<semaphore_mem>>
    %23 = tpu.memref_squeeze %22 : memref<1x!tpu.dma_semaphore, #tpu.memory_space<semaphore_mem>> -> memref<!tpu.dma_semaphore, #tpu.memory_space<semaphore_mem>>
    tpu.enqueue_dma source(%20 : memref<1x128xf32, #tpu.memory_space<any>>) target(%21 : memref<1x128xf32, #tpu.memory_space<vmem>>) target_semaphore(%23 : memref<!tpu.dma_semaphore, #tpu.memory_space<semaphore_mem>>)
    %24 = arith.index_cast %arg0 : i32 to index
    %c4 = arith.constant 4 : index
    %25 = memref.load %arg1[%24, %c4] : memref<2x8xi32, #tpu.memory_space<smem>>
    %c4_i32 = arith.constant 4 : i32
    %c0_i32_12 = arith.constant 0 : i32
    %26 = tpu.memref_slice %arg2[%25, %c0_i32_12] : memref<128x128xf32, #tpu.memory_space<any>> -> memref<1x128xf32, #tpu.memory_space<any>>
    %c4_i32_13 = arith.constant 4 : i32
    %c0_i32_14 = arith.constant 0 : i32
    %27 = tpu.memref_slice %arg5[%c4_i32_13, %c0_i32_14] : memref<8x128xf32, #tpu.memory_space<vmem>> -> memref<1x128xf32, #tpu.memory_space<vmem>>
    %28 = tpu.memref_slice %arg6[%c4_i32] : memref<8x!tpu.dma_semaphore, #tpu.memory_space<semaphore_mem>> -> memref<1x!tpu.dma_semaphore, #tpu.memory_space<semaphore_mem>>
    %29 = tpu.memref_squeeze %28 : memref<1x!tpu.dma_semaphore, #tpu.memory_space<semaphore_mem>> -> memref<!tpu.dma_semaphore, #tpu.memory_space<semaphore_mem>>
    tpu.enqueue_dma source(%26 : memref<1x128xf32, #tpu.memory_space<any>>) target(%27 : memref<1x128xf32, #tpu.memory_space<vmem>>) target_semaphore(%29 : memref<!tpu.dma_semaphore, #tpu.memory_space<semaphore_mem>>)
    %30 = arith.index_cast %arg0 : i32 to index
    %c5 = arith.constant 5 : index
    %31 = memref.load %arg1[%30, %c5] : memref<2x8xi32, #tpu.memory_space<smem>>
    %c5_i32 = arith.constant 5 : i32
    %c0_i32_15 = arith.constant 0 : i32
    %32 = tpu.memref_slice %arg2[%31, %c0_i32_15] : memref<128x128xf32, #tpu.memory_space<any>> -> memref<1x128xf32, #tpu.memory_space<any>>
    %c5_i32_16 = arith.constant 5 : i32
    %c0_i32_17 = arith.constant 0 : i32
    %33 = tpu.memref_slice %arg5[%c5_i32_16, %c0_i32_17] : memref<8x128xf32, #tpu.memory_space<vmem>> -> memref<1x128xf32, #tpu.memory_space<vmem>>
    %34 = tpu.memref_slice %arg6[%c5_i32] : memref<8x!tpu.dma_semaphore, #tpu.memory_space<semaphore_mem>> -> memref<1x!tpu.dma_semaphore, #tpu.memory_space<semaphore_mem>>
    %35 = tpu.memref_squeeze %34 : memref<1x!tpu.dma_semaphore, #tpu.memory_space<semaphore_mem>> -> memref<!tpu.dma_semaphore, #tpu.memory_space<semaphore_mem>>
    tpu.enqueue_dma source(%32 : memref<1x128xf32, #tpu.memory_space<any>>) target(%33 : memref<1x128xf32, #tpu.memory_space<vmem>>) target_semaphore(%35 : memref<!tpu.dma_semaphore, #tpu.memory_space<semaphore_mem>>)
    %36 = arith.index_cast %arg0 : i32 to index
    %c6 = arith.constant 6 : index
    %37 = memref.load %arg1[%36, %c6] : memref<2x8xi32, #tpu.memory_space<smem>>
    %c6_i32 = arith.constant 6 : i32
    %c0_i32_18 = arith.constant 0 : i32
    %38 = tpu.memref_slice %arg2[%37, %c0_i32_18] : memref<128x128xf32, #tpu.memory_space<any>> -> memref<1x128xf32, #tpu.memory_space<any>>
    %c6_i32_19 = arith.constant 6 : i32
    %c0_i32_20 = arith.constant 0 : i32
    %39 = tpu.memref_slice %arg5[%c6_i32_19, %c0_i32_20] : memref<8x128xf32, #tpu.memory_space<vmem>> -> memref<1x128xf32, #tpu.memory_space<vmem>>
    %40 = tpu.memref_slice %arg6[%c6_i32] : memref<8x!tpu.dma_semaphore, #tpu.memory_space<semaphore_mem>> -> memref<1x!tpu.dma_semaphore, #tpu.memory_space<semaphore_mem>>
    %41 = tpu.memref_squeeze %40 : memref<1x!tpu.dma_semaphore, #tpu.memory_space<semaphore_mem>> -> memref<!tpu.dma_semaphore, #tpu.memory_space<semaphore_mem>>
    tpu.enqueue_dma source(%38 : memref<1x128xf32, #tpu.memory_space<any>>) target(%39 : memref<1x128xf32, #tpu.memory_space<vmem>>) target_semaphore(%41 : memref<!tpu.dma_semaphore, #tpu.memory_space<semaphore_mem>>)
    %42 = arith.index_cast %arg0 : i32 to index
    %c7 = arith.constant 7 : index
    %43 = memref.load %arg1[%42, %c7] : memref<2x8xi32, #tpu.memory_space<smem>>
    %c7_i32 = arith.constant 7 : i32
    %c0_i32_21 = arith.constant 0 : i32
    %44 = tpu.memref_slice %arg2[%43, %c0_i32_21] : memref<128x128xf32, #tpu.memory_space<any>> -> memref<1x128xf32, #tpu.memory_space<any>>
    %c7_i32_22 = arith.constant 7 : i32
    %c0_i32_23 = arith.constant 0 : i32
    %45 = tpu.memref_slice %arg5[%c7_i32_22, %c0_i32_23] : memref<8x128xf32, #tpu.memory_space<vmem>> -> memref<1x128xf32, #tpu.memory_space<vmem>>
    %46 = tpu.memref_slice %arg6[%c7_i32] : memref<8x!tpu.dma_semaphore, #tpu.memory_space<semaphore_mem>> -> memref<1x!tpu.dma_semaphore, #tpu.memory_space<semaphore_mem>>
    %47 = tpu.memref_squeeze %46 : memref<1x!tpu.dma_semaphore, #tpu.memory_space<semaphore_mem>> -> memref<!tpu.dma_semaphore, #tpu.memory_space<semaphore_mem>>
    tpu.enqueue_dma source(%44 : memref<1x128xf32, #tpu.memory_space<any>>) target(%45 : memref<1x128xf32, #tpu.memory_space<vmem>>) target_semaphore(%47 : memref<!tpu.dma_semaphore, #tpu.memory_space<semaphore_mem>>)
    %c0_i32_24 = arith.constant 0 : i32
    %c0_i32_25 = arith.constant 0 : i32
    %48 = tpu.memref_slice %arg2[%1, %c0_i32_25] : memref<128x128xf32, #tpu.memory_space<any>> -> memref<1x128xf32, #tpu.memory_space<any>>
    %c0_i32_26 = arith.constant 0 : i32
    %c0_i32_27 = arith.constant 0 : i32
    %49 = tpu.memref_slice %arg5[%c0_i32_26, %c0_i32_27] : memref<8x128xf32, #tpu.memory_space<vmem>> -> memref<1x128xf32, #tpu.memory_space<vmem>>
    %50 = tpu.memref_slice %arg6[%c0_i32_24] : memref<8x!tpu.dma_semaphore, #tpu.memory_space<semaphore_mem>> -> memref<1x!tpu.dma_semaphore, #tpu.memory_space<semaphore_mem>>
    %51 = tpu.memref_squeeze %50 : memref<1x!tpu.dma_semaphore, #tpu.memory_space<semaphore_mem>> -> memref<!tpu.dma_semaphore, #tpu.memory_space<semaphore_mem>>
    tpu.wait_dma2 semaphore(%51 : memref<!tpu.dma_semaphore, #tpu.memory_space<semaphore_mem>>) src(%48 : memref<1x128xf32, #tpu.memory_space<any>>) dst(%49 : memref<1x128xf32, #tpu.memory_space<vmem>>)
    %c1_i32_28 = arith.constant 1 : i32
    %c0_i32_29 = arith.constant 0 : i32
    %52 = tpu.memref_slice %arg2[%7, %c0_i32_29] : memref<128x128xf32, #tpu.memory_space<any>> -> memref<1x128xf32, #tpu.memory_space<any>>
    %c1_i32_30 = arith.constant 1 : i32
    %c0_i32_31 = arith.constant 0 : i32
    %53 = tpu.memref_slice %arg5[%c1_i32_30, %c0_i32_31] : memref<8x128xf32, #tpu.memory_space<vmem>> -> memref<1x128xf32, #tpu.memory_space<vmem>>
    %54 = tpu.memref_slice %arg6[%c1_i32_28] : memref<8x!tpu.dma_semaphore, #tpu.memory_space<semaphore_mem>> -> memref<1x!tpu.dma_semaphore, #tpu.memory_space<semaphore_mem>>
    %55 = tpu.memref_squeeze %54 : memref<1x!tpu.dma_semaphore, #tpu.memory_space<semaphore_mem>> -> memref<!tpu.dma_semaphore, #tpu.memory_space<semaphore_mem>>
    tpu.wait_dma2 semaphore(%55 : memref<!tpu.dma_semaphore, #tpu.memory_space<semaphore_mem>>) src(%52 : memref<1x128xf32, #tpu.memory_space<any>>) dst(%53 : memref<1x128xf32, #tpu.memory_space<vmem>>)
    %c2_i32_32 = arith.constant 2 : i32
    %c0_i32_33 = arith.constant 0 : i32
    %56 = tpu.memref_slice %arg2[%13, %c0_i32_33] : memref<128x128xf32, #tpu.memory_space<any>> -> memref<1x128xf32, #tpu.memory_space<any>>
    %c2_i32_34 = arith.constant 2 : i32
    %c0_i32_35 = arith.constant 0 : i32
    %57 = tpu.memref_slice %arg5[%c2_i32_34, %c0_i32_35] : memref<8x128xf32, #tpu.memory_space<vmem>> -> memref<1x128xf32, #tpu.memory_space<vmem>>
    %58 = tpu.memref_slice %arg6[%c2_i32_32] : memref<8x!tpu.dma_semaphore, #tpu.memory_space<semaphore_mem>> -> memref<1x!tpu.dma_semaphore, #tpu.memory_space<semaphore_mem>>
    %59 = tpu.memref_squeeze %58 : memref<1x!tpu.dma_semaphore, #tpu.memory_space<semaphore_mem>> -> memref<!tpu.dma_semaphore, #tpu.memory_space<semaphore_mem>>
    tpu.wait_dma2 semaphore(%59 : memref<!tpu.dma_semaphore, #tpu.memory_space<semaphore_mem>>) src(%56 : memref<1x128xf32, #tpu.memory_space<any>>) dst(%57 : memref<1x128xf32, #tpu.memory_space<vmem>>)
    %c3_i32_36 = arith.constant 3 : i32
    %c0_i32_37 = arith.constant 0 : i32
    %60 = tpu.memref_slice %arg2[%19, %c0_i32_37] : memref<128x128xf32, #tpu.memory_space<any>> -> memref<1x128xf32, #tpu.memory_space<any>>
    %c3_i32_38 = arith.constant 3 : i32
    %c0_i32_39 = arith.constant 0 : i32
    %61 = tpu.memref_slice %arg5[%c3_i32_38, %c0_i32_39] : memref<8x128xf32, #tpu.memory_space<vmem>> -> memref<1x128xf32, #tpu.memory_space<vmem>>
    %62 = tpu.memref_slice %arg6[%c3_i32_36] : memref<8x!tpu.dma_semaphore, #tpu.memory_space<semaphore_mem>> -> memref<1x!tpu.dma_semaphore, #tpu.memory_space<semaphore_mem>>
    %63 = tpu.memref_squeeze %62 : memref<1x!tpu.dma_semaphore, #tpu.memory_space<semaphore_mem>> -> memref<!tpu.dma_semaphore, #tpu.memory_space<semaphore_mem>>
    tpu.wait_dma2 semaphore(%63 : memref<!tpu.dma_semaphore, #tpu.memory_space<semaphore_mem>>) src(%60 : memref<1x128xf32, #tpu.memory_space<any>>) dst(%61 : memref<1x128xf32, #tpu.memory_space<vmem>>)
    %c4_i32_40 = arith.constant 4 : i32
    %c0_i32_41 = arith.constant 0 : i32
    %64 = tpu.memref_slice %arg2[%25, %c0_i32_41] : memref<128x128xf32, #tpu.memory_space<any>> -> memref<1x128xf32, #tpu.memory_space<any>>
    %c4_i32_42 = arith.constant 4 : i32
    %c0_i32_43 = arith.constant 0 : i32
    %65 = tpu.memref_slice %arg5[%c4_i32_42, %c0_i32_43] : memref<8x128xf32, #tpu.memory_space<vmem>> -> memref<1x128xf32, #tpu.memory_space<vmem>>
    %66 = tpu.memref_slice %arg6[%c4_i32_40] : memref<8x!tpu.dma_semaphore, #tpu.memory_space<semaphore_mem>> -> memref<1x!tpu.dma_semaphore, #tpu.memory_space<semaphore_mem>>
    %67 = tpu.memref_squeeze %66 : memref<1x!tpu.dma_semaphore, #tpu.memory_space<semaphore_mem>> -> memref<!tpu.dma_semaphore, #tpu.memory_space<semaphore_mem>>
    tpu.wait_dma2 semaphore(%67 : memref<!tpu.dma_semaphore, #tpu.memory_space<semaphore_mem>>) src(%64 : memref<1x128xf32, #tpu.memory_space<any>>) dst(%65 : memref<1x128xf32, #tpu.memory_space<vmem>>)
    %c5_i32_44 = arith.constant 5 : i32
    %c0_i32_45 = arith.constant 0 : i32
    %68 = tpu.memref_slice %arg2[%31, %c0_i32_45] : memref<128x128xf32, #tpu.memory_space<any>> -> memref<1x128xf32, #tpu.memory_space<any>>
    %c5_i32_46 = arith.constant 5 : i32
    %c0_i32_47 = arith.constant 0 : i32
    %69 = tpu.memref_slice %arg5[%c5_i32_46, %c0_i32_47] : memref<8x128xf32, #tpu.memory_space<vmem>> -> memref<1x128xf32, #tpu.memory_space<vmem>>
    %70 = tpu.memref_slice %arg6[%c5_i32_44] : memref<8x!tpu.dma_semaphore, #tpu.memory_space<semaphore_mem>> -> memref<1x!tpu.dma_semaphore, #tpu.memory_space<semaphore_mem>>
    %71 = tpu.memref_squeeze %70 : memref<1x!tpu.dma_semaphore, #tpu.memory_space<semaphore_mem>> -> memref<!tpu.dma_semaphore, #tpu.memory_space<semaphore_mem>>
    tpu.wait_dma2 semaphore(%71 : memref<!tpu.dma_semaphore, #tpu.memory_space<semaphore_mem>>) src(%68 : memref<1x128xf32, #tpu.memory_space<any>>) dst(%69 : memref<1x128xf32, #tpu.memory_space<vmem>>)
    %c6_i32_48 = arith.constant 6 : i32
    %c0_i32_49 = arith.constant 0 : i32
    %72 = tpu.memref_slice %arg2[%37, %c0_i32_49] : memref<128x128xf32, #tpu.memory_space<any>> -> memref<1x128xf32, #tpu.memory_space<any>>
    %c6_i32_50 = arith.constant 6 : i32
    %c0_i32_51 = arith.constant 0 : i32
    %73 = tpu.memref_slice %arg5[%c6_i32_50, %c0_i32_51] : memref<8x128xf32, #tpu.memory_space<vmem>> -> memref<1x128xf32, #tpu.memory_space<vmem>>
    %74 = tpu.memref_slice %arg6[%c6_i32_48] : memref<8x!tpu.dma_semaphore, #tpu.memory_space<semaphore_mem>> -> memref<1x!tpu.dma_semaphore, #tpu.memory_space<semaphore_mem>>
    %75 = tpu.memref_squeeze %74 : memref<1x!tpu.dma_semaphore, #tpu.memory_space<semaphore_mem>> -> memref<!tpu.dma_semaphore, #tpu.memory_space<semaphore_mem>>
    tpu.wait_dma2 semaphore(%75 : memref<!tpu.dma_semaphore, #tpu.memory_space<semaphore_mem>>) src(%72 : memref<1x128xf32, #tpu.memory_space<any>>) dst(%73 : memref<1x128xf32, #tpu.memory_space<vmem>>)
    %c7_i32_52 = arith.constant 7 : i32
    %c0_i32_53 = arith.constant 0 : i32
    %76 = tpu.memref_slice %arg2[%43, %c0_i32_53] : memref<128x128xf32, #tpu.memory_space<any>> -> memref<1x128xf32, #tpu.memory_space<any>>
    %c7_i32_54 = arith.constant 7 : i32
    %c0_i32_55 = arith.constant 0 : i32
    %77 = tpu.memref_slice %arg5[%c7_i32_54, %c0_i32_55] : memref<8x128xf32, #tpu.memory_space<vmem>> -> memref<1x128xf32, #tpu.memory_space<vmem>>
    %78 = tpu.memref_slice %arg6[%c7_i32_52] : memref<8x!tpu.dma_semaphore, #tpu.memory_space<semaphore_mem>> -> memref<1x!tpu.dma_semaphore, #tpu.memory_space<semaphore_mem>>
    %79 = tpu.memref_squeeze %78 : memref<1x!tpu.dma_semaphore, #tpu.memory_space<semaphore_mem>> -> memref<!tpu.dma_semaphore, #tpu.memory_space<semaphore_mem>>
    tpu.wait_dma2 semaphore(%79 : memref<!tpu.dma_semaphore, #tpu.memory_space<semaphore_mem>>) src(%76 : memref<1x128xf32, #tpu.memory_space<any>>) dst(%77 : memref<1x128xf32, #tpu.memory_space<vmem>>)
    %c0_56 = arith.constant 0 : index
    %c0_57 = arith.constant 0 : index
    %80 = vector.load %arg5[%c0_56, %c0_57] : memref<8x128xf32, #tpu.memory_space<vmem>>, vector<8x128xf32>
    %c0_58 = arith.constant 0 : index
    %c0_59 = arith.constant 0 : index
    %81 = vector.load %arg3[%c0_58, %c0_59] : memref<8x128xf32, #tpu.memory_space<vmem>>, vector<8x128xf32>
    %82 = arith.addf %80, %81 : vector<8x128xf32>
    %c0_60 = arith.constant 0 : index
    %c0_61 = arith.constant 0 : index
    %c0_62 = arith.constant 0 : index
    %83 = vector.load %arg4[%c0_60, %c0_61, %c0_62] : memref<1x8x128xf32, #tpu.memory_space<vmem>>, vector<1x8x128xf32>
    %84 = vector.shape_cast %83 : vector<1x8x128xf32> to vector<8x128xf32>
    %85 = vector.shape_cast %82 : vector<8x128xf32> to vector<1x8x128xf32>
    tpu.vector_store %arg4[%c0_60, %c0_61, %c0_62], %85 {strides = array<i32>} : memref<1x8x128xf32, #tpu.memory_space<vmem>>, vector<1x8x128xf32>,
    return
  }
  func.func @transform_1(%arg0: i32, %arg1: memref<2x8xi32, #tpu.memory_space<smem>>) -> (i32, i32) {
    %c0_i32 = arith.constant 0 : i32
    %c0_i32_0 = arith.constant 0 : i32
    %c0_i32_1 = arith.constant 0 : i32
    return %c0_i32, %c0_i32_0 : i32, i32
  }
  func.func @transform_2(%arg0: i32, %arg1: memref<2x8xi32, #tpu.memory_space<smem>>) -> (i32, i32, i32) {
    %c0_i32 = arith.constant 0 : i32
    %c0_i32_0 = arith.constant 0 : i32
    %c0_i32_1 = arith.constant 0 : i32
    return %arg0, %c0_i32, %c0_i32_0 : i32, i32, i32
  }
}

</mosaic_0001>

<bundles_post_ra>
// kernel: decoder_forward.3
= control target key start
LH: loop header
LB: loop body
LE: loop exit
PB: predicated region body
PF: predicated region fallthrough
CT: control target
= control target key end

     0   :  { %s1125_s0 = inlined_call_operand.hbm [shape: s32[2,8], index: 0, kind: input, shape index: {}]   ;;  %s1126_s1 = inlined_call_operand.hbm [shape: f32[128,128], index: 1, kind: input, shape index: {}]   ;;  %s1127_s2 = inlined_call_operand.hbm [shape: f32[16,128], index: 2, kind: input, shape index: {}]   ;;  %s1128_s3 = inlined_call_operand.hbm [shape: f32[2,8,128], index: 3, kind: output, shape index: {}]  }
   0x1   :  { %1133 = sst [smem:[#allocation39_spill]] %s1127_s2  ;;  %s499_s14 = scalar_lea.hbm %s1125_s0, 32 }
   0x2   :  { %p500_p0 = scmp.ne.s32.totalorder %s1125_s0, %s499_s14  ;;  %p503_p1 = scmp.lt.u32.totalorder %s499_s14, %s1125_s0 }
   0x4   :  { %p505_p2 = pnand %p503_p1, %p500_p0 }
   0x6   :  { %508 = shalt.err (!%p505_p2)  }
   0x7   :  { %s815_s19 = smov [#allocation5]  }
   0x8   :  { %9 = dma.hbm_to_smem %s1125_s0, 32, %s815_s19, [#allocation4] }
   0x9   :  { %773 = dma.done.wait [#allocation4], 32 }
   0xa   :  { %774 = vsyncadd [#allocation4], 4294967264 }
   0xb   :  { %11 = sfence }
   0xc   :  { %12 = vsyncpa [#allocation7], 0 }
   0xd   :  { %13 = vsyncpa [#allocation8], 0 }
   0xe   :  { %15 = vsyncpa [#allocation8 + $0x1], 0  ;;  %s858_s22 = smov 0   ;;  %s860_s23 = smov 0  }
   0xf   :  { %s862_s24 = smov 0   ;;  %s864_s25 = smov 0  }
  0x10 LB: > { %s879_s0 = sadd.s32 4294967295, %s813_s25   ;;  %s413_s26 = sadd.s32 4294967294, %s813_s25   ;;  %s813_s25 = sphi %s864_s25, %s1148_s25   ;;  %s809_s24 = sphi %s862_s24, %s1147_s24   ;;  %s805_s23 = sphi %s860_s23, %s1146_s23   ;;  %s801_s22 = sphi %s858_s22, %s1145_s22  }
  0x11   : > { %s883_s27 = sadd.s32 1, %s813_s25   ;;  %s49_s28 = sadd.s32 1, %s809_s24 }
  0x12   : > { %s46_s29 = ssub.s32 %s813_s25, %s883_s27  ;;  %p59_p3 = scmp.ne.s32.totalorder %s809_s24, %s805_s23 }
  0x13   : > { %p47_p4 = scmp.eq.s32.totalorder %s46_s29, 0  ;;  %p60_p5 = scmp.eq.s32.totalorder %s879_s0, 1 }
  0x14   : > { %p65_p6 = scmp.ne.s32.totalorder %s805_s23, %s801_s22  ;;  %p66_p7 = scmp.eq.s32.totalorder %s413_s26, 1 }
  0x15   : > { %s894_s30 = scalar_select %p47_p4, %s809_s24, %s49_s28  }
  0x16   : > { %p896_p8 = por %p60_p5, %p59_p3  ;;  %p900_p9 = por %p66_p7, %p65_p6 }
  0x17   : > { %p414_p10 = scmp.ge.s32.totalorder %s813_s25, 1  ;;  %p73_p11 = scmp.lt.s32.totalorder %s813_s25, 3 }
  0x18   : > { %s1134_s4 = scalar_select %p896_p8, 1, 0 }
  0x19   : > { %s1135_s5 = scalar_select %p900_p9, 1, 0 }
  0x1a   : > { %p1129_p12 = scmp.eq.s32.totalorder %s879_s0, 0  ;;  %p907_p13 = pnand %p414_p10, %p73_p11 }
  0x1b   : > { %s816_s7 = smov [#allocation6]   ;;  %s1138_s2 = sld [smem:[#allocation39_spill]] }
  0x1c   : > { %s1136_s6 = scalar_select %p907_p13, 1, 0 }
  0x1d   : > { %s86_s8 = sshll.u32 %s816_s7, 4  ;;  %p446_p0 = pneg %p907_p13  ;;  %s87_s8 = int_to_ptr.vmem [resolvable:$true] %s86_s8 }
  0x1f   : > { %p915_p1 = pnand %p1129_p12, %p446_p0 }
  0x21   : > { %s509_s12 = scalar_lea.hbm %s1138_s2, 128  ;;  %p511_p3 = pneg %p915_p1 }
  0x22   : > { %p510_p2 = scmp.ne.s32.totalorder %s1138_s2, %s509_s12  ;;  %s514_s17 = scalar_lea.hbm %s1138_s2, 256 }
  0x23   : > { %p515_p6 = scmp.lt.u32.totalorder %s514_s17, %s509_s12  ;;  %p516_p7 = scmp.lt.u32.totalorder %s509_s12, %s1138_s2 }
  0x24   : > { %p512_p4 = pnand %p511_p3, %p510_p2 }
  0x25   : > { %p517_p10 = por %p516_p7, %p515_p6 }
  0x26   : > { %p513_p5 = pneg %p512_p4 }
  0x28   : > { %p518_p11 = pnand %p517_p10, %p513_p5 }
  0x2a   : > { %521 = shalt.err (!%p518_p11)
}
  0x2b   : > { %s522_s20 = scalar_lea.vmem %s87_s8, 128  ;;  %p530_p8 = scmp.lt.s32.totalorder %s87_s8, %s87_s8 }
  0x2c   : > { %p523_p0 = scmp.ne.s32.totalorder %s87_s8, %s522_s20  ;;  %p531_p13 = scmp.lt.s32.totalorder %s522_s20, %s522_s20 }
  0x2e   : > { %p525_p12 = pnand %p523_p0, %p511_p3  ;;  %p532_p2 = por %p531_p13, %p530_p8 }
  0x30   : > { %p526_p9 = pneg %p525_p12 }
  0x32   : > { %p533_p4 = pnand %p532_p2, %p526_p9 }
  0x34   : > { %536 = shalt.err (!%p533_p4)
}
  0x35   : > { %449 = dma.hbm_to_vmem [thread:$0]  (!%p915_p1), %s1138_s2, 128, %s87_s8, [#allocation7]  }
  0x36   : > { %p1139_p6 = scmp.ne.s32.totalorder %s1136_s6, 0 }
  0x37   : > { %p1140_p5 = scmp.eq.s32.totalorder (!%p1139_p6), %s879_s0, 0 }
  0x38   : > { %99 = sbr.rel (%p1139_p6) target bundleno = 286 (0x11e), region = 24 }
  0x3f   : > { %776 = dma.done.wait (%p1140_p5), [#allocation7], 128   ;;  %p1141_p3 = pmov %p1140_p5 }
  0x40   : > { %s1132_s28 = sand.u32 1, %s805_s23   ;;  %s946_s29 = sshll.u32 %s879_s0, 7 }
  0x41   : > { %778 = vsyncadd (%p1141_p3), [#allocation7], 4294967168  ;;  %s950_s7 = sshll.u32 %s1132_s28, 3  ;;  %s115_s6 = sld [smem:[#allocation5 + %s946_s29]] }
  0x42   : > { %s817_s8 = smov [#allocation2]   ;;  %s129_s10 = sadd.s32 1, %s946_s29 }
  0x43   : > { %s125_s9 = sshll.u32 %s817_s8, 4  ;;  %s956_s11 = sld [smem:[#allocation5 + %s129_s10]]  ;;  %s954_s9 = int_to_ptr.vmem [resolvable:$true] %s125_s9 }
  0x44   : > { %s146_s12 = sadd.s32 2, %s946_s29  ;;  %s818_s13 = smov [#allocation2 + $0x1]  }
  0x45   : > { %s142_s14 = sshll.u32 %s818_s13, 4  ;;  %s959_s15 = sld [smem:[#allocation5 + %s146_s12]]  ;;  %s961_s14 = int_to_ptr.vmem [resolvable:$true] %s142_s14 }
  0x46   : > { %s969_s26 = scalar_lea.hbm %s1126_s1, 2048 }
  0x47   : > { %s420_s0 = sshll.u32 %s115_s6, 4 }
  0x48   : > { %s117_s18 = scalar_lea.hbm %s1126_s1, %s420_s0 }
  0x49   : > { %s537_s19 = scalar_lea.hbm %s117_s18, 16  ;;  %p540_p9 = scmp.lt.u32.totalorder %s117_s18, %s1126_s1 }
  0x4a   : > { %p538_p8 = scmp.ne.s32.totalorder %s117_s18, %s537_s19  ;;  %p541_p12 = scmp.lt.u32.totalorder %s969_s26, %s537_s19 }
  0x4b   : > { %p543_p1 = scmp.lt.u32.totalorder %s537_s19, %s117_s18 }
  0x4c   : > { %p542_p13 = por %p541_p12, %p540_p9 }
  0x4e   : > { %p544_p7 = por %p543_p1, %p542_p13 }
  0x50   : > { %p545_p10 = pnand %p544_p7, %p538_p8 }
  0x52   : > { %548 = shalt.err (!%p545_p10)  }
  0x53   : > { %s549_s6 = scalar_lea.vmem %s954_s9, 16  ;;  %s978_s12 = scalar_lea.vmem %s954_s9, 128 }
  0x54   : > { %p550_p11 = scmp.ne.s32.totalorder %s954_s9, %s549_s6  ;;  %p554_p0 = scmp.lt.s32.totalorder %s954_s9, %s954_s9 }
  0x55   : > { %p555_p2 = scmp.lt.s32.totalorder %s978_s12, %s549_s6 }
  0x57   : > { %p556_p4 = por %p555_p2, %p554_p0 }
  0x59   : > { %p557_p6 = pnand %p556_p4, %p550_p11 }
  0x5b   : > { %560 = shalt.err (!%p557_p6)  }
  0x5c   : > { %128 = dma.hbm_to_vmem [thread:$0]  %s117_s18, 16, %s954_s9, [#allocation3] }
  0x5d   : > { %s421_s13 = sshll.u32 %s956_s11, 4  ;;  %s819_s0 = smov [#allocation2 + $0x2]  }
  0x5e   : > { %s159_s16 = sshll.u32 %s819_s0, 4  ;;  %s132_s20 = scalar_lea.hbm %s1126_s1, %s421_s13  ;;  %s988_s16 = int_to_ptr.vmem [resolvable:$true] %s159_s16 }
  0x5f   : > { %s561_s21 = scalar_lea.hbm %s132_s20, 16  ;;  %p564_p3 = scmp.lt.u32.totalorder %s132_s20, %s1126_s1 }
  0x60   : > { %p562_p5 = scmp.ne.s32.totalorder %s132_s20, %s561_s21  ;;  %p565_p8 = scmp.lt.u32.totalorder %s969_s26, %s561_s21 }
  0x61   : > { %p567_p12 = scmp.lt.u32.totalorder %s561_s21, %s132_s20 }
  0x62   : > { %p566_p9 = por %p565_p8, %p564_p3 }
  0x64   : > { %p568_p13 = por %p567_p12, %p566_p9 }
  0x66   : > { %p569_p1 = pnand %p568_p13, %p562_p5 }
  0x68   : > { %572 = shalt.err (!%p569_p1)  }
  0x69   : > { %s573_s11 = scalar_lea.vmem %s961_s14, 16  ;;  %p578_p10 = scmp.lt.s32.totalorder %s961_s14, %s954_s9 }
  0x6a   : > { %p574_p7 = scmp.ne.s32.totalorder %s961_s14, %s573_s11  ;;  %p579_p11 = scmp.lt.s32.totalorder %s978_s12, %s573_s11 }
  0x6c   : > { %p580_p0 = por %p579_p11, %p578_p10 }
  0x6e   : > { %p581_p2 = pnand %p580_p0, %p574_p7 }
  0x70   : > { %584 = shalt.err (!%p581_p2)  }
  0x71   : > { %145 = dma.hbm_to_vmem [thread:$0]  %s132_s20, 16, %s961_s14, [#allocation3 + $0x1] }
  0x72   : > { %s422_s18 = sshll.u32 %s959_s15, 4  ;;  %s163_s6 = sadd.s32 3, %s946_s29 }
  0x73   : > { %s149_s17 = scalar_lea.hbm %s1126_s1, %s422_s18  ;;  %s1005_s19 = sld [smem:[#allocation5 + %s163_s6]] }
  0x74   : > { %s585_s21 = scalar_lea.hbm %s149_s17, 16  ;;  %p588_p6 = scmp.lt.u32.totalorder %s149_s17, %s1126_s1 }
  0x75   : > { %p586_p4 = scmp.ne.s32.totalorder %s149_s17, %s585_s21  ;;  %p589_p5 = scmp.lt.u32.totalorder %s969_s26, %s585_s21 }
  0x76   : > { %p591_p8 = scmp.lt.u32.totalorder %s585_s21, %s149_s17 }
  0x77   : > { %p590_p3 = por %p589_p5, %p588_p6 }
  0x79   : > { %p592_p9 = por %p591_p8, %p590_p3 }
  0x7b   : > { %p593_p12 = pnand %p592_p9, %p586_p4 }
  0x7d   : > { %596 = shalt.err (!%p593_p12)  }
  0x7e   : > { %s597_s14 = scalar_lea.vmem %s988_s16, 16  ;;  %p602_p1 = scmp.lt.s32.totalorder %s988_s16, %s954_s9 }
  0x7f   : > { %p598_p13 = scmp.ne.s32.totalorder %s988_s16, %s597_s14  ;;  %p603_p7 = scmp.lt.s32.totalorder %s978_s12, %s597_s14 }
  0x81   : > { %p604_p10 = por %p603_p7, %p602_p1 }
  0x83   : > { %p605_p11 = pnand %p604_p10, %p598_p13 }
  0x85   : > { %608 = shalt.err (!%p605_p11)  }
  0x86   : > { %162 = dma.hbm_to_vmem [thread:$0]  %s149_s17, 16, %s988_s16, [#allocation3 + $0x2] }
  0x87   : > { %s180_s15 = sadd.s32 4, %s946_s29  ;;  %s820_s20 = smov [#allocation2 + $0x3]  }
  0x88   : > { %s176_s11 = sshll.u32 %s820_s20, 4  ;;  %s181_s18 = sld [smem:[#allocation5 + %s180_s15]]  ;;  %s177_s11 = int_to_ptr.vmem [resolvable:$true] %s176_s11 }
  0x89   : > { %s821_s6 = smov [#allocation2 + $0x4]   ;;  %s197_s0 = sadd.s32 5, %s946_s29 }
  0x8a   : > { %s193_s13 = sshll.u32 %s821_s6, 4  ;;  %s423_s21 = sshll.u32 %s1005_s19, 4  ;;  %s1020_s13 = int_to_ptr.vmem [resolvable:$true] %s193_s13 }
  0x8b   : > { %s166_s14 = scalar_lea.hbm %s1126_s1, %s423_s21  ;;  %s1025_s28 = sld [smem:[#allocation5 + %s197_s0]] }
  0x8c   : > { %s609_s2 = scalar_lea.hbm %s166_s14, 16  ;;  %p612_p2 = scmp.lt.u32.totalorder %s166_s14, %s1126_s1 }
  0x8d   : > { %p610_p0 = scmp.ne.s32.totalorder %s166_s14, %s609_s2  ;;  %p613_p4 = scmp.lt.u32.totalorder %s969_s26, %s609_s2 }
  0x8e   : > { %p615_p5 = scmp.lt.u32.totalorder %s609_s2, %s166_s14 }
  0x8f   : > { %p614_p6 = por %p613_p4, %p612_p2 }
  0x91   : > { %p616_p3 = por %p615_p5, %p614_p6 }
  0x93   : > { %p617_p8 = pnand %p616_p3, %p610_p0 }
  0x95   : > { %620 = shalt.err (!%p617_p8)  }
  0x96   : > { %s621_s19 = scalar_lea.vmem %s177_s11, 16  ;;  %p626_p12 = scmp.lt.s32.totalorder %s177_s11, %s954_s9 }
  0x97   : > { %p622_p9 = scmp.ne.s32.totalorder %s177_s11, %s621_s19  ;;  %p627_p13 = scmp.lt.s32.totalorder %s978_s12, %s621_s19 }
  0x99   : > { %p628_p1 = por %p627_p13, %p626_p12 }
  0x9b   : > { %p629_p7 = pnand %p628_p1, %p622_p9 }
  0x9d   : > { %632 = shalt.err (!%p629_p7)  }
  0x9e   : > { %179 = dma.hbm_to_vmem [thread:$0]  %s166_s14, 16, %s177_s11, [#allocation3 + $0x3] }
  0x9f   : > { %s424_s15 = sshll.u32 %s181_s18, 4  ;;  %s822_s2 = smov [#allocation2 + $0x5]  }
  0xa0   : > { %s183_s0 = scalar_lea.hbm %s1126_s1, %s424_s15  ;;  %s210_s21 = sshll.u32 %s822_s2, 4  ;;  %s211_s21 = int_to_ptr.vmem [resolvable:$true] %s210_s21 }
  0xa1   : > { %s633_s8 = scalar_lea.hbm %s183_s0, 16  ;;  %p636_p11 = scmp.lt.u32.totalorder %s183_s0, %s1126_s1 }
  0xa2   : > { %p634_p10 = scmp.ne.s32.totalorder %s183_s0, %s633_s8  ;;  %p637_p0 = scmp.lt.u32.totalorder %s969_s26, %s633_s8 }
  0xa3   : > { %p639_p4 = scmp.lt.u32.totalorder %s633_s8, %s183_s0 }
  0xa4   : > { %p638_p2 = por %p637_p0, %p636_p11 }
  0xa6   : > { %p640_p6 = por %p639_p4, %p638_p2 }
  0xa8   : > { %p641_p5 = pnand %p640_p6, %p634_p10 }
  0xaa   : > { %644 = shalt.err (!%p641_p5)  }
  0xab   : > { %s645_s11 = scalar_lea.vmem %s1020_s13, 16  ;;  %p650_p8 = scmp.lt.s32.totalorder %s1020_s13, %s954_s9 }
  0xac   : > { %p646_p3 = scmp.ne.s32.totalorder %s1020_s13, %s645_s11  ;;  %p651_p9 = scmp.lt.s32.totalorder %s978_s12, %s645_s11 }
  0xae   : > { %p652_p12 = por %p651_p9, %p650_p8 }
  0xb0   : > { %p653_p13 = pnand %p652_p12, %p646_p3 }
  0xb2   : > { %656 = shalt.err (!%p653_p13)  }
  0xb3   : > { %196 = dma.hbm_to_vmem [thread:$0]  %s183_s0, 16, %s1020_s13, [#allocation3 + $0x4] }
  0xb4   : > { %s214_s18 = sadd.s32 6, %s946_s29  ;;  %s425_s14 = sshll.u32 %s1025_s28, 4 }
  0xb5   : > { %s215_s17 = sld [smem:[#allocation5 + %s214_s18]]  ;;  %s200_s20 = scalar_lea.hbm %s1126_s1, %s425_s14 }
  0xb6   : > { %s657_s6 = scalar_lea.hbm %s200_s20, 16  ;;  %p660_p7 = scmp.lt.u32.totalorder %s200_s20, %s1126_s1 }
  0xb7   : > { %p658_p1 = scmp.ne.s32.totalorder %s200_s20, %s657_s6  ;;  %p661_p10 = scmp.lt.u32.totalorder %s969_s26, %s657_s6 }
  0xb8   : > { %p663_p0 = scmp.lt.u32.totalorder %s657_s6, %s200_s20 }
  0xb9   : > { %p662_p11 = por %p661_p10, %p660_p7 }
  0xbb   : > { %p664_p2 = por %p663_p0, %p662_p11 }
  0xbd   : > { %p665_p4 = pnand %p664_p2, %p658_p1 }
  0xbf   : > { %668 = shalt.err (!%p665_p4)  }
  0xc0   : > { %s669_s13 = scalar_lea.vmem %s211_s21, 16  ;;  %p674_p5 = scmp.lt.s32.totalorder %s211_s21, %s954_s9 }
  0xc1   : > { %p670_p6 = scmp.ne.s32.totalorder %s211_s21, %s669_s13  ;;  %p675_p3 = scmp.lt.s32.totalorder %s978_s12, %s669_s13 }
  0xc3   : > { %p676_p8 = por %p675_p3, %p674_p5 }
  0xc5   : > { %p677_p9 = pnand %p676_p8, %p670_p6 }
  0xc7   : > { %680 = shalt.err (!%p677_p9)  }
  0xc8   : > { %213 = dma.hbm_to_vmem [thread:$0]  %s200_s20, 16, %s211_s21, [#allocation3 + $0x5] }
  0xc9   : > { %s823_s28 = smov [#allocation2 + $0x6]   ;;  %s231_s10 = sadd.s32 7, %s946_s29 }
  0xca   : > { %s227_s0 = sshll.u32 %s823_s28, 4  ;;  %s232_s16 = sld [smem:[#allocation5 + %s231_s10]]  ;;  %s228_s0 = int_to_ptr.vmem [resolvable:$true] %s227_s0 }
  0xcb   : > { %s426_s11 = sshll.u32 %s215_s17, 4  ;;  %s824_s18 = smov [#allocation2 + $0x7]  }
  0xcc   : > { %s244_s14 = sshll.u32 %s824_s18, 4  ;;  %s217_s6 = scalar_lea.hbm %s1126_s1, %s426_s11  ;;  %s245_s14 = int_to_ptr.vmem [resolvable:$true] %s244_s14 }
  0xcd   : > { %s681_s2 = scalar_lea.hbm %s217_s6, 16  ;;  %p684_p13 = scmp.lt.u32.totalorder %s217_s6, %s1126_s1 }
  0xce   : > { %p682_p12 = scmp.ne.s32.totalorder %s217_s6, %s681_s2  ;;  %p685_p1 = scmp.lt.u32.totalorder %s969_s26, %s681_s2 }
  0xcf   : > { %p687_p10 = scmp.lt.u32.totalorder %s681_s2, %s217_s6 }
  0xd0   : > { %p686_p7 = por %p685_p1, %p684_p13 }
  0xd2   : > { %p688_p11 = por %p687_p10, %p686_p7 }
  0xd4   : > { %p689_p0 = pnand %p688_p11, %p682_p12 }
  0xd6   : > { %692 = shalt.err (!%p689_p0)  }
  0xd7   : > { %s693_s21 = scalar_lea.vmem %s228_s0, 16  ;;  %p698_p4 = scmp.lt.s32.totalorder %s228_s0, %s954_s9 }
  0xd8   : > { %p694_p2 = scmp.ne.s32.totalorder %s228_s0, %s693_s21  ;;  %p699_p6 = scmp.lt.s32.totalorder %s978_s12, %s693_s21 }
  0xda   : > { %p700_p5 = por %p699_p6, %p698_p4 }
  0xdc   : > { %p701_p3 = pnand %p700_p5, %p694_p2 }
  0xde   : > { %704 = shalt.err (!%p701_p3)  }
  0xdf   : > { %230 = dma.hbm_to_vmem [thread:$0]  %s217_s6, 16, %s228_s0, [#allocation3 + $0x6] }
  0xe0   : > { %s427_s17 = sshll.u32 %s232_s16, 4 }
  0xe1   : > { %s234_s10 = scalar_lea.hbm %s1126_s1, %s427_s17 }
  0xe2   : > { %s705_s11 = scalar_lea.hbm %s234_s10, 16  ;;  %p708_p9 = scmp.lt.u32.totalorder %s234_s10, %s1126_s1 }
  0xe3   : > { %p706_p8 = scmp.ne.s32.totalorder %s234_s10, %s705_s11  ;;  %p709_p12 = scmp.lt.u32.totalorder %s969_s26, %s705_s11 }
  0xe4   : > { %p711_p1 = scmp.lt.u32.totalorder %s705_s11, %s234_s10 }
  0xe5   : > { %p710_p13 = por %p709_p12, %p708_p9 }
  0xe7   : > { %p712_p7 = por %p711_p1, %p710_p13 }
  0xe9   : > { %p713_p10 = pnand %p712_p7, %p706_p8 }
  0xeb   : > { %716 = shalt.err (!%p713_p10)  }
  0xec   : > { %s717_s0 = scalar_lea.vmem %s245_s14, 16  ;;  %p722_p0 = scmp.lt.s32.totalorder %s245_s14, %s954_s9 }
  0xed   : > { %p718_p11 = scmp.ne.s32.totalorder %s245_s14, %s717_s0  ;;  %p723_p2 = scmp.lt.s32.totalorder %s978_s12, %s717_s0 }
  0xef   : > { %p724_p4 = por %p723_p2, %p722_p0 }
  0xf1   : > { %p725_p6 = pnand %p724_p4, %p718_p11 }
  0xf3   : > { %728 = shalt.err (!%p725_p6)  }
  0xf4   : > { %247 = dma.hbm_to_vmem [thread:$0]  %s234_s10, 16, %s245_s14, [#allocation3 + $0x7] }
  0xf5   : > { %s113_s16 = scalar_lea.vmem [#allocation9], %s950_s7 }
  0xf6   : > { %779 = dma.done.wait [#allocation3], 16 }
  0xf7   : > { %780 = vsyncadd [#allocation3], 4294967280 }
  0xf8   : > { %781 = dma.done.wait [#allocation3 + $0x1], 16 }
  0xf9   : > { %782 = vsyncadd [#allocation3 + $0x1], 4294967280 }
  0xfa   : > { %783 = dma.done.wait [#allocation3 + $0x2], 16 }
  0xfb   : > { %784 = vsyncadd [#allocation3 + $0x2], 4294967280 }
  0xfc   : > { %785 = dma.done.wait [#allocation3 + $0x3], 16 }
  0xfd   : > { %786 = vsyncadd [#allocation3 + $0x3], 4294967280 }
  0xfe   : > { %787 = dma.done.wait [#allocation3 + $0x4], 16 }
  0xff   : > { %788 = vsyncadd [#allocation3 + $0x4], 4294967280 }
 0x100   : > { %789 = dma.done.wait [#allocation3 + $0x5], 16 }
 0x101   : > { %790 = vsyncadd [#allocation3 + $0x5], 4294967280 }
 0x102   : > { %791 = dma.done.wait [#allocation3 + $0x6], 16 }
 0x103   : > { %792 = vsyncadd [#allocation3 + $0x6], 4294967280 }
 0x104   : > { %793 = dma.done.wait [#allocation3 + $0x7], 16 }
 0x105   : > { %794 = vsyncadd [#allocation3 + $0x7], 4294967280  ;;  %s283_s7 = sshll.u32 %s113_s16, 4  ;;  %v265_v0 = vld [vmem:[#allocation2] sm:$0xff]  ;;  %v266_v1 = vld [vmem:[#allocation6] sm:$0xff]  ;;  %s1081_s12 = scalar_lea.hbm %s1128_s3, %s946_s29  ;;  %s1083_s7 = int_to_ptr.vmem [resolvable:$true] %s283_s7 }
 0x106   : > { %v267_v2 = vadd.f32 %v266_v1, %v265_v0  ;;  %s1142_s14 = sand.u32 1, %s805_s23   ;;  %s729_s6 = scalar_lea.vmem %s1083_s7, 128 }
 0x107   : > { %s270_s15 = scalar_lea.sflag [#allocation8], %s1142_s14  ;;  %p730_p5 = scmp.ne.s32.totalorder %s1083_s7, %s729_s6 }
 0x108   : > { %268 = vst [vmem:[%s113_s16] sm:$0xff] %v267_v2  ;;  %p1143_p3 = scmp.ne.s32.totalorder %s1134_s4, 0  ;;  %s825_s2 = smov [#allocation9]  }
 0x109   : > { %s733_s8 = sshll.u32 %s825_s2, 4  ;;  %s734_s8 = int_to_ptr.vmem [resolvable:$false] %s733_s8 }
 0x10a   : > { %p731_p8 = pnand %p730_p5, %p1143_p3  ;;  %s735_s13 = scalar_lea.vmem %s734_s8, 256 }
 0x10b   : > { %p736_p12 = scmp.lt.s32.totalorder %s1083_s7, %s734_s8  ;;  %p737_p13 = scmp.lt.s32.totalorder %s735_s13, %s729_s6 }
 0x10c   : > { %p732_p9 = pneg %p731_p8 }
 0x10d   : > { %p738_p1 = por %p737_p13, %p736_p12 }
 0x10f   : > { %p739_p7 = pnand %p738_p1, %p732_p9 }
 0x111   : > { %742 = shalt.err (!%p739_p7)
}
 0x112   : > { %s743_s29 = scalar_lea.hbm %s1081_s12, 128  ;;  %s747_s20 = scalar_lea.hbm %s1128_s3, 256 }
 0x113   : > { %p744_p10 = scmp.ne.s32.totalorder %s1081_s12, %s743_s29  ;;  %p748_p2 = scmp.lt.u32.totalorder %s1081_s12, %s1128_s3 }
 0x114   : > { %p749_p4 = scmp.lt.u32.totalorder %s747_s20, %s743_s29  ;;  %p751_p5 = scmp.lt.u32.totalorder %s743_s29, %s1081_s12 }
 0x115   : > { %p745_p11 = pnand %p744_p10, %p1143_p3 }
 0x116   : > { %p750_p6 = por %p749_p4, %p748_p2 }
 0x117   : > { %p746_p0 = pneg %p745_p11 }
 0x118   : > { %p752_p8 = por %p751_p5, %p750_p6 }
 0x11a   : > { %p753_p9 = pnand %p752_p8, %p746_p0 }
 0x11c   : > { %756 = shalt.err (!%p753_p9)
}
 0x11d   : > { %444 = dma.vmem_to_hbm [thread:$0]  (%p1143_p3), %s1083_s7, 128, %s1081_s12, %s270_s15  }
 0x11e PF: > { %p456_p12 = scmp.ge.s32.totalorder %s813_s25, 2  ;;  %s295_s11 = sand.u32 1, %s801_s22  }
 0x11f   : > { %p1144_p13 = scmp.ne.s32.totalorder %s1135_s5, 0  ;;  %s296_s18 = scalar_lea.sflag [#allocation8], %s295_s11 }
 0x121   : > { %p451_p1 = pnand %p456_p12, %p1144_p13 }
 0x123   : > { %796 = dma.done.wait (!%p451_p1), %s296_s18, 128  }
 0x124   : > { %798 = vsyncadd (!%p451_p1), %s296_s18, 4294967168  ;;  %p18_p7 = scmp.ge.s32.totalorder %s883_s27, 4   ;;  %s1145_s22 = smov %s805_s23 }
 0x125   : > { %s1146_s23 = smov %s809_s24  ;;  %s1147_s24 = smov %s894_s30 }
 0x126   : > { %s1148_s25 = smov %s883_s27  ;;  %20 = sbr.rel (!%p18_p7) target bundleno = 16 (0x10), region = 122 }
 0x12d   :  { %301 = vsyncpa [#allocation7], 1 }
 0x12e   :  { %303 = vsyncpa [#allocation7 + $0x1], 1 }
 0x12f   :  { %304 = vsyncpa [#allocation8], 1 }
 0x130   :  { %306 = vsyncpa [#allocation8 + $0x1], 1 }
 0x131   :  { %307 = vsyncmov [#allocation3] }
 0x134   :  { %s308_s25 = vpop.sfrf %307 }
 0x135   :  { %p432_p3 = scmp.ne.s32.totalorder %s308_s25, 0 }
 0x137   :  { %312 = shalt.err (%p432_p3)  }
 0x138   :  { %314 = vsyncmov [#allocation3 + $0x1] }
 0x13b   :  { %s315_s4 = vpop.sfrf %314 }
 0x13c   :  { %p433_p10 = scmp.ne.s32.totalorder %s315_s4, 0 }
 0x13e   :  { %319 = shalt.err (%p433_p10)  }
 0x13f   :  { %321 = vsyncmov [#allocation3 + $0x2] }
 0x142   :  { %s322_s5 = vpop.sfrf %321 }
 0x143   :  { %p434_p11 = scmp.ne.s32.totalorder %s322_s5, 0 }
 0x145   :  { %326 = shalt.err (%p434_p11)  }
 0x146   :  { %328 = vsyncmov [#allocation3 + $0x3] }
 0x149   :  { %s329_s30 = vpop.sfrf %328 }
 0x14a   :  { %p435_p0 = scmp.ne.s32.totalorder %s329_s30, 0 }
 0x14c   :  { %333 = shalt.err (%p435_p0)  }
 0x14d   :  { %335 = vsyncmov [#allocation3 + $0x4] }
 0x150   :  { %s336_s1 = vpop.sfrf %335 }
 0x151   :  { %p436_p2 = scmp.ne.s32.totalorder %s336_s1, 0 }
 0x153   :  { %340 = shalt.err (%p436_p2)  }
 0x154   :  { %342 = vsyncmov [#allocation3 + $0x5] }
 0x157   :  { %s343_s3 = vpop.sfrf %342 }
 0x158   :  { %p437_p4 = scmp.ne.s32.totalorder %s343_s3, 0 }
 0x15a   :  { %347 = shalt.err (%p437_p4)  }
 0x15b   :  { %349 = vsyncmov [#allocation3 + $0x6] }
 0x15e   :  { %s350_s22 = vpop.sfrf %349 }
 0x15f   :  { %p438_p6 = scmp.ne.s32.totalorder %s350_s22, 0 }
 0x161   :  { %354 = shalt.err (%p438_p6)  }
 0x162   :  { %356 = vsyncmov [#allocation3 + $0x7] }
 0x165   :  { %s357_s23 = vpop.sfrf %356 }
 0x166   :  { %p439_p5 = scmp.ne.s32.totalorder %s357_s23, 0 }
 0x168   :  { %361 = shalt.err (%p439_p5)  }

// kernel: decoder_forward.4
= control target key start
LH: loop header
LB: loop body
LE: loop exit
PB: predicated region body
PF: predicated region fallthrough
CT: control target
= control target key end

     0   :  { %s3981_s0 = inlined_call_operand.hbm [shape: f32[2,8,128], index: 0, kind: input, shape index: {}]   ;;  %s3982_s1 = inlined_call_operand.hbm [shape: f32[1,128], index: 1, kind: input, shape index: {}]   ;;  %s3983_s2 = inlined_call_operand.hbm [shape: f32[1,128], index: 2, kind: input, shape index: {}]   ;;  %s3984_s3 = inlined_call_operand.hbm [shape: bf16[128,384], index: 3, kind: input, shape index: {}]   ;;  %s3985_s4 = inlined_call_operand.hbm [shape: f32[1,384], index: 4, kind: input, shape index: {}]   ;;  %s3986_s5 = inlined_call_operand.hbm [shape: bf16[128,128], index: 5, kind: input, shape index: {}]   ;;  %s3987_s6 = inlined_call_operand.hbm [shape: f32[1,128], index: 6, kind: input, shape index: {}]   ;;  %s3988_s7 = inlined_call_operand.hbm [shape: f32[1,128], index: 7, kind: input, shape index: {}]   ;;  %s3989_s8 = inlined_call_operand.hbm [shape: f32[1,128], index: 8, kind: input, shape index: {}]   ;;  %s3990_s9 = inlined_call_operand.hbm [shape: bf16[128,256], index: 9, kind: input, shape index: {}]   ;;  %s3991_s10 = inlined_call_operand.hbm [shape: f32[1,256], index: 10, kind: input, shape index: {}]   ;;  %s3992_s11 = inlined_call_operand.hbm [shape: bf16[256,128], index: 11, kind: input, shape index: {}]   ;;  %s3993_s12 = inlined_call_operand.hbm [shape: f32[1,128], index: 12, kind: input, shape index: {}]   ;;  %s3994_s13 = inlined_call_operand.hbm [shape: f32[2,8,128], index: 13, kind: output, shape index: {}]  }
   0x1   :  { %4008 = sst [smem:[#allocation41_spill]] %s3981_s0 }
   0x2   :  { %4009 = sst [smem:[#allocation42_spill]] %s3982_s1 }
   0x3   :  { %4010 = sst [smem:[#allocation43_spill]] %s3984_s3 }
   0x4   :  { %4011 = sst [smem:[#allocation44_spill]] %s3994_s13 }
   0x5   :  { %18 = vsyncpa [#allocation7], 0 }
   0x6   :  { %20 = vsyncpa [#allocation7 + $0x1], 0 }
   0x7   :  { %21 = vsyncpa [#allocation10], 0 }
   0x8   :  { %22 = vsyncpa [#allocation13], 0 }
   0x9   :  { %23 = vsyncpa [#allocation16], 0 }
   0xa   :  { %24 = vsyncpa [#allocation19], 0 }
   0xb   :  { %25 = vsyncpa [#allocation22], 0 }
   0xc   :  { %26 = vsyncpa [#allocation25], 0 }
   0xd   :  { %27 = vsyncpa [#allocation8], 0 }
   0xe   :  { %29 = vsyncpa [#allocation8 + $0x1], 0  ;;  %s3403_s25 = smov 0   ;;  %s3405_s26 = smov 0  }
   0xf   :  { %s3407_s27 = smov 0   ;;  %s3409_s28 = smov 0  }
  0x10   :  { %s3411_s29 = smov 0   ;;  %s3413_s30 = smov 0  }
  0x11 LB: > { %4012 = sst [smem:[#allocation36_spill]] %s3285_s25  ;;  %s3995_s14 = sadd.s32 4294967295, %s3305_s30   ;;  %s3305_s30 = sphi %s3413_s30, %s35_s30   ;;  %s3301_s29 = sphi %s3411_s29, %s4052_s29   ;;  %s3297_s28 = sphi %s3409_s28, %s4051_s28   ;;  %s3293_s27 = sphi %s3407_s27, %s4050_s27   ;;  %s3289_s26 = sphi %s3405_s26, %s4049_s26   ;;  %s3285_s25 = sphi %s3403_s25, %s4047_s25  }
  0x12   : > { %4013 = sst [smem:[#allocation37_spill]] %s3289_s26  ;;  %p2206_p0 = scmp.ge.s32.totalorder %s3305_s30, 1 }
  0x13   : > { %4014 = sst [smem:[#allocation38_spill]] %s3297_s28  ;;  %p3437_p1 = scmp.eq.s32.totalorder %s3995_s14, 0 }
  0x14   : > { %p358_p2 = scmp.lt.s32.totalorder %s3305_s30, 3  ;;  %s3307_s17 = smov [#allocation9]  }
  0x15   : > { %s4015_s15 = scalar_select %p3437_p1, 1, 0 }
  0x16   : > { %p3442_p3 = pnand %p2206_p0, %p358_p2  ;;  %s371_s18 = sshll.u32 %s3307_s17, 4  ;;  %s372_s18 = int_to_ptr.vmem [resolvable:$true] %s371_s18 }
  0x17   : > { %4016 = sst [smem:[#allocation39_spill]] %s4015_s15  ;;  %s3308_s19 = smov [#allocation12]  }
  0x18   : > { %s4017_s16 = scalar_select %p3442_p3, 1, 0 }
  0x19   : > { %p2588_p5 = pneg %p3442_p3  ;;  %s392_s20 = sshll.u32 %s3308_s19, 4  ;;  %s3455_s20 = int_to_ptr.vmem [resolvable:$true] %s392_s20 }
  0x1a   : > { %4018 = sst [smem:[#allocation40_spill]] %s4017_s16  ;;  %s3309_s22 = smov [#allocation15]  }
  0x1b   : > { %p3451_p6 = pnand %p2588_p5, %p3437_p1  ;;  %s3457_s23 = sshll.u32 %s3309_s22, 4  ;;  %s417_s23 = int_to_ptr.vmem [resolvable:$true] %s3457_s23 }
  0x1c   : > { %s4020_s1 = sld [smem:[#allocation42_spill]] }
  0x1d   : > { %p3467_p8 = pneg %p3451_p6 }
  0x22   : > { %s2833_s17 = scalar_lea.hbm %s4020_s1, 16 }
  0x23   : > { %p2834_p7 = scmp.ne.s32.totalorder %s4020_s1, %s2833_s17  ;;  %p2840_p11 = scmp.lt.u32.totalorder %s2833_s17, %s4020_s1 }
  0x25   : > { %p2836_p9 = pnand %p3467_p8, %p2834_p7 }
  0x27   : > { %p2837_p10 = pneg %p2836_p9 }
  0x29   : > { %p2842_p12 = pnand %p2840_p11, %p2837_p10 }
  0x2b   : > { %2845 = shalt.err (!%p2842_p12)
}
  0x2c   : > { %s2846_s14 = scalar_lea.vmem %s372_s18, 16  ;;  %s2853_s13 = scalar_lea.vmem %s372_s18, 32 }
  0x2d   : > { %p2847_p13 = scmp.ne.s32.totalorder %s372_s18, %s2846_s14  ;;  %p2854_p5 = scmp.lt.s32.totalorder %s372_s18, %s372_s18 }
  0x2e   : > { %p2855_p4 = scmp.lt.s32.totalorder %s2853_s13, %s2846_s14 }
  0x2f   : > { %p2849_p0 = pnand %p2847_p13, %p3467_p8 }
  0x30   : > { %p2856_p3 = por %p2855_p4, %p2854_p5 }
  0x31   : > { %p2850_p2 = pneg %p2849_p0 }
  0x33   : > { %p2857_p1 = pnand %p2856_p3, %p2850_p2 }
  0x35   : > { %2860 = shalt.err (!%p2857_p1)
}
  0x36   : > { %2591 = dma.hbm_to_vmem [thread:$0]  (!%p3451_p6), %s4020_s1, 16, %s372_s18, [#allocation10]  }
  0x37   : > { %s4022_s3 = sld [smem:[#allocation43_spill]] }
  0x3d   : > { %s2861_s22 = scalar_lea.hbm %s4022_s3, 3072 }
  0x3e   : > { %p2862_p7 = scmp.ne.s32.totalorder %s4022_s3, %s2861_s22  ;;  %p2868_p1 = scmp.lt.u32.totalorder %s2861_s22, %s4022_s3 }
  0x40   : > { %p2864_p9 = pnand %p2862_p7, %p3467_p8 }
  0x42   : > { %p2865_p4 = pneg %p2864_p9 }
  0x44   : > { %p2870_p3 = pnand %p2868_p1, %p2865_p4 }
  0x46   : > { %2873 = shalt.err (!%p2870_p3)
}
  0x47   : > { %s2874_s18 = scalar_lea.vmem %s3455_s20, 3072  ;;  %p2882_p13 = scmp.lt.s32.totalorder %s3455_s20, %s3455_s20 }
  0x48   : > { %p2875_p10 = scmp.ne.s32.totalorder %s3455_s20, %s2874_s18  ;;  %p2883_p0 = scmp.lt.s32.totalorder %s2874_s18, %s2874_s18 }
  0x4a   : > { %p2877_p11 = pnand %p2875_p10, %p3467_p8  ;;  %p2884_p2 = por %p2883_p0, %p2882_p13 }
  0x4c   : > { %p2878_p12 = pneg %p2877_p11 }
  0x4e   : > { %p2885_p5 = pnand %p2884_p2, %p2878_p12 }
  0x50   : > { %2888 = shalt.err (!%p2885_p5)
}
  0x51   : > { %s3310_s0 = smov 192   ;;  %s3311_s15 = smov 12  }
  0x52   : > { %2597 = dma.hbm_to_vmem [thread:$0]  (!%p3451_p6), %s4022_s3, 3072, %s3455_s20, [#allocation13], %s3310_s0, %s3310_s0, %s3311_s15  }
  0x53   : > { %s2889_s22 = scalar_lea.hbm %s3986_s5, 1024 }
  0x54   : > { %p2890_p7 = scmp.ne.s32.totalorder %s3986_s5, %s2889_s22  ;;  %p2896_p1 = scmp.lt.u32.totalorder %s2889_s22, %s3986_s5 }
  0x56   : > { %p2892_p9 = pnand %p2890_p7, %p3467_p8 }
  0x58   : > { %p2893_p4 = pneg %p2892_p9 }
  0x5a   : > { %p2898_p3 = pnand %p2896_p1, %p2893_p4 }
  0x5c   : > { %2901 = shalt.err (!%p2898_p3)
}
  0x5d   : > { %s2902_s28 = scalar_lea.vmem %s417_s23, 1024  ;;  %p2910_p13 = scmp.lt.s32.totalorder %s417_s23, %s417_s23 }
  0x5e   : > { %p2903_p10 = scmp.ne.s32.totalorder %s417_s23, %s2902_s28  ;;  %p2911_p0 = scmp.lt.s32.totalorder %s2902_s28, %s2902_s28 }
  0x60   : > { %p2905_p11 = pnand %p2903_p10, %p3467_p8  ;;  %p2912_p2 = por %p2911_p0, %p2910_p13 }
  0x62   : > { %p2906_p12 = pneg %p2905_p11 }
  0x64   : > { %p2913_p5 = pnand %p2912_p2, %p2906_p12 }
  0x66   : > { %2916 = shalt.err (!%p2913_p5)
}
  0x67   : > { %s4005_s20 = smov 64   ;;  %s4006_s0 = smov 4  }
  0x68   : > { %2603 = dma.hbm_to_vmem [thread:$0]  (!%p3451_p6), %s3986_s5, 1024, %s417_s23, [#allocation16], %s4005_s20, %s4005_s20, %s4006_s0  }
  0x69   : > { %s3314_s24 = smov [#allocation18]   ;;  %s3315_s17 = smov [#allocation21]  }
  0x6a   : > { %s441_s16 = sshll.u32 %s3314_s24, 4  ;;  %s462_s22 = sshll.u32 %s3315_s17, 4  ;;  %s442_s16 = int_to_ptr.vmem [resolvable:$true] %s441_s16  ;;  %s463_s22 = int_to_ptr.vmem [resolvable:$true] %s462_s22 }
  0x6b   : > { %s2917_s18 = scalar_lea.hbm %s3988_s7, 16 }
  0x6c   : > { %p2918_p7 = scmp.ne.s32.totalorder %s3988_s7, %s2917_s18  ;;  %p2924_p1 = scmp.lt.u32.totalorder %s2917_s18, %s3988_s7 }
  0x6e   : > { %p2920_p9 = pnand %p2918_p7, %p3467_p8 }
  0x70   : > { %p2921_p4 = pneg %p2920_p9 }
  0x72   : > { %p2926_p3 = pnand %p2924_p1, %p2921_p4 }
  0x74   : > { %2929 = shalt.err (!%p2926_p3)
}
  0x75   : > { %s2930_s23 = scalar_lea.vmem %s442_s16, 16  ;;  %s2937_s1 = scalar_lea.vmem %s442_s16, 32 }
  0x76   : > { %p2931_p10 = scmp.ne.s32.totalorder %s442_s16, %s2930_s23  ;;  %p2938_p13 = scmp.lt.s32.totalorder %s442_s16, %s442_s16 }
  0x77   : > { %p2939_p0 = scmp.lt.s32.totalorder %s2937_s1, %s2930_s23 }
  0x78   : > { %p2933_p11 = pnand %p2931_p10, %p3467_p8 }
  0x79   : > { %p2940_p2 = por %p2939_p0, %p2938_p13 }
  0x7a   : > { %p2934_p12 = pneg %p2933_p11 }
  0x7c   : > { %p2941_p5 = pnand %p2940_p2, %p2934_p12 }
  0x7e   : > { %2944 = shalt.err (!%p2941_p5)
}
  0x7f   : > { %2609 = dma.hbm_to_vmem [thread:$0]  (!%p3451_p6), %s3988_s7, 16, %s442_s16, [#allocation19]  }
  0x80   : > { %s2945_s24 = scalar_lea.hbm %s3990_s9, 2048 }
  0x81   : > { %p2946_p7 = scmp.ne.s32.totalorder %s3990_s9, %s2945_s24  ;;  %p2952_p1 = scmp.lt.u32.totalorder %s2945_s24, %s3990_s9 }
  0x83   : > { %p2948_p9 = pnand %p2946_p7, %p3467_p8 }
  0x85   : > { %p2949_p4 = pneg %p2948_p9 }
  0x87   : > { %p2954_p3 = pnand %p2952_p1, %p2949_p4 }
  0x89   : > { %2957 = shalt.err (!%p2954_p3)
}
  0x8a   : > { %s2958_s28 = scalar_lea.vmem %s463_s22, 2048  ;;  %p2966_p13 = scmp.lt.s32.totalorder %s463_s22, %s463_s22 }
  0x8b   : > { %p2959_p10 = scmp.ne.s32.totalorder %s463_s22, %s2958_s28  ;;  %p2967_p0 = scmp.lt.s32.totalorder %s2958_s28, %s2958_s28 }
  0x8d   : > { %p2961_p11 = pnand %p2959_p10, %p3467_p8  ;;  %p2968_p2 = por %p2967_p0, %p2966_p13 }
  0x8f   : > { %p2962_p12 = pneg %p2961_p11 }
  0x91   : > { %p2969_p5 = pnand %p2968_p2, %p2962_p12 }
  0x93   : > { %2972 = shalt.err (!%p2969_p5)
}
  0x94   : > { %s3316_s16 = smov 128   ;;  %s3317_s23 = smov 8  }
  0x95   : > { %2615 = dma.hbm_to_vmem [thread:$0]  (!%p3451_p6), %s3990_s9, 2048, %s463_s22, [#allocation22], %s3316_s16, %s3316_s16, %s3317_s23  }
  0x96   : > { %s3318_s15 = smov [#allocation24]   ;;  %s3319_s26 = smov [#allocation11]  }
  0x97   : > { %s486_s25 = sshll.u32 %s3318_s15, 4  ;;  %s382_s24 = sshll.u32 %s3319_s26, 4  ;;  %s487_s25 = int_to_ptr.vmem [resolvable:$true] %s486_s25  ;;  %s383_s24 = int_to_ptr.vmem [resolvable:$true] %s382_s24 }
  0x98   : > { %s2973_s13 = scalar_lea.hbm %s3992_s11, 2048 }
  0x99   : > { %p2974_p7 = scmp.ne.s32.totalorder %s3992_s11, %s2973_s13  ;;  %p2980_p1 = scmp.lt.u32.totalorder %s2973_s13, %s3992_s11 }
  0x9b   : > { %p2976_p9 = pnand %p2974_p7, %p3467_p8 }
  0x9d   : > { %p2977_p4 = pneg %p2976_p9 }
  0x9f   : > { %p2982_p3 = pnand %p2980_p1, %p2977_p4 }
  0xa1   : > { %2985 = shalt.err (!%p2982_p3)
}
  0xa2   : > { %s2986_s22 = scalar_lea.vmem %s487_s25, 2048  ;;  %p2994_p13 = scmp.lt.s32.totalorder %s487_s25, %s487_s25 }
  0xa3   : > { %p2987_p10 = scmp.ne.s32.totalorder %s487_s25, %s2986_s22  ;;  %p2995_p0 = scmp.lt.s32.totalorder %s2986_s22, %s2986_s22 }
  0xa5   : > { %p2989_p11 = pnand %p2987_p10, %p3467_p8  ;;  %p2996_p2 = por %p2995_p0, %p2994_p13 }
  0xa7   : > { %p2990_p12 = pneg %p2989_p11 }
  0xa9   : > { %p2997_p5 = pnand %p2996_p2, %p2990_p12 }
  0xab   : > { %3000 = shalt.err (!%p2997_p5)
}
  0xac   : > { %s4023_s16 = smov 4   ;;  %s4024_s23 = smov 64  }
  0xad   : > { %2621 = dma.hbm_to_vmem [thread:$0]  (!%p3451_p6), %s3992_s11, 2048, %s487_s25, [#allocation25], %s4024_s23, %s4024_s23, %s4023_s16  }
  0xae   : > { %s3001_s15 = scalar_lea.hbm %s3983_s2, 16 }
  0xaf   : > { %p3002_p7 = scmp.ne.s32.totalorder %s3983_s2, %s3001_s15  ;;  %p3008_p1 = scmp.lt.u32.totalorder %s3001_s15, %s3983_s2 }
  0xb1   : > { %p3004_p9 = pnand %p3002_p7, %p3467_p8 }
  0xb3   : > { %p3005_p4 = pneg %p3004_p9 }
  0xb5   : > { %p3010_p3 = pnand %p3008_p1, %p3005_p4 }
  0xb7   : > { %3013 = shalt.err (!%p3010_p3)
}
  0xb8   : > { %s3014_s18 = scalar_lea.vmem %s383_s24, 16  ;;  %s3021_s25 = scalar_lea.vmem %s383_s24, 32 }
  0xb9   : > { %p3015_p10 = scmp.ne.s32.totalorder %s383_s24, %s3014_s18  ;;  %p3022_p13 = scmp.lt.s32.totalorder %s383_s24, %s383_s24 }
  0xba   : > { %p3023_p0 = scmp.lt.s32.totalorder %s3021_s25, %s3014_s18 }
  0xbb   : > { %p3017_p11 = pnand %p3015_p10, %p3467_p8 }
  0xbc   : > { %p3024_p2 = por %p3023_p0, %p3022_p13 }
  0xbd   : > { %p3018_p12 = pneg %p3017_p11 }
  0xbf   : > { %p3025_p5 = pnand %p3024_p2, %p3018_p12 }
  0xc1   : > { %3028 = shalt.err (!%p3025_p5)
}
  0xc2   : > { %2594 = dma.hbm_to_vmem [thread:$0]  (!%p3451_p6), %s3983_s2, 16, %s383_s24, [#allocation10]  }
  0xc3   : > { %s3320_s16 = smov [#allocation14]   ;;  %s3321_s20 = smov [#allocation17]  }
  0xc4   : > { %s406_s23 = sshll.u32 %s3320_s16, 4  ;;  %s430_s0 = sshll.u32 %s3321_s20, 4  ;;  %s407_s23 = int_to_ptr.vmem [resolvable:$true] %s406_s23  ;;  %s431_s0 = int_to_ptr.vmem [resolvable:$true] %s430_s0 }
  0xc5   : > { %s3029_s15 = scalar_lea.hbm %s3985_s4, 48 }
  0xc6   : > { %p3030_p7 = scmp.ne.s32.totalorder %s3985_s4, %s3029_s15  ;;  %p3036_p1 = scmp.lt.u32.totalorder %s3029_s15, %s3985_s4 }
  0xc8   : > { %p3032_p9 = pnand %p3030_p7, %p3467_p8 }
  0xca   : > { %p3033_p4 = pneg %p3032_p9 }
  0xcc   : > { %p3038_p3 = pnand %p3036_p1, %p3033_p4 }
  0xce   : > { %3041 = shalt.err (!%p3038_p3)
}
  0xcf   : > { %s3042_s24 = scalar_lea.vmem %s407_s23, 48  ;;  %s3049_s18 = scalar_lea.vmem %s407_s23, 64 }
  0xd0   : > { %p3043_p10 = scmp.ne.s32.totalorder %s407_s23, %s3042_s24  ;;  %p3050_p13 = scmp.lt.s32.totalorder %s407_s23, %s407_s23 }
  0xd1   : > { %p3051_p0 = scmp.lt.s32.totalorder %s3049_s18, %s3042_s24 }
  0xd2   : > { %p3045_p11 = pnand %p3043_p10, %p3467_p8 }
  0xd3   : > { %p3052_p2 = por %p3051_p0, %p3050_p13 }
  0xd4   : > { %p3046_p12 = pneg %p3045_p11 }
  0xd6   : > { %p3053_p5 = pnand %p3052_p2, %p3046_p12 }
  0xd8   : > { %3056 = shalt.err (!%p3053_p5)
}
  0xd9   : > { %2600 = dma.hbm_to_vmem [thread:$0]  (!%p3451_p6), %s3985_s4, 48, %s407_s23, [#allocation13]  }
  0xda   : > { %s3057_s20 = scalar_lea.hbm %s3987_s6, 16 }
  0xdb   : > { %p3058_p7 = scmp.ne.s32.totalorder %s3987_s6, %s3057_s20  ;;  %p3064_p1 = scmp.lt.u32.totalorder %s3057_s20, %s3987_s6 }
  0xdd   : > { %p3060_p9 = pnand %p3058_p7, %p3467_p8 }
  0xdf   : > { %p3061_p4 = pneg %p3060_p9 }
  0xe1   : > { %p3066_p3 = pnand %p3064_p1, %p3061_p4 }
  0xe3   : > { %3069 = shalt.err (!%p3066_p3)
}
  0xe4   : > { %s3070_s17 = scalar_lea.vmem %s431_s0, 16  ;;  %s3077_s23 = scalar_lea.vmem %s431_s0, 32 }
  0xe5   : > { %p3071_p10 = scmp.ne.s32.totalorder %s431_s0, %s3070_s17  ;;  %p3078_p13 = scmp.lt.s32.totalorder %s431_s0, %s431_s0 }
  0xe6   : > { %p3079_p0 = scmp.lt.s32.totalorder %s3077_s23, %s3070_s17 }
  0xe7   : > { %p3073_p11 = pnand %p3071_p10, %p3467_p8 }
  0xe8   : > { %p3080_p2 = por %p3079_p0, %p3078_p13 }
  0xe9   : > { %p3074_p12 = pneg %p3073_p11 }
  0xeb   : > { %p3081_p5 = pnand %p3080_p2, %p3074_p12 }
  0xed   : > { %3084 = shalt.err (!%p3081_p5)
}
  0xee   : > { %2606 = dma.hbm_to_vmem [thread:$0]  (!%p3451_p6), %s3987_s6, 16, %s431_s0, [#allocation16]  }
  0xef   : > { %s3322_s24 = smov [#allocation20]   ;;  %s3323_s25 = smov [#allocation23]  }
  0xf0   : > { %s452_s18 = sshll.u32 %s3322_s24, 4  ;;  %s476_s28 = sshll.u32 %s3323_s25, 4  ;;  %s453_s18 = int_to_ptr.vmem [resolvable:$true] %s452_s18  ;;  %s477_s28 = int_to_ptr.vmem [resolvable:$true] %s476_s28 }
  0xf1   : > { %s3085_s20 = scalar_lea.hbm %s3989_s8, 16 }
  0xf2   : > { %p3086_p7 = scmp.ne.s32.totalorder %s3989_s8, %s3085_s20  ;;  %p3092_p1 = scmp.lt.u32.totalorder %s3085_s20, %s3989_s8 }
  0xf4   : > { %p3088_p9 = pnand %p3086_p7, %p3467_p8 }
  0xf6   : > { %p3089_p4 = pneg %p3088_p9 }
  0xf8   : > { %p3094_p3 = pnand %p3092_p1, %p3089_p4 }
  0xfa   : > { %3097 = shalt.err (!%p3094_p3)
}
  0xfb   : > { %s3098_s0 = scalar_lea.vmem %s453_s18, 16  ;;  %s3105_s17 = scalar_lea.vmem %s453_s18, 32 }
  0xfc   : > { %p3099_p10 = scmp.ne.s32.totalorder %s453_s18, %s3098_s0  ;;  %p3106_p13 = scmp.lt.s32.totalorder %s453_s18, %s453_s18 }
  0xfd   : > { %p3107_p0 = scmp.lt.s32.totalorder %s3105_s17, %s3098_s0 }
  0xfe   : > { %p3101_p11 = pnand %p3099_p10, %p3467_p8 }
  0xff   : > { %p3108_p2 = por %p3107_p0, %p3106_p13 }
 0x100   : > { %p3102_p12 = pneg %p3101_p11 }
 0x102   : > { %p3109_p5 = pnand %p3108_p2, %p3102_p12 }
 0x104   : > { %3112 = shalt.err (!%p3109_p5)
}
 0x105   : > { %2612 = dma.hbm_to_vmem [thread:$0]  (!%p3451_p6), %s3989_s8, 16, %s453_s18, [#allocation19]  }
 0x106   : > { %s3113_s25 = scalar_lea.hbm %s3991_s10, 32 }
 0x107   : > { %p3114_p7 = scmp.ne.s32.totalorder %s3991_s10, %s3113_s25  ;;  %p3120_p1 = scmp.lt.u32.totalorder %s3113_s25, %s3991_s10 }
 0x109   : > { %p3116_p9 = pnand %p3114_p7, %p3467_p8 }
 0x10b   : > { %p3117_p4 = pneg %p3116_p9 }
 0x10d   : > { %p3122_p3 = pnand %p3120_p1, %p3117_p4 }
 0x10f   : > { %3125 = shalt.err (!%p3122_p3)
}
 0x110   : > { %s3126_s3 = scalar_lea.vmem %s477_s28, 32  ;;  %p3134_p13 = scmp.lt.s32.totalorder %s477_s28, %s477_s28 }
 0x111   : > { %p3127_p10 = scmp.ne.s32.totalorder %s477_s28, %s3126_s3  ;;  %p3135_p0 = scmp.lt.s32.totalorder %s3126_s3, %s3126_s3 }
 0x113   : > { %p3129_p11 = pnand %p3127_p10, %p3467_p8  ;;  %p3136_p2 = por %p3135_p0, %p3134_p13 }
 0x115   : > { %p3130_p12 = pneg %p3129_p11 }
 0x117   : > { %p3137_p5 = pnand %p3136_p2, %p3130_p12 }
 0x119   : > { %3140 = shalt.err (!%p3137_p5)
}
 0x11a   : > { %2618 = dma.hbm_to_vmem [thread:$0]  (!%p3451_p6), %s3991_s10, 32, %s477_s28, [#allocation22]  }
 0x11b   : > { %s3324_s26 = smov [#allocation26]   ;;  %s3141_s14 = scalar_lea.hbm %s3993_s12, 16 }
 0x11c   : > { %s500_s0 = sshll.u32 %s3324_s26, 4  ;;  %p3142_p7 = scmp.ne.s32.totalorder %s3993_s12, %s3141_s14  ;;  %s501_s0 = int_to_ptr.vmem [resolvable:$true] %s500_s0 }
 0x11d   : > { %p3148_p1 = scmp.lt.u32.totalorder %s3141_s14, %s3993_s12 }
 0x11e   : > { %p3144_p9 = pnand %p3142_p7, %p3467_p8 }
 0x120   : > { %p3145_p4 = pneg %p3144_p9 }
 0x122   : > { %p3150_p3 = pnand %p3148_p1, %p3145_p4 }
 0x124   : > { %3153 = shalt.err (!%p3150_p3)
}
 0x125   : > { %s3154_s28 = scalar_lea.vmem %s501_s0, 16  ;;  %s3161_s16 = scalar_lea.vmem %s501_s0, 32 }
 0x126   : > { %p3155_p10 = scmp.ne.s32.totalorder %s501_s0, %s3154_s28  ;;  %p3162_p13 = scmp.lt.s32.totalorder %s501_s0, %s501_s0 }
 0x127   : > { %p3163_p0 = scmp.lt.s32.totalorder %s3161_s16, %s3154_s28 }
 0x128   : > { %p3157_p11 = pnand %p3155_p10, %p3467_p8 }
 0x129   : > { %p3164_p2 = por %p3163_p0, %p3162_p13 }
 0x12a   : > { %p3158_p12 = pneg %p3157_p11 }
 0x12c   : > { %p3165_p5 = pnand %p3164_p2, %p3158_p12 }
 0x12e   : > { %3168 = shalt.err (!%p3165_p5)
}
 0x12f   : > { %s4025_s3 = sld [smem:[#allocation37_spill]]  ;;  %s4026_s19 = sld [smem:[#allocation36_spill]] }
 0x130   : > { %s4027_s18 = sld [smem:[#allocation39_spill]]  ;;  %s2205_s15 = sadd.s32 4294967294, %s3305_s30  }
 0x131   : > { %2624 = dma.hbm_to_vmem [thread:$0]  (!%p3451_p6), %s3993_s12, 16, %s501_s0, [#allocation25]  }
 0x132   : > { %s47_s26 = sadd.s32 1, %s3301_s29  ;;  %s54_s21 = sadd.s32 1, %s3293_s27 }
 0x133   : > { %p49_p8 = scmp.ge.s32.totalorder %s47_s26, 2  ;;  %p62_p9 = scmp.eq.s32.totalorder %s3305_s30, 0 }
 0x134   : > { %s4029_s23 = sadd.s32 4294967295, %s3305_s30   ;;  %p351_p13 = scmp.eq.s32.totalorder %s2205_s15, 1 }
 0x135   : > { %p61_p7 = scmp.ne.s32.totalorder %s3293_s27, %s4025_s3  ;;  %s4054_s26 = smov (%p49_p8, %s47_s26), 0 }
 0x136   : > { %p67_p1 = scmp.ne.s32.totalorder %s4025_s3, %s4026_s19  ;;  %s51_s0 = ssub.s32 %s3301_s29, %s4054_s26 }
 0x137   : > { %p3701_p4 = por %p62_p9, %p61_p7  ;;  %p345_p6 = scmp.eq.s32.totalorder %s4029_s23, 1 }
 0x138   : > { %p52_p3 = scmp.eq.s32.totalorder %s51_s0, 0  ;;  %p4030_p10 = scmp.ne.s32.totalorder %s4027_s18, 0 }
 0x139   : > { %p3717_p12 = por %p345_p6, %p61_p7  ;;  %p3724_p0 = por %p351_p13, %p67_p1 }
 0x13a   : > { %p3713_p11 = por %p4030_p10, %p67_p1  ;;  %p2645_p2 = scmp.lt.s32.totalorder %s3305_s30, 2 }
 0x13b   : > { %s4032_s13 = scalar_select %p3717_p12, 1, 0 }
 0x13c   : > { %s3722_s24 = scalar_select %p52_p3, %s3293_s27, %s54_s21  }
 0x13d   : > { %s4033_s25 = scalar_select %p3724_p0, 1, 0 }
 0x13e   : > { %s511_s22 = sand.u32 1, %s3293_s27   ;;  %s2221_s28 = sshll.u32 %s3301_s29, 7 }
 0x13f   : > { %s2220_s16 = sshll.u32 %s511_s22, 3  ;;  %s4034_s3 = sld [smem:[#allocation41_spill]] }
 0x140   : > { %s515_s18 = scalar_lea.vmem [#allocation6], %s2220_s16  ;;  %p3738_p5 = pnand %p2645_p2, %p3701_p4 }
 0x141   : > { %s522_s15 = sshll.u32 %s515_s18, 4  ;;  %s512_s0 = scalar_lea.sflag [#allocation7], %s511_s22  ;;  %s3742_s15 = int_to_ptr.vmem [resolvable:$true] %s522_s15 }
 0x142   : > { %p3171_p7 = pneg %p3738_p5 }
 0x145   : > { %s3734_s19 = scalar_lea.hbm %s4034_s3, %s2221_s28  ;;  %s3174_s17 = scalar_lea.hbm %s4034_s3, 256 }
 0x146   : > { %s3169_s23 = scalar_lea.hbm %s3734_s19, 128  ;;  %p3175_p4 = scmp.lt.u32.totalorder %s3734_s19, %s4034_s3 }
 0x147   : > { %p3170_p8 = scmp.ne.s32.totalorder %s3734_s19, %s3169_s23  ;;  %p3176_p6 = scmp.lt.u32.totalorder %s3174_s17, %s3169_s23 }
 0x148   : > { %p3178_p10 = scmp.lt.u32.totalorder %s3169_s23, %s3734_s19 }
 0x149   : > { %p3172_p9 = pnand %p3171_p7, %p3170_p8  ;;  %p3177_p3 = por %p3176_p6, %p3175_p4 }
 0x14b   : > { %p3173_p1 = pneg %p3172_p9  ;;  %p3179_p13 = por %p3178_p10, %p3177_p3 }
 0x14d   : > { %p3180_p2 = pnand %p3179_p13, %p3173_p1 }
 0x14f   : > { %3183 = shalt.err (!%p3180_p2)
}
 0x150   : > { %s3184_s22 = scalar_lea.vmem %s3742_s15, 128  ;;  %s3325_s18 = smov [#allocation6]  }
 0x151   : > { %p3185_p8 = scmp.ne.s32.totalorder %s3742_s15, %s3184_s22  ;;  %s3189_s28 = sshll.u32 %s3325_s18, 4  ;;  %s3190_s28 = int_to_ptr.vmem [resolvable:$false] %s3189_s28 }
 0x152   : > { %s3191_s16 = scalar_lea.vmem %s3190_s28, 256  ;;  %p3192_p12 = scmp.lt.s32.totalorder %s3742_s15, %s3190_s28 }
 0x153   : > { %p3187_p9 = pnand %p3185_p8, %p3171_p7  ;;  %p3193_p4 = scmp.lt.s32.totalorder %s3191_s16, %s3184_s22 }
 0x155   : > { %p3188_p0 = pneg %p3187_p9  ;;  %p3194_p6 = por %p3193_p4, %p3192_p12 }
 0x157   : > { %p3195_p3 = pnand %p3194_p6, %p3188_p0 }
 0x159   : > { %3198 = shalt.err (!%p3195_p3)
}
 0x15a   : > { %2628 = dma.hbm_to_vmem [thread:$0]  (!%p3738_p5), %s3734_s19, 128, %s3742_s15, %s512_s0  }
 0x15b   : > { %s4036_s23 = sld [smem:[#allocation40_spill]] }
 0x161   : > { %p4037_p1 = scmp.ne.s32.totalorder %s4036_s23, 0 }
 0x162   : > { %s4038_s17 = sld [smem:[#allocation37_spill]] (!%p4037_p1) }
 0x163   : > { %531 = sbr.rel (%p4037_p1) target bundleno = 4423 (0x1147), region = 72 }
 0x168   : > { %s3772_s20 = sand.u32 (!%p4037_p1), 1, %s4038_s17  }
 0x169   : > { %s2223_s1 = sshll.u32 (!%p4037_p1), %s3772_s20, 3  ;;  %s534_s22 = scalar_lea.sflag (!%p4037_p1), [#allocation7], %s3772_s20 }
 0x16a   : > { %s537_s18 = scalar_lea.vmem [#allocation6], %s2223_s1 }
 0x16b   : > { %3252 = dma.done.wait (%p3713_p11), %s534_s22, 128  }
 0x16c   : > { %3254 = vsyncadd (%p3713_p11), %s534_s22, 4294967168  ;;  %s4039_s19 = sld [smem:[#allocation39_spill]] }
 0x172   : > { %p4040_p12 = scmp.ne.s32.totalorder %s4039_s19, 0 }
 0x174   : > { %3256 = dma.done.wait (%p4040_p12), [#allocation10], 32  }
 0x175   : > { %3258 = vsyncadd (%p4040_p12), [#allocation10], 4294967264 }
 0x176   : > { %3260 = dma.done.wait (%p4040_p12), [#allocation13], 3120  }
 0x177   : > { %3262 = vsyncadd (%p4040_p12), [#allocation13], 4294964176 }
 0x178   : > { %3264 = dma.done.wait (%p4040_p12), [#allocation16], 1040  }
 0x179   : > { %3266 = vsyncadd (%p4040_p12), [#allocation16], 4294966256 }
 0x17a   : > { %3268 = dma.done.wait (%p4040_p12), [#allocation19], 32  }
 0x17b   : > { %3270 = vsyncadd (%p4040_p12), [#allocation19], 4294967264 }
 0x17c   : > { %3272 = dma.done.wait (%p4040_p12), [#allocation22], 2080  }
 0x17d   : > { %3274 = vsyncadd (%p4040_p12), [#allocation22], 4294965216 }
 0x17e   : > { %3276 = dma.done.wait (%p4040_p12), [#allocation25], 2064  }
 0x17f   : > { %3278 = vsyncadd (%p4040_p12), [#allocation25], 4294965232  ;;  %v3806_v0 = vld [vmem:[%s537_s18] sm:$0xff]  ;;  %v3326_v3 = vmov 0.0   ;;  %v2733_v4 = vld [vmem:[#allocation12 + $0x1c] ss:$12 sps:$4 sm:$0xff]  }
 0x180   : > { %637 = vadd.xlane.f32.xlu0 %v3806_v0  ;;  %v2731_v1 = vld [vmem:[#allocation12 + $0x4] ss:$12 sps:$4 sm:$0xff]   ;;  %v2732_v2 = vld [vmem:[#allocation12 + $0x8] ss:$12 sps:$4 sm:$0xff]   ;;  %2408 = vmatprep.subr.bf16.mxu0 %v3326_v3  ;;  %v2734_v5 = vld [vmem:[#allocation12 + $0x20] ss:$12 sps:$4 sm:$0xff]  }
 0x181   : > { %2428 = vmatprep.subr.bf16.mxu1 %v3326_v3  ;;  %2409 = vmatpush3.bf16.msra.mxu0 %v2731_v1  ;;  %v2735_v6 = vld [vmem:[#allocation12 + $0x34] ss:$12 sps:$4 sm:$0xff]   ;;  %v2736_v11 = vld [vmem:[#allocation12 + $0x38] ss:$12 sps:$4 sm:$0xff]   ;;  %v2738_v13 = vld [vmem:[#allocation12 + $0x50] ss:$12 sps:$4 sm:$0xff]  }
 0x182   : > { %2429 = vmatpush3.bf16.msra.mxu1 %v2732_v2  ;;  %2410 = vmatprep.subr.bf16.mxu0 %v3326_v3  ;;  %v2737_v12 = vld [vmem:[#allocation12 + $0x4c] ss:$12 sps:$4 sm:$0xff]   ;;  %v2739_v14 = vld [vmem:[#allocation12 + $0x64] ss:$12 sps:$4 sm:$0xff]   ;;  %v2740_v15 = vld [vmem:[#allocation12 + $0x68] ss:$12 sps:$4 sm:$0xff]  }
 0x183   : > { %2430 = vmatprep.subr.bf16.mxu1 %v3326_v3  ;;  %v2741_v16 = vld [vmem:[#allocation12 + $0x7c] ss:$12 sps:$4 sm:$0xff]   ;;  %vm3327_vm0 = vmmov 0   ;;  %v2742_v17 = vld [vmem:[#allocation12 + $0x80] ss:$12 sps:$4 sm:$0xff]   ;;  %vm1011_vm1 = vcmask 261120  }
 0x184   : > { %2424 = vmatprep.mubr.msk.bf16.mxu0 %vm3327_vm0, %v3326_v3  ;;  %2444 = vmatprep.mubr.msk.bf16.mxu1 %vm3327_vm0, %v3326_v3  ;;  %v2743_v18 = vld [vmem:[#allocation12 + $0x94] ss:$12 sps:$4 sm:$0xff]   ;;  %v2744_v19 = vld [vmem:[#allocation12 + $0x98] ss:$12 sps:$4 sm:$0xff]   ;;  %v2746_v21 = vld [vmem:[#allocation12 + $0xb0] ss:$12 sps:$4 sm:$0xff]  }
 0x185   : > { %2411 = vmatpush3.bf16.msra.mxu0 %v2733_v4  ;;  %v2745_v20 = vld [vmem:[#allocation12 + $0xac] ss:$12 sps:$4 sm:$0xff]   ;;  %v2237_v26 = vld [vmem:[#allocation9] ss:$0 sm:$0xff]  ;;  %v2238_v28 = vld [vmem:[#allocation11] ss:$0 sm:$0xff] }
 0x186   : > { %2431 = vmatpush3.bf16.msra.mxu1 %v2734_v5  ;;  %2412 = vmatprep.subr.bf16.mxu0 %v3326_v3  ;;  %v2747_v31 = vld [vmem:[#allocation12] ss:$12 sps:$4 sm:$0xff]   ;;  %v2748_v33 = vld [vmem:[#allocation12 + $0x18] ss:$12 sps:$4 sm:$0xff]   ;;  %v2749_v34 = vld [vmem:[#allocation12 + $0x30] ss:$12 sps:$4 sm:$0xff]  }
 0x187   : > { %2432 = vmatprep.subr.bf16.mxu1 %v3326_v3  ;;  %v2750_v35 = vld [vmem:[#allocation12 + $0x48] ss:$12 sps:$4 sm:$0xff]   ;;  %v2751_v36 = vld [vmem:[#allocation12 + $0x60] ss:$12 sps:$4 sm:$0xff]   ;;  %v2752_v37 = vld [vmem:[#allocation12 + $0x78] ss:$12 sps:$4 sm:$0xff]  }
 0x188   : > { %v2753_v38 = vld [vmem:[#allocation12 + $0x90] ss:$12 sps:$4 sm:$0xff]   ;;  %v2754_v39 = vld [vmem:[#allocation12 + $0xa8] ss:$12 sps:$4 sm:$0xff]   ;;  %v2239_v41 = vld [vmem:[#allocation14 + $0x1] ss:$0 sm:$0xff] }
 0x189   : > { %2413 = vmatpush3.bf16.msra.mxu0 %v2735_v6  ;;  %v2248_v42 = vld [vmem:[#allocation14 + $0x2] ss:$0 sm:$0xff]  ;;  %s3328_s14 = smov 96   ;;  %v2257_v58 = vld [vmem:[#allocation14] ss:$0 sm:$0xff]  ;;  %vm1075_vm2 = vcmask 1043456  }
 0x18a   : > { %2414 = vmatprep.subr.bf16.mxu0 %v3326_v3  ;;  %2433 = vmatpush3.bf16.msra.mxu1 %v2736_v11  ;;  %vm1058_vm3 = vcmask 64512   ;;  %vm1120_vm4 = vcmask 257024   ;;  %s3329_s15 = smov 64   ;;  %s3330_s21 = smov 32   ;;  %vm1248_vm5 = vcmask 519424   ;;  %vm1375_vm6 = vcmask 781824  }
 0x18b   : > { %2434 = vmatprep.subr.bf16.mxu1 %v3326_v3  ;;  %vm1502_vm7 = vcmask 1044224   ;;  %s4041_s0 = sld [smem:[#allocation38_spill]]  ;;  %s627_s16 = scalar_lea.vmem [#allocation27], %s2223_s1 }
 0x18c   : > { %s2007_s23 = sshll.u32 %s627_s16, 4  ;;  %s4042_s18 = sld [smem:[#allocation44_spill]]  ;;  %s3934_s23 = int_to_ptr.vmem [resolvable:$true] %s2007_s23 }
 0x18d   : > { %2415 = vmatpush3.bf16.msra.mxu0 %v2737_v12  ;;  %p4043_p0 = scmp.ne.s32.totalorder %s4032_s13, 0  ;;  %s3332_s1 = smov [#allocation27]  }
 0x18e   : > { %2435 = vmatpush3.bf16.msra.mxu1 %v2738_v13  ;;  %2416 = vmatprep.subr.bf16.mxu0 %v3326_v3 }
 0x18f   : > { %2436 = vmatprep.subr.bf16.mxu1 %v3326_v3 }
 0x191   : > { %2417 = vmatpush3.bf16.msra.mxu0 %v2739_v14  ;;  %s2328_s28 = sshll.u32 %s4041_s0, 7 }
 0x192   : > { %2437 = vmatpush3.bf16.msra.mxu1 %v2740_v15  ;;  %2418 = vmatprep.subr.bf16.mxu0 %v3326_v3  ;;  %s3932_s19 = scalar_lea.hbm %s4042_s18, %s2328_s28 }
 0x193   : > { %2438 = vmatprep.subr.bf16.mxu1 %v3326_v3 }
 0x195   : > { %2419 = vmatpush3.bf16.msra.mxu0 %v2741_v16 }
 0x196   : > { %2439 = vmatpush3.bf16.msra.mxu1 %v2742_v17  ;;  %2420 = vmatprep.subr.bf16.mxu0 %v3326_v3 }
 0x197   : > { %2440 = vmatprep.subr.bf16.mxu1 %v3326_v3 }
 0x199   : > { %2421 = vmatpush3.bf16.msra.mxu0 %v2743_v18 }
 0x19a   : > { %2441 = vmatpush3.bf16.msra.mxu1 %v2744_v19  ;;  %2422 = vmatprep.subr.bf16.mxu0 %v3326_v3 }
 0x19b   : > { %2442 = vmatprep.subr.bf16.mxu1 %v3326_v3 }
 0x19d   : > { %2423 = vmatpush3.bf16.msra.mxu0 %v2745_v20 }
 0x19e   : > { %2443 = vmatpush3.bf16.msra.mxu1 %v2746_v21  ;;  %2448 = vmatprep.subr.bf16.mxu0 %v3326_v3 }
 0x19f   : > { %2468 = vmatprep.subr.bf16.mxu1 %v3326_v3 }
 0x20d   : > { %v638_v7 = vpop.xlane.xlu0 %637 }
 0x20e   : > { %v640_v8 = vmul.f32 0.0078125, %v638_v7 }
 0x210   : > { %v641_v9 = vsub.f32 %v3806_v0, %v640_v8 }
 0x212   : > { %v642_v10 = vmul.f32 %v641_v9, %v641_v9 }
 0x214   : > { %643 = vadd.xlane.f32.xlu0 %v642_v10 }
 0x2a1   : > { %v644_v22 = vpop.xlane.xlu0 %643 }
 0x2a2   : > { %v645_v23 = vmul.f32 0.0078125, %v644_v22 }
 0x2a4   : > { %v646_v24 = vadd.f32 1e-05, %v645_v23 }
 0x2a6   : > { %2809 = vrsqrt.f32 %v646_v24 }
 0x2b0   : > { %v2810_v25 = vpop.eup %2809 }
 0x2b1   : > { %v648_v27 = vmul.f32 %v2810_v25, %v641_v9 }
 0x2b3   : > { %v655_v29 = vmul.f32 %v2237_v26, %v648_v27 }
 0x2b5   : > { %v662_v30 = vadd.f32 %v2238_v28, %v655_v29 }
 0x2b7   : > { %v663_v32 = vpack.c.bf16 %v662_v30, %v662_v30 }
 0x2b9   : > { %664 = vst [vmem:[#allocation2] sm:$0xf] %v663_v32  ;;  %2425 = vmatmul.mubr.bf16.vlgmr.msra.gmra.mrb[0].mxu0 %v663_v32  ;;  %2445 = vmatmul.mubr.bf16.vlgmr.msra.gmra.mrb[0].mxu1 %v663_v32 }
 0x2ba   : > { %2449 = vmatpush3.bf16.msra.mxu0 %v2747_v31  ;;  %2464 = vmatprep.mubr.msk.bf16.mxu0 %vm3327_vm0, %v3326_v3 }
 0x2bb   : > { %2450 = vmatprep.subr.bf16.mxu0 %v3326_v3  ;;  %2470 = vmatprep.mubr.msk.bf16.mxu1 %vm3327_vm0, %v3326_v3 }
 0x2be   : > { %2451 = vmatpush3.bf16.msra.mxu0 %v2748_v33 }
 0x2bf   : > { %2452 = vmatprep.subr.bf16.mxu0 %v3326_v3 }
 0x2c0   : > { %v897_v40 = vld [vmem:[#allocation2] sm:$0xf] }
 0x2c2   : > { %2453 = vmatpush3.bf16.msra.mxu0 %v2749_v34 }
 0x2c3   : > { %2454 = vmatprep.subr.bf16.mxu0 %v3326_v3 }
 0x2c6   : > { %2455 = vmatpush3.bf16.msra.mxu0 %v2750_v35 }
 0x2c7   : > { %2456 = vmatprep.subr.bf16.mxu0 %v3326_v3 }
 0x2ca   : > { %2457 = vmatpush3.bf16.msra.mxu0 %v2751_v36 }
 0x2cb   : > { %2458 = vmatprep.subr.bf16.mxu0 %v3326_v3 }
 0x2ce   : > { %2459 = vmatpush3.bf16.msra.mxu0 %v2752_v37 }
 0x2cf   : > { %2460 = vmatprep.subr.bf16.mxu0 %v3326_v3 }
 0x2d2   : > { %2461 = vmatpush3.bf16.msra.mxu0 %v2753_v38 }
 0x2d3   : > { %2462 = vmatprep.subr.bf16.mxu0 %v3326_v3 }
 0x2d6   : > { %2463 = vmatpush3.bf16.msra.mxu0 %v2754_v39 }
 0x2d7   : > { %2516 = vmatprep.subr.bf16.mxu0 %v3326_v3 }
 0x2d9   : > { %2465 = vmatmul.mubr.bf16.vlgmr.msra.gmra.mrb[4].mxu0 %v897_v40 }
 0x2da   : > { %2532 = vmatprep.mubr.msk.bf16.mxu0 %vm3327_vm0, %v3326_v3 }
 0x38c   : > { %v770_v43 = vpop.f32.mrb[0].mxu0  ;;  %v883_v44 = vpop.f32.mrb[0].mxu1 }
 0x38d   : > { %v771_v45 = vadd.f32 %v2239_v41, %v770_v43  ;;  %v884_v46 = vadd.f32 %v2248_v42, %v883_v44  ;;  %v2426_v47 = vpop.f32.mrb[1].mxu0  ;;  %v2446_v48 = vpop.f32.mrb[1].mxu1 }
 0x38e   : > { %v773_v49 = vpop.f32.mrb[2].mxu0  ;;  %v886_v50 = vpop.f32.mrb[2].mxu1 }
 0x38f   : > { %v776_v51 = vpack.c.bf16 %v771_v45, %v771_v45  ;;  %v889_v52 = vpack.c.bf16 %v884_v46, %v884_v46  ;;  %v2427_v53 = vpop.f32.mrb[3].mxu0  ;;  %v2447_v54 = vpop.f32.mrb[3].mxu1 }
 0x391   : > { %777 = vst [vmem:[#allocation3] sm:$0xf] %v776_v51  ;;  %890 = vst [vmem:[#allocation4] sm:$0xf] %v889_v52 }
 0x398   : > { %v1010_v55 = vld [vmem:[#allocation3] sm:$0xf]  ;;  %v1071_v63 = vld [vmem:[#allocation4] sm:$0xf] }
 0x399   : > { %v2755_v56 = vld [vmem:[#allocation3] ss:$0 sps:$4 sm:$0xff]   ;;  %v1016_v57 = vsel %vm1011_vm1, %v1010_v55, 0  ;;  %v1077_v4 = vsel %vm1075_vm2, %v1071_v63, 0  ;;  %v2757_v38 = vld [vmem:[#allocation4] ss:$0 sps:$4 sm:$0xff]  }
 0x39a   : > { %2469 = vmatpush3.bf16.xpose.msra.mxu1 %v1016_v57  ;;  %1129 = vrot.lane.b32.xlu0 %v2755_v56, %s3328_s14  ;;  %v2756_v32 = vld [vmem:[#allocation3] ss:$0 sps:$4 sm:$0xff]   ;;  %v2759_v63 = vld [vmem:[#allocation4] ss:$0 sps:$4 sm:$0xff]  }
 0x39b   : > { %2474 = vmatprep.subr.bf16.mxu1 %v3326_v3  ;;  %v2758_v57 = vld [vmem:[#allocation3] ss:$0 sps:$4 sm:$0xff]  }
 0x3ac   : > { %v1003_v59 = vpop.f32.mrb[4].mxu0 }
 0x3ad   : > { %v1004_v60 = vadd.f32 %v2257_v58, %v1003_v59  ;;  %v2466_v61 = vpop.f32.mrb[5].mxu0 }
 0x3ae   : > { %v1006_v62 = vpop.f32.mrb[6].mxu0 }
 0x3af   : > { %v3849_v1 = vpack.c.bf16 %v1004_v60, %v1004_v60  ;;  %v2467_v2 = vpop.f32.mrb[7].mxu0 }
 0x3b1   : > { %2471 = vmatmul.mubr.msk.bf16.vlgmr.msra.gmra.mrb[4].mxu1 %vm1011_vm1, %v3849_v1 }
 0x3b2   : > { %2475 = vmatpush3.bf16.msra.mxu1 %v1077_v4  ;;  %2476 = vmatprep.mubr.msk.bf16.mxu1 %vm3327_vm0, %v3326_v3 }
 0x3b3   : > { %2480 = vmatprep.subr.bf16.mxu1 %v3326_v3 }
 0x40c   : > { %v1130_v18 = vpop.permute.xlu0 %1129 }
 0x40d   : > { %v1135_v20 = vsel %vm1011_vm1, %v1130_v18, 0 }
 0x484   : > { %v1052_v5 = vpop.f32.mrb[4].mxu1 }
 0x485   : > { %v2472_v6 = vpop.f32.mrb[5].mxu1  ;;  %v1059_v7 = vsel %vm1058_vm3, %v1052_v5, -inf }
 0x486   : > { %1060 = vmax.xlane.f32.xlu1 %v1059_v7  ;;  %v1055_v8 = vpop.f32.mrb[6].mxu1 }
 0x487   : > { %v2473_v9 = vpop.f32.mrb[7].mxu1 }
 0x513   : > { %v1061_v10 = vpop.xlane.xlu1 %1060 }
 0x514   : > { %v1062_v11 = vsub.f32 %v1052_v5, %v1061_v10 }
 0x516   : > { %v1063_v12 = vmul.f32 1.442695, %v1062_v11 }
 0x518   : > { %2811 = vpow2.f32 %v1063_v12 }
 0x522   : > { %v2812_v13 = vpop.eup %2811 }
 0x523   : > { %v1065_v14 = vsel %vm1058_vm3, %v2812_v13, 0.0 }
 0x524   : > { %1066 = vadd.xlane.f32.xlu1 %v1065_v14 }
 0x535   : > { %1124 = vrot.lane.b32.xlu1 %v3849_v1, %s3328_s14 }
 0x5b1   : > { %v1067_v15 = vpop.xlane.xlu1 %1066 }
 0x5b2   : > { %2813 = vrcp.f32 %v1067_v15 }
 0x5b5   : > { %v1125_v21 = vpop.permute.xlu1 %1124 }
 0x5bc   : > { %v2814_v16 = vpop.eup %2813 }
 0x5bd   : > { %v1069_v17 = vmul.f32 %v2814_v16, %v2812_v13 }
 0x5bf   : > { %v1070_v19 = vpack.c.bf16 %v1069_v17, %v1069_v17 }
 0x5c1   : > { %2477 = vmatmul.mubr.msk.bf16.vlgmr.msra.gmra.mrb[8].mxu1 %vm1058_vm3, %v1070_v19 }
 0x5c2   : > { %2481 = vmatpush3.bf16.xpose.msra.mxu1 %v1135_v20  ;;  %2482 = vmatprep.mubr.msk.bf16.mxu1 %vm3327_vm0, %v3326_v3  ;;  %v2760_v20 = vld [vmem:[#allocation4] ss:$0 sps:$4 sm:$0xff]  }
 0x5c3   : > { %2486 = vmatprep.subr.bf16.mxu1 %v3326_v3 }
 0x5c9   : > { %2483 = vmatmul.mubr.msk.bf16.vlgmr.msra.gmra.mrb[12].mxu1 %vm1011_vm1, %v1125_v21 }
 0x5ca   : > { %2488 = vmatprep.mubr.msk.bf16.mxu1 %vm3327_vm0, %v3326_v3 }
 0x694   : > { %v1113_v22 = vpop.f32.mrb[8].mxu1 }
 0x695   : > { %v1119_v23 = vpack.c.bf16 %v1113_v22, %v1113_v22  ;;  %v2478_v24 = vpop.f32.mrb[9].mxu1 }
 0x696   : > { %v1116_v25 = vpop.f32.mrb[10].mxu1 }
 0x697   : > { %1121 = vst.msk [vmem:[#allocation5] sm:$0xf] %vm1120_vm4, %v1119_v23  ;;  %v2479_v26 = vpop.f32.mrb[11].mxu1 }
 0x69c   : > { %v1171_v27 = vpop.f32.mrb[12].mxu1 }
 0x69d   : > { %v2484_v28 = vpop.f32.mrb[13].mxu1  ;;  %v1177_v29 = vsel %vm1058_vm3, %v1171_v27, -inf }
 0x69e   : > { %1178 = vmax.xlane.f32.xlu1 %v1177_v29  ;;  %v1174_v30 = vpop.f32.mrb[14].mxu1 }
 0x69f   : > { %v2485_v31 = vpop.f32.mrb[15].mxu1 }
 0x6af   : > { %1256 = vrot.lane.b32.xlu1 %v2756_v32, %s3329_s15 }
 0x6b3   : > { %1251 = vrot.lane.b32.xlu1 %v3849_v1, %s3329_s15 }
 0x72b   : > { %v1179_v33 = vpop.xlane.xlu1 %1178 }
 0x72c   : > { %v1180_v34 = vsub.f32 %v1171_v27, %v1179_v33 }
 0x72e   : > { %v1181_v35 = vmul.f32 1.442695, %v1180_v34 }
 0x72f   : > { %v1257_v44 = vpop.permute.xlu1 %1256 }
 0x730   : > { %2815 = vpow2.f32 %v1181_v35  ;;  %v1262_v46 = vsel %vm1011_vm1, %v1257_v44, 0 }
 0x733   : > { %v1252_v47 = vpop.permute.xlu1 %1251 }
 0x73a   : > { %v2816_v36 = vpop.eup %2815 }
 0x73b   : > { %v1183_v37 = vsel %vm1058_vm3, %v2816_v36, 0.0 }
 0x73c   : > { %1184 = vadd.xlane.f32.xlu0 %v1183_v37  ;;  %v2762_v37 = vld [vmem:[#allocation15 + $0x8] sm:$0xff]  }
 0x752   : > { %1193 = vrot.lane.b32.xlu0 %v2757_v38, %s3328_s14  ;;  %v2763_v38 = vld [vmem:[#allocation15 + $0x10] sm:$0xff]  }
 0x7c9   : > { %v1185_v39 = vpop.xlane.xlu0 %1184 }
 0x7ca   : > { %2817 = vrcp.f32 %v1185_v39  ;;  %v2764_v39 = vld [vmem:[#allocation15 + $0x18] sm:$0xff]  }
 0x7cd   : > { %v1194_v40 = vpop.permute.xlu0 %1193 }
 0x7ce   : > { %v1199_v41 = vsel %vm1075_vm2, %v1194_v40, 0  ;;  %v2765_v40 = vld [vmem:[#allocation15 + $0x20] sm:$0xff]  }
 0x7cf   : > { %2487 = vmatpush3.bf16.msra.mxu1 %v1199_v41  ;;  %v2766_v41 = vld [vmem:[#allocation15 + $0x28] sm:$0xff]  }
 0x7d0   : > { %2492 = vmatprep.subr.bf16.mxu1 %v3326_v3 }
 0x7d4   : > { %v2818_v42 = vpop.eup %2817 }
 0x7d5   : > { %v1187_v43 = vmul.f32 %v2818_v42, %v2816_v36  ;;  %v2761_v36 = vld [vmem:[#allocation15] sm:$0xff]   ;;  %v2767_v42 = vld [vmem:[#allocation15 + $0x30] sm:$0xff]  }
 0x7d6   : > { %2517 = vmatpush3.bf16.msra.mxu0 %v2761_v36  ;;  %v2804_v36 = vld [vmem:[#allocation24 + $0x28] sm:$0xff]  }
 0x7d7   : > { %v1188_v45 = vpack.c.bf16 %v1187_v43, %v1187_v43  ;;  %2518 = vmatprep.subr.bf16.mxu0 %v3326_v3  ;;  %v2768_v43 = vld [vmem:[#allocation15 + $0x38] sm:$0xff]  }
 0x7d9   : > { %2489 = vmatmul.mubr.msk.bf16.vlgmr.msra.gmra.mrb[16].mxu1 %vm1058_vm3, %v1188_v45 }
 0x7da   : > { %2493 = vmatpush3.bf16.xpose.msra.mxu1 %v1262_v46  ;;  %2494 = vmatprep.mubr.msk.bf16.mxu1 %vm3327_vm0, %v3326_v3 }
 0x7db   : > { %2498 = vmatprep.subr.bf16.mxu1 %v3326_v3  ;;  %2519 = vmatpush3.bf16.msra.mxu0 %v2762_v37  ;;  %v2805_v37 = vld [vmem:[#allocation24 + $0x70] sm:$0xff]  }
 0x7dc   : > { %2520 = vmatprep.subr.bf16.mxu0 %v3326_v3 }
 0x7df   : > { %2521 = vmatpush3.bf16.msra.mxu0 %v2763_v38  ;;  %v2806_v38 = vld [vmem:[#allocation24 + $0x30] sm:$0xff]  }
 0x7e0   : > { %2522 = vmatprep.subr.bf16.mxu0 %v3326_v3 }
 0x7e1   : > { %2495 = vmatmul.mubr.msk.bf16.vlgmr.msra.gmra.mrb[20].mxu1 %vm1011_vm1, %v1252_v47 }
 0x7e2   : > { %2500 = vmatprep.mubr.msk.bf16.mxu1 %vm3327_vm0, %v3326_v3 }
 0x7e3   : > { %2523 = vmatpush3.bf16.msra.mxu0 %v2764_v39  ;;  %v2807_v39 = vld [vmem:[#allocation24 + $0x78] sm:$0xff]  }
 0x7e4   : > { %2524 = vmatprep.subr.bf16.mxu0 %v3326_v3 }
 0x7e7   : > { %2525 = vmatpush3.bf16.msra.mxu0 %v2765_v40  ;;  %v2808_v40 = vld [vmem:[#allocation24 + $0x38] sm:$0xff]  }
 0x7e8   : > { %2526 = vmatprep.subr.bf16.mxu0 %v3326_v3 }
 0x7eb   : > { %2527 = vmatpush3.bf16.msra.mxu0 %v2766_v41  ;;  %v1664_v41 = vlaneseq }
 0x7ec   : > { %2528 = vmatprep.subr.bf16.mxu0 %v3326_v3 }
 0x7ef   : > { %2529 = vmatpush3.bf16.msra.mxu0 %v2767_v42  ;;  %v1665_v42 = vshrl.u32 %v1664_v41, 7 }
 0x7f0   : > { %2530 = vmatprep.subr.bf16.mxu0 %v3326_v3 }
 0x7f3   : > { %2531 = vmatpush3.bf16.msra.mxu0 %v2768_v43  ;;  %v1666_v43 = vsub.s32 0, %v1665_v42 }
 0x8ac   : > { %v3885_v48 = vpop.f32.mrb[16].mxu1 }
 0x8ad   : > { %v2490_v49 = vpop.f32.mrb[17].mxu1  ;;  %v2331_v29 = vpack.c.bf16 %v3885_v48, %v3885_v48 }
 0x8ae   : > { %v1238_v50 = vpop.f32.mrb[18].mxu1 }
 0x8af   : > { %v2491_v51 = vpop.f32.mrb[19].mxu1 }
 0x8b0   : > { %v2283_v51 = vld [vmem:[#allocation17] ss:$0 sm:$0xff] }
 0x8b4   : > { %v1298_v52 = vpop.f32.mrb[20].mxu1 }
 0x8b5   : > { %v2496_v53 = vpop.f32.mrb[21].mxu1  ;;  %v1304_v54 = vsel %vm1058_vm3, %v1298_v52, -inf }
 0x8b6   : > { %1305 = vmax.xlane.f32.xlu1 %v1304_v54  ;;  %v1301_v55 = vpop.f32.mrb[22].mxu1 }
 0x8b7   : > { %v2497_v56 = vpop.f32.mrb[23].mxu1 }
 0x8c7   : > { %1383 = vrot.lane.b32.xlu1 %v2758_v57, %s3330_s21  ;;  %v2769_v57 = vld [vmem:[#allocation21] ss:$8 sps:$4 sm:$0xff]  }
 0x8cb   : > { %1378 = vrot.lane.b32.xlu1 %v3849_v1, %s3330_s21 }
 0x943   : > { %v1306_v58 = vpop.xlane.xlu1 %1305 }
 0x944   : > { %v1307_v59 = vsub.f32 %v1298_v52, %v1306_v58  ;;  %v2771_v58 = vld [vmem:[#allocation21 + $0x4] ss:$8 sps:$4 sm:$0xff]  }
 0x946   : > { %v1308_v60 = vmul.f32 1.442695, %v1307_v59  ;;  %v2774_v59 = vld [vmem:[#allocation21 + $0x14] ss:$8 sps:$4 sm:$0xff]  }
 0x947   : > { %v1384_v7 = vpop.permute.xlu1 %1383 }
 0x948   : > { %2819 = vpow2.f32 %v1308_v60  ;;  %v1389_v9 = vsel %vm1011_vm1, %v1384_v7, 0  ;;  %v2772_v60 = vld [vmem:[#allocation21 + $0x10] ss:$8 sps:$4 sm:$0xff]   ;;  %v2781_v7 = vld [vmem:[#allocation21 + $0x40] ss:$8 sps:$4 sm:$0xff]  }
 0x94b   : > { %v1379_v10 = vpop.permute.xlu1 %1378 }
 0x952   : > { %v2820_v61 = vpop.eup %2819 }
 0x953   : > { %v1310_v62 = vsel %vm1058_vm3, %v2820_v61, 0.0 }
 0x954   : > { %1311 = vadd.xlane.f32.xlu0 %v1310_v62  ;;  %v2775_v62 = vld [vmem:[#allocation21 + $0x20] ss:$8 sps:$4 sm:$0xff]  }
 0x96a   : > { %1320 = vrot.lane.b32.xlu0 %v2759_v63, %s3329_s15 }
 0x9e1   : > { %v1312_v2 = vpop.xlane.xlu0 %1311 }
 0x9e2   : > { %2821 = vrcp.f32 %v1312_v2 }
 0x9e5   : > { %v1321_v4 = vpop.permute.xlu0 %1320 }
 0x9e6   : > { %v1326_v5 = vsel %vm1075_vm2, %v1321_v4, 0 }
 0x9e7   : > { %2499 = vmatpush3.bf16.msra.mxu1 %v1326_v5  ;;  %v2780_v5 = vld [vmem:[#allocation21 + $0x34] ss:$8 sps:$4 sm:$0xff]  }
 0x9e8   : > { %2504 = vmatprep.subr.bf16.mxu1 %v3326_v3 }
 0x9ec   : > { %v2822_v1 = vpop.eup %2821 }
 0x9ed   : > { %v1314_v6 = vmul.f32 %v2822_v1, %v2820_v61  ;;  %v2777_v61 = vld [vmem:[#allocation21 + $0x24] ss:$8 sps:$4 sm:$0xff]   ;;  %v2778_v1 = vld [vmem:[#allocation21 + $0x30] ss:$8 sps:$4 sm:$0xff]  }
 0x9ef   : > { %v1315_v8 = vpack.c.bf16 %v1314_v6, %v1314_v6  ;;  %v2783_v6 = vld [vmem:[#allocation21 + $0x44] ss:$8 sps:$4 sm:$0xff]  }
 0x9f1   : > { %2501 = vmatmul.mubr.msk.bf16.vlgmr.msra.gmra.mrb[24].mxu1 %vm1058_vm3, %v1315_v8  ;;  %v2786_v8 = vld [vmem:[#allocation21 + $0x54] ss:$8 sps:$4 sm:$0xff]  }
 0x9f2   : > { %2505 = vmatpush3.bf16.xpose.msra.mxu1 %v1389_v9  ;;  %2506 = vmatprep.mubr.msk.bf16.mxu1 %vm3327_vm0, %v3326_v3  ;;  %v2784_v9 = vld [vmem:[#allocation21 + $0x50] ss:$8 sps:$4 sm:$0xff]  }
 0x9f3   : > { %2510 = vmatprep.subr.bf16.mxu1 %v3326_v3 }
 0x9f9   : > { %2507 = vmatmul.mubr.msk.bf16.vlgmr.msra.gmra.mrb[28].mxu1 %vm1011_vm1, %v1379_v10  ;;  %v2789_v10 = vld [vmem:[#allocation21 + $0x64] ss:$8 sps:$4 sm:$0xff]  }
 0x9fa   : > { %2512 = vmatprep.mubr.msk.bf16.mxu1 %vm3327_vm0, %v3326_v3 }
 0xac4   : > { %v1362_v11 = vpop.f32.mrb[24].mxu1 }
 0xac5   : > { %v2502_v12 = vpop.f32.mrb[25].mxu1  ;;  %v2332_v21 = vpack.c.bf16 %v1362_v11, %v1362_v11  ;;  %v2787_v11 = vld [vmem:[#allocation21 + $0x60] ss:$8 sps:$4 sm:$0xff]  }
 0xac6   : > { %v1365_v13 = vpop.f32.mrb[26].mxu1  ;;  %v2792_v12 = vld [vmem:[#allocation21 + $0x74] ss:$8 sps:$4 sm:$0xff]  }
 0xac7   : > { %v2503_v14 = vpop.f32.mrb[27].mxu1  ;;  %v3331_v13 = vmov 0  }
 0xac8   : > { %v2790_v14 = vld [vmem:[#allocation21 + $0x70] ss:$8 sps:$4 sm:$0xff]  }
 0xacc   : > { %v1425_v15 = vpop.f32.mrb[28].mxu1 }
 0xacd   : > { %v2508_v16 = vpop.f32.mrb[29].mxu1  ;;  %v1431_v17 = vsel %vm1058_vm3, %v1425_v15, -inf }
 0xace   : > { %1432 = vmax.xlane.f32.xlu0 %v1431_v17  ;;  %v1428_v18 = vpop.f32.mrb[30].mxu1 }
 0xacf   : > { %v2509_v19 = vpop.f32.mrb[31].mxu1 }
 0xad0   : > { %v2292_v19 = vld [vmem:[#allocation18] ss:$0 sm:$0xff] }
 0xae4   : > { %1447 = vrot.lane.b32.xlu0 %v2760_v20, %s3330_s21 }
 0xae8   : > { %1372 = vrot.lane.b32.xlu0 %v2332_v21, %s3329_s15  ;;  %v2293_v21 = vld [vmem:[#allocation20] ss:$0 sm:$0xff]  ;;  %s3199_s15 = scalar_lea.vmem %s3934_s23, 128 }
 0xae9   : > { %p3200_p11 = scmp.ne.s32.totalorder %s3934_s23, %s3199_s15 }
 0xaeb   : > { %p3201_p5 = pnand %p3200_p11, %p4043_p0 }
 0xaed   : > { %p3202_p7 = pneg %p3201_p5 }
 0xb5b   : > { %v1433_v22 = vpop.xlane.xlu0 %1432 }
 0xb5c   : > { %v1434_v23 = vsub.f32 %v1425_v15, %v1433_v22 }
 0xb5e   : > { %v1435_v24 = vmul.f32 1.442695, %v1434_v23 }
 0xb5f   : > { %v1448_v25 = vpop.permute.xlu0 %1447 }
 0xb60   : > { %2823 = vpow2.f32 %v1435_v24  ;;  %v1453_v26 = vsel %vm1075_vm2, %v1448_v25, 0  ;;  %v2793_v25 = vld [vmem:[#allocation24 + $0x40] sm:$0xff]  }
 0xb61   : > { %2511 = vmatpush3.bf16.msra.mxu1 %v1453_v26  ;;  %v2794_v26 = vld [vmem:[#allocation24] sm:$0xff]   ;;  %2386 = vmatprep.subr.bf16.mxu0 %v2793_v25 }
 0xb62   : > { %1754 = vmatprep.subr.bf16.mxu1 %v2771_v58 }
 0xb63   : > { %v1373_v32 = vpop.permute.xlu0 %1372 }
 0xb6a   : > { %v2824_v27 = vpop.eup %2823 }
 0xb6b   : > { %v1437_v28 = vsel %vm1058_vm3, %v2824_v27, 0.0 }
 0xb6c   : > { %1438 = vadd.xlane.f32.xlu1 %v1437_v28  ;;  %v2796_v28 = vld [vmem:[#allocation24 + $0x8] sm:$0xff]  }
 0xb7d   : > { %1245 = vrot.lane.b32.xlu1 %v2331_v29, %s3330_s21  ;;  %v2797_v29 = vld [vmem:[#allocation24 + $0x50] sm:$0xff]   ;;  %s3203_s21 = sshll.u32 %s3332_s1, 4  ;;  %s3204_s21 = int_to_ptr.vmem [resolvable:$false] %s3203_s21 }
 0xb7e   : > { %s3205_s0 = scalar_lea.vmem %s3204_s21, 256  ;;  %p3206_p10 = scmp.lt.s32.totalorder %s3934_s23, %s3204_s21 }
 0xb7f   : > { %p3207_p13 = scmp.lt.s32.totalorder %s3205_s0, %s3199_s15 }
 0xb81   : > { %p3208_p2 = por %p3207_p13, %p3206_p10 }
 0xb83   : > { %p3209_p8 = pnand %p3208_p2, %p3202_p7 }
 0xbf9   : > { %v1439_v30 = vpop.xlane.xlu1 %1438 }
 0xbfa   : > { %2825 = vrcp.f32 %v1439_v30  ;;  %v2798_v30 = vld [vmem:[#allocation24 + $0x10] sm:$0xff]  }
 0xbfd   : > { %v1246_v31 = vpop.permute.xlu1 %1245 }
 0xbfe   : > { %1249 = vst.msk [vmem:[#allocation5] sm:$0xf] %vm1248_vm5, %v1246_v31  ;;  %v2799_v31 = vld [vmem:[#allocation24 + $0x58] sm:$0xff]  }
 0xbff   : > { %1376 = vst.msk [vmem:[#allocation5] sm:$0xf] %vm1375_vm6, %v1373_v32  ;;  %v2800_v32 = vld [vmem:[#allocation24 + $0x18] sm:$0xff]  }
 0xc04   : > { %v2826_v33 = vpop.eup %2825 }
 0xc05   : > { %v1441_v34 = vmul.f32 %v2826_v33, %v2824_v27  ;;  %v2795_v27 = vld [vmem:[#allocation24 + $0x48] sm:$0xff]   ;;  %v2801_v33 = vld [vmem:[#allocation24 + $0x60] sm:$0xff]  }
 0xc07   : > { %v1442_v35 = vpack.c.bf16 %v1441_v34, %v1441_v34  ;;  %v2802_v34 = vld [vmem:[#allocation24 + $0x20] sm:$0xff]  }
 0xc09   : > { %2513 = vmatmul.mubr.msk.bf16.vlgmr.msra.gmra.mrb[32].mxu1 %vm1058_vm3, %v1442_v35  ;;  %v2803_v35 = vld [vmem:[#allocation24 + $0x68] sm:$0xff]  }
 0xc0a   : > { %1755 = vmatpush1.bf16.msra.mxu1 %v2769_v57  ;;  %1786 = vmatprep.mubr.bf16.mxu1 %v3331_v13 }
 0xc0b   : > { %1756 = vmatprep.subr.bf16.mxu1 %v2774_v59 }
 0xc0e   : > { %1757 = vmatpush1.bf16.msra.mxu1 %v2772_v60 }
 0xc0f   : > { %1758 = vmatprep.subr.bf16.mxu1 %v2777_v61 }
 0xc12   : > { %1759 = vmatpush1.bf16.msra.mxu1 %v2775_v62 }
 0xc13   : > { %1760 = vmatprep.subr.bf16.mxu1 %v2780_v5 }
 0xc16   : > { %1761 = vmatpush1.bf16.msra.mxu1 %v2778_v1 }
 0xc17   : > { %1762 = vmatprep.subr.bf16.mxu1 %v2783_v6 }
 0xc1a   : > { %1763 = vmatpush1.bf16.msra.mxu1 %v2781_v7 }
 0xc1b   : > { %1764 = vmatprep.subr.bf16.mxu1 %v2786_v8 }
 0xc1e   : > { %1765 = vmatpush1.bf16.msra.mxu1 %v2784_v9 }
 0xc1f   : > { %1766 = vmatprep.subr.bf16.mxu1 %v2789_v10 }
 0xc22   : > { %1767 = vmatpush1.bf16.msra.mxu1 %v2787_v11 }
 0xc23   : > { %1768 = vmatprep.subr.bf16.mxu1 %v2792_v12  ;;  %v2310_v12 = vld [vmem:[#allocation26] ss:$0 sm:$0xff] }
 0xc26   : > { %1769 = vmatpush1.bf16.msra.mxu1 %v2790_v14 }
 0xcdc   : > { %v1489_v44 = vpop.f32.mrb[32].mxu1 }
 0xcdd   : > { %v2333_v45 = vpack.c.bf16 %v1489_v44, %v1489_v44  ;;  %v2514_v46 = vpop.f32.mrb[33].mxu1  ;;  %v1662_v44 = vld [vmem:[#allocation23] sm:$0x3] }
 0xcde   : > { %v1492_v47 = vpop.f32.mrb[34].mxu1  ;;  %v1667_v46 = vrot.slane %v1662_v44, %v1666_v43 }
 0xcdf   : > { %1499 = vrot.lane.b32.xlu1 %v2333_v45, %s3328_s14  ;;  %v2515_v48 = vpop.f32.mrb[35].mxu1  ;;  %v1670_v45 = vsub.s32 1, %v1665_v42  ;;  %s1993_s14 = scalar_lea.sflag [#allocation8], %s3772_s20 }
 0xce1   : > { %v1671_v47 = vrot.slane %v1662_v44, %v1670_v45 }
 0xd51   : > { %v1500_v49 = vpop.permute.xlu1 %1499 }
 0xd52   : > { %1503 = vst.msk [vmem:[#allocation5] sm:$0xf] %vm1502_vm7, %v1500_v49 }
 0xd59   : > { %v1504_v50 = vld [vmem:[#allocation5] sm:$0xf] }
 0xd5a   : > { %2533 = vmatmul.mubr.bf16.vlgmr.msra.gmra.mrb[8].mxu0 %v1504_v50 }
 0xd5b   : > { %2387 = vmatpush3.bf16.msra.mxu0 %v2794_v26 }
 0xd5c   : > { %2388 = vmatprep.subr.bf16.mxu0 %v2795_v27 }
 0xd5f   : > { %2389 = vmatpush3.bf16.msra.mxu0 %v2796_v28 }
 0xd60   : > { %2390 = vmatprep.subr.bf16.mxu0 %v2797_v29 }
 0xd63   : > { %2391 = vmatpush3.bf16.msra.mxu0 %v2798_v30 }
 0xd64   : > { %2392 = vmatprep.subr.bf16.mxu0 %v2799_v31 }
 0xd67   : > { %2393 = vmatpush3.bf16.msra.mxu0 %v2800_v32 }
 0xd68   : > { %2394 = vmatprep.subr.bf16.mxu0 %v2801_v33 }
 0xd6b   : > { %2395 = vmatpush3.bf16.msra.mxu0 %v2802_v34 }
 0xd6c   : > { %2396 = vmatprep.subr.bf16.mxu0 %v2803_v35 }
 0xd6f   : > { %2397 = vmatpush3.bf16.msra.mxu0 %v2804_v36 }
 0xd70   : > { %2398 = vmatprep.subr.bf16.mxu0 %v2805_v37 }
 0xd73   : > { %2399 = vmatpush3.bf16.msra.mxu0 %v2806_v38 }
 0xd74   : > { %2400 = vmatprep.subr.bf16.mxu0 %v2807_v39 }
 0xd77   : > { %2401 = vmatpush3.bf16.msra.mxu0 %v2808_v40 }
 0xe2d   : > { %v1610_v52 = vpop.f32.mrb[8].mxu0 }
 0xe2e   : > { %v1611_v53 = vadd.f32 %v2283_v51, %v1610_v52  ;;  %v2534_v54 = vpop.f32.mrb[9].mxu0 }
 0xe2f   : > { %v1613_v55 = vpop.f32.mrb[10].mxu0 }
 0xe30   : > { %v3921_v3 = vadd.f32 %v1611_v53, %v3806_v0  ;;  %v2535_v56 = vpop.f32.mrb[11].mxu0 }
 0xe32   : > { %1619 = vadd.xlane.f32.xlu0 %v3921_v3 }
 0xebf   : > { %v1620_v63 = vpop.xlane.xlu0 %1619 }
 0xec0   : > { %v1622_v2 = vmul.f32 0.0078125, %v1620_v63 }
 0xec2   : > { %v1623_v0 = vsub.f32 %v3921_v3, %v1622_v2 }
 0xec4   : > { %v1624_v4 = vmul.f32 %v1623_v0, %v1623_v0 }
 0xec6   : > { %1625 = vadd.xlane.f32.xlu1 %v1624_v4 }
 0xf53   : > { %v1626_v15 = vpop.xlane.xlu1 %1625 }
 0xf54   : > { %v1627_v16 = vmul.f32 0.0078125, %v1626_v15 }
 0xf56   : > { %v1628_v17 = vadd.f32 1e-05, %v1627_v16 }
 0xf58   : > { %2827 = vrsqrt.f32 %v1628_v17 }
 0xf62   : > { %v2828_v18 = vpop.eup %2827 }
 0xf63   : > { %v1630_v20 = vmul.f32 %v2828_v18, %v1623_v0 }
 0xf65   : > { %v1637_v22 = vmul.f32 %v2292_v19, %v1630_v20 }
 0xf67   : > { %v1644_v23 = vadd.f32 %v2293_v21, %v1637_v22 }
 0xf69   : > { %v1645_v24 = vpack.c.bf16 %v1644_v23, %v1644_v23 }
 0xf6b   : > { %1787 = vmatmul.mubr.bf16.vlgmr.msra.gmra.mrb[36].mxu1 %v1645_v24 }
0x103e   : > { %v1788_v48 = vpop.f32.mrb[36].mxu1 }
0x103f   : > { %v1789_v49 = vadd.f32 %v1788_v48, %v1667_v46  ;;  %v1790_v50 = vpop.f32.mrb[37].mxu1 }
0x1040   : > { %v1791_v51 = vadd.f32 %v1790_v50, %v1671_v47  ;;  %v1792_v52 = vpop.f32.mrb[38].mxu1 }
0x1041   : > { %v1797_v53 = vmul.f32 0.044715, %v1789_v49  ;;  %v1793_v54 = vpop.f32.mrb[39].mxu1  ;;  %v1795_v4 = vmul.f32 0.5, %v1789_v49 }
0x1042   : > { %v1798_v55 = vmul.f32 0.044715, %v1791_v51  ;;  %v1796_v1 = vmul.f32 0.5, %v1791_v51 }
0x1043   : > { %v1799_v56 = vmul.f32 %v1797_v53, %v1789_v49 }
0x1044   : > { %v1800_v57 = vmul.f32 %v1798_v55, %v1791_v51 }
0x1045   : > { %v1801_v58 = vmul.f32 %v1799_v56, %v1789_v49 }
0x1046   : > { %v1802_v59 = vmul.f32 %v1800_v57, %v1791_v51 }
0x1047   : > { %v1803_v60 = vadd.f32 %v1801_v58, %v1789_v49 }
0x1048   : > { %v1804_v61 = vadd.f32 %v1802_v59, %v1791_v51 }
0x1049   : > { %v1805_v62 = vmul.f32 0.7978846, %v1803_v60 }
0x104a   : > { %v1806_v63 = vmul.f32 0.7978846, %v1804_v61 }
0x104b   : > { %2829 = vtanh.f32 %v1805_v62 }
0x104c   : > { %2831 = vtanh.f32 %v1806_v63 }
0x1055   : > { %v2830_v2 = vpop.eup %2829 }
0x1056   : > { %v2832_v0 = vpop.eup %2831  ;;  %v1809_v5 = vadd.f32 1.0, %v2830_v2 }
0x1057   : > { %v1810_v6 = vadd.f32 1.0, %v2832_v0 }
0x1058   : > { %v1811_v7 = vmul.f32 %v1809_v5, %v1795_v4 }
0x1059   : > { %v1812_v8 = vmul.f32 %v1810_v6, %v1796_v1 }
0x105a   : > { %v1813_v10 = vpack.c.bf16 %v1811_v7, %v1811_v7 }
0x105b   : > { %v1814_v9 = vpack.c.bf16 %v1812_v8, %v1812_v8 }
0x105d   : > { %1982 = vmatprep.mubr.bf16.mxu0 %v1814_v9 }
0x105e   : > { %1983 = vmatmul.mubr.bf16.vlgmr.msra.gmra.mrb[12].mxu0 %v1813_v10 }
0x1131   : > { %v2402_v11 = vpop.f32.mrb[12].mxu0 }
0x1132   : > { %v2403_v13 = vpop.f32.mrb[13].mxu0 }
0x1133   : > { %v2404_v14 = vadd.f32 %v2403_v13, %v2402_v11  ;;  %v2405_v15 = vpop.f32.mrb[14].mxu0 }
0x1134   : > { %v2406_v16 = vpop.f32.mrb[15].mxu0 }
0x1135   : > { %v1985_v17 = vadd.f32 %v2404_v14, %v2310_v12 }
0x1137   : > { %v1990_v18 = vadd.f32 %v1985_v17, %v3921_v3 }
0x1139   : > { %1991 = vst [vmem:[%s627_s16] sm:$0xff] %v1990_v18 }
0x113a   : > { %3212 = shalt.err (!%p3209_p8)
}
0x113b   : > { %s3213_s20 = scalar_lea.hbm %s3932_s19, 128  ;;  %s3217_s17 = scalar_lea.hbm %s4042_s18, 256 }
0x113c   : > { %p3214_p9 = scmp.ne.s32.totalorder %s3932_s19, %s3213_s20  ;;  %p3218_p3 = scmp.lt.u32.totalorder %s3932_s19, %s4042_s18 }
0x113d   : > { %p3219_p1 = scmp.lt.u32.totalorder %s3217_s17, %s3213_s20  ;;  %p3221_p11 = scmp.lt.u32.totalorder %s3213_s20, %s3932_s19 }
0x113e   : > { %p3215_p4 = pnand %p3214_p9, %p4043_p0 }
0x113f   : > { %p3220_p12 = por %p3219_p1, %p3218_p3 }
0x1140   : > { %p3216_p6 = pneg %p3215_p4 }
0x1141   : > { %p3222_p5 = por %p3221_p11, %p3220_p12 }
0x1143   : > { %p3223_p7 = pnand %p3222_p5, %p3216_p6 }
0x1145   : > { %3226 = shalt.err (!%p3223_p7)
}
0x1146   : > { %2586 = dma.vmem_to_hbm [thread:$0]  (%p4043_p0), %s3934_s23, 128, %s3932_s19, %s1993_s14  }
0x1147 PF: > { %s4044_s15 = sld [smem:[#allocation36_spill]]  ;;  %p4045_p10 = scmp.ne.s32.totalorder %s4033_s25, 0 }
0x1148   : > { %p4046_p13 = scmp.ge.s32.totalorder %s3305_s30, 2 }
0x114a   : > { %p2630_p2 = pnand %p4046_p13, %p4045_p10 }
0x114d   : > { %s2019_s21 = sand.u32 1, %s4044_s15  }
0x114e   : > { %s2020_s0 = scalar_lea.sflag [#allocation8], %s2019_s21 }
0x114f   : > { %3280 = dma.done.wait (!%p2630_p2), %s2020_s0, 128  }
0x1150   : > { %3282 = vsyncadd (!%p2630_p2), %s2020_s0, 4294967168  ;;  %s35_s30 = sadd.s32 1, %s3305_s30   ;;  %s4047_s25 = sld [smem:[#allocation37_spill]] }
0x1151   : > { %p32_p8 = scmp.ge.s32.totalorder %s35_s30, 4   ;;  %s4048_s13 = smov %s4054_s26 }
0x1152   : > { %s4049_s26 = smov %s3293_s27  ;;  %s4050_s27 = smov %s3722_s24 }
0x1153   : > { %s4051_s28 = smov %s3301_s29  ;;  %s4052_s29 = smov %s4048_s13 }
0x1154   :  { %34 = sbr.rel (!%p32_p8) target bundleno = 17 (0x11), region = 171 }
0x115b   :  { %2025 = vsyncpa [#allocation7], 1 }
0x115c   :  { %2027 = vsyncpa [#allocation7 + $0x1], 1 }
0x115d   :  { %2028 = vsyncpa [#allocation10], 1 }
0x115e   :  { %2029 = vsyncpa [#allocation13], 1 }
0x115f   :  { %2030 = vsyncpa [#allocation16], 1 }
0x1160   :  { %2031 = vsyncpa [#allocation19], 1 }
0x1161   :  { %2032 = vsyncpa [#allocation22], 1 }
0x1162   :  { %2033 = vsyncpa [#allocation25], 1 }
0x1163   :  { %2034 = vsyncpa [#allocation8], 1 }
0x1164   :  { %2036 = vsyncpa [#allocation8 + $0x1], 1 }

</bundles_post_ra>
